<compile_context>
chip_gen: v7x
topology: tpu7x:2x2x1
jax: 0.10.0
libtpu: 0.0.40
codegen_flags: <defaults>
</compile_context>

<pallas_src>
import functools

import jax
import jax.numpy as jnp
from jax import lax
from jax.experimental import pallas as pl
from jax.experimental.pallas import tpu as pltpu

IN_FEATURES = 196608   # fixed by the module definition (3 * 256 * 256)
OUT_FEATURES = 10


def _num_k_partitions_for_device():
    """One K-partition per TensorCore that can independently stream HBM.

    v7x has 2 TensorCores per chip (megacore v4/v5p also exposes 2);
    v5e / v6e have a single TensorCore, where splitting K only adds overhead
    (extra accumulator reset + partial-sum epilogue)."""
    try:
        kind = jax.devices()[0].device_kind.lower()
    except Exception:
        return 1
    if "v7" in kind:
        return 2
    if "v4" in kind or "v5p" in kind:
        return 2
    return 1


def _linear_kernel(x_ref, w_ref, b_ref, o_ref, acc_ref):
    """Tiled skinny matmul: o = x @ W.T (+ bias on partition 0).

    Grid axis 0 (p): independent K partitions ("parallel", shards across TCs).
    Grid axis 1 (k): K-slab reduction within a partition ("arbitrary").

    x_ref : (B, block_k)  f32      -- cast to the weight dtype before the dot
    w_ref : (N, block_k)  bf16/f32 -- lane-dense, contracted over last dim
    b_ref : (1, N)        f32
    o_ref : (B, N)        f32      -- written once, on the last K step
    acc_ref: (B, N) f32 persistent VMEM accumulator.
    """
    p = pl.program_id(0)
    k = pl.program_id(1)

    @pl.when(k == 0)
    def _():
        acc_ref[...] = jnp.zeros_like(acc_ref)

    compute_dtype = jnp.dtype(w_ref.dtype)
    # Explicit precision: bf16 inputs -> DEFAULT (single MXU pass, best push
    # cadence for this degenerate M=2/N=10 shape); f32 inputs -> HIGHEST so a
    # full-precision weight path matches the reference.
    precision = (lax.Precision.HIGHEST
                 if compute_dtype == jnp.dtype(jnp.float32)
                 else lax.Precision.DEFAULT)

    acc_ref[...] += lax.dot_general(
        x_ref[...].astype(compute_dtype),
        w_ref[...],
        dimension_numbers=(((1,), (1,)), ((), ())),   # contract over K (lanes)
        preferred_element_type=jnp.float32,
        precision=precision,
    )

    @pl.when(k == pl.num_programs(1) - 1)
    def _():
        # Only partition 0 adds the bias, so partial sums over partitions
        # (num_parts > 1) do not double-count it.
        bias = jnp.where(p == 0, b_ref[...], jnp.zeros_like(b_ref[...]))
        o_ref[...] = (acc_ref[...] + bias).astype(o_ref.dtype)


@functools.partial(jax.jit, static_argnames=("block_k", "num_parts"))
def _div_forward_impl(x, weight, bias, *, block_k, num_parts):
    B, K = x.shape
    N, K_w = weight.shape
    assert K == K_w, "weight K dim must match x"
    assert K % (num_parts * block_k) == 0, "K must divide by num_parts*block_k"
    num_k = K // (num_parts * block_k)   # K-steps per partition

    bias = bias.reshape(1, N).astype(jnp.float32)

    if num_parts == 1:
        # Final result written directly by the kernel -> no extra XLA epilogue.
        out_shape = jax.ShapeDtypeStruct((B, N), jnp.float32)
        out_specs = pl.BlockSpec((B, N), lambda p, k: (0, 0))
    else:
        # One partial (B, N) block per partition; leading dim squeezed.
        out_shape = jax.ShapeDtypeStruct((num_parts, B, N), jnp.float32)
        out_specs = pl.BlockSpec((None, B, N), lambda p, k: (p, 0, 0))

    bytes_accessed = (x.size * x.dtype.itemsize
                      + weight.size * weight.dtype.itemsize
                      + bias.size * bias.dtype.itemsize
                      + num_parts * B * N * 4)

    out = pl.pallas_call(
        _linear_kernel,
        out_shape=out_shape,
        grid_spec=pltpu.PrefetchScalarGridSpec(
            num_scalar_prefetch=0,
            grid=(num_parts, num_k),
            in_specs=[
                # x tile: full batch, one K-slab (lane-dense).
                pl.BlockSpec((B, block_k), lambda p, k: (0, p * num_k + k)),
                # W tile: full N (=10, full dim), one K-slab (lane-dense).
                pl.BlockSpec((N, block_k), lambda p, k: (0, p * num_k + k)),
                # Bias: tiny, resident for the whole grid.
                pl.BlockSpec((1, N), lambda p, k: (0, 0)),
            ],
            out_specs=out_specs,
            scratch_shapes=[pltpu.VMEM((B, N), jnp.float32)],
        ),
        compiler_params=pltpu.CompilerParams(
            dimension_semantics=("parallel", "arbitrary"),
            vmem_limit_bytes=32 * 1024 * 1024,
        ),
        cost_estimate=pl.CostEstimate(
            flops=2 * B * N * K,
            bytes_accessed=bytes_accessed,
            transcendentals=0,
        ),
    )(x, weight, bias)

    if num_parts == 1:
        return out
    # Tiny (num_parts, B, 10) partial-sum; bias already added by partition 0.
    return out.sum(axis=0)


def div_forward(x, weight, bias, *, block_k=49152, num_parts=None):
    """Equivalent of Div.forward: x @ weight.T + bias.

    x      : (B, K) float32
    weight : (N, K) float32 or bfloat16 (PyTorch-native layout; stream dtype)
    bias   : (1, N) float32
    """
    if num_parts is None:
        num_parts = _num_k_partitions_for_device()
    return _div_forward_impl(x, weight, bias, block_k=block_k,
                             num_parts=num_parts)


def init_linear_params(key, in_features, out_features):
    """Deterministic init mimicking torch.nn.Linear defaults:
    U(-1/sqrt(in_features), 1/sqrt(in_features)) for weight and bias.
    Weight stored in PyTorch-native (out, in) layout."""
    k_w, k_b = jax.random.split(key)
    bound = 1.0 / jnp.sqrt(jnp.float32(in_features))
    weight = jax.random.uniform(
        k_w, (out_features, in_features), jnp.float32, -bound, bound
    )
    bias = jax.random.uniform(
        k_b, (1, out_features), jnp.float32, -bound, bound
    )
    return weight, bias


if __name__ == "__main__":
    key = jax.random.PRNGKey(0)
    k_params, k_x = jax.random.split(key)

    # Parameters for linear1 (conv1/maxpool1/relu1/sigmod1 are unused in forward()).
    weight_f32, bias = init_linear_params(k_params, IN_FEATURES, OUT_FEATURES)
    # Stream-dtype weight: cast ONCE here (outside jit) so the 7.9 MB cast is
    # not re-paid per call; halves the dominant HBM traffic of the kernel.
    weight_bf16 = weight_f32.astype(jnp.bfloat16)

    # Example input: batch=2, features=196608 (linear1's required input width).
    B = 2
    x = jax.random.normal(k_x, (B, IN_FEATURES), dtype=jnp.float32)

    # Generation-adapted path (num_parts=1 on v5e/v6e, 2 on v7x).
    out = jax.block_until_ready(div_forward(x, weight_bf16, bias))
    # Also exercise the explicit 2-partition (multi-TensorCore) code path.
    out_split = jax.block_until_ready(
        div_forward(x, weight_bf16, bias, num_parts=2))

    assert out.shape == (B, OUT_FEATURES)
    assert out_split.shape == (B, OUT_FEATURES)

    # 1) Matched-precision reference (same bf16 input rounding, f32 accum):
    #    only accumulation order differs -> tight tolerance.
    ref_matched = (
        jnp.dot(x.astype(jnp.bfloat16).astype(jnp.float32),
                weight_bf16.astype(jnp.float32).T,
                precision=lax.Precision.HIGHEST,
                preferred_element_type=jnp.float32)
        + bias
    )
    assert jnp.allclose(out, ref_matched, atol=1e-3, rtol=1e-3), \
        "mismatch vs matched-precision reference"
    assert jnp.allclose(out_split, ref_matched, atol=1e-3, rtol=1e-3), \
        "mismatch vs matched-precision reference (num_parts=2)"

    # 2) Full f32 reference: bf16 streaming of the weight/x introduces ~1e-3
    #    level rounding over the K=196608 reduction -> modestly looser check.
    ref_full = (
        jnp.dot(x, weight_f32.T,
                precision=lax.Precision.HIGHEST,
                preferred_element_type=jnp.float32)
        + bias
    )
    assert jnp.allclose(out, ref_full, atol=1e-2, rtol=1e-2), \
        "mismatch vs full-precision reference"
    assert jnp.allclose(out_split, ref_full, atol=1e-2, rtol=1e-2), \
        "mismatch vs full-precision reference (num_parts=2)"

    print("KERNEL_OK")
</pallas_src>

<mosaic_0001>
module attributes {stable_mosaic.version = 11 : i64} {
  func.func @_linear_kernel(%arg0: i32, %arg1: i32, %arg2: memref<2x49152xf32, #tpu.memory_space<vmem>>, %arg3: memref<10x49152xbf16, #tpu.memory_space<vmem>>, %arg4: memref<1x10xf32, #tpu.memory_space<vmem>>, %arg5: memref<2x10xf32, #tpu.memory_space<vmem>>, %arg6: memref<2x10xf32, #tpu.memory_space<vmem>>) attributes {dimension_semantics = [#tpu.dimension_semantics<parallel>, #tpu.dimension_semantics<arbitrary>], iteration_bounds = array<i64: 1, 4>, scalar_prefetch = 0 : i64, scratch_operands = 1 : i64, tpu.core_type = #tpu.core_type<tc>, window_params = [{transform_indices = @transform_0, window_bounds = array<i64: 2, 49152>}, {transform_indices = @transform_1, window_bounds = array<i64: 10, 49152>}, {pipeline_mode = #tpu.pipeline_mode<synchronous>, transform_indices = @transform_2, window_bounds = array<i64: 1, 10>}, {pipeline_mode = #tpu.pipeline_mode<synchronous>, transform_indices = @transform_3, window_bounds = array<i64: 2, 10>}]} {
    %c0_i32 = arith.constant 0 : i32
    %0 = arith.cmpi eq, %arg1, %c0_i32 : i32
    %1 = arith.extui %0 : i1 to i32
    %c0_i32_0 = arith.constant 0 : i32
    %2 = arith.cmpi ne, %1, %c0_i32_0 : i32
    scf.if %2 {
      %cst_9 = arith.constant 0.000000e+00 : f32
      %13 = vector.broadcast %cst_9 : f32 to vector<2x10xf32>
      %c0_10 = arith.constant 0 : index
      %c0_11 = arith.constant 0 : index
      %14 = vector.load %arg6[%c0_10, %c0_11] : memref<2x10xf32, #tpu.memory_space<vmem>>, vector<2x10xf32>
      tpu.vector_store %arg6[%c0_10, %c0_11], %13 {strides = array<i32>} : memref<2x10xf32, #tpu.memory_space<vmem>>, vector<2x10xf32>,
    } else {
    }
    %c0 = arith.constant 0 : index
    %c0_1 = arith.constant 0 : index
    %3 = vector.load %arg6[%c0, %c0_1] : memref<2x10xf32, #tpu.memory_space<vmem>>, vector<2x10xf32>
    %c0_2 = arith.constant 0 : index
    %c0_3 = arith.constant 0 : index
    %4 = vector.load %arg2[%c0_2, %c0_3] : memref<2x49152xf32, #tpu.memory_space<vmem>>, vector<2x49152xf32>
    %5 = arith.truncf %4 : vector<2x49152xf32> to vector<2x49152xbf16>
    %c0_4 = arith.constant 0 : index
    %c0_5 = arith.constant 0 : index
    %6 = vector.load %arg3[%c0_4, %c0_5] : memref<10x49152xbf16, #tpu.memory_space<vmem>>, vector<10x49152xbf16>
    %cst = arith.constant dense<0.000000e+00> : vector<2x10xf32>
    %7 = tpu.matmul %5, %6, %cst {dimension_numbers = #tpu.dot_dimension_numbers<[1], [1], [0], [0], [0, 0, 1, 0], [], []>} : vector<2x49152xbf16>, vector<10x49152xbf16>, vector<2x10xf32> -> vector<2x10xf32>
    %8 = arith.addf %3, %7 : vector<2x10xf32>
    %c0_6 = arith.constant 0 : index
    %c0_7 = arith.constant 0 : index
    %9 = vector.load %arg6[%c0_6, %c0_7] : memref<2x10xf32, #tpu.memory_space<vmem>>, vector<2x10xf32>
    tpu.vector_store %arg6[%c0_6, %c0_7], %8 {strides = array<i32>} : memref<2x10xf32, #tpu.memory_space<vmem>>, vector<2x10xf32>,
    %c3_i32 = arith.constant 3 : i32
    %10 = arith.cmpi eq, %arg1, %c3_i32 : i32
    %11 = arith.extui %10 : i1 to i32
    %c0_i32_8 = arith.constant 0 : i32
    %12 = arith.cmpi ne, %11, %c0_i32_8 : i32
    scf.if %12 {
      %c0_i32_9 = arith.constant 0 : i32
      %13 = arith.cmpi eq, %arg0, %c0_i32_9 : i32
      %c0_10 = arith.constant 0 : index
      %c0_11 = arith.constant 0 : index
      %14 = vector.load %arg4[%c0_10, %c0_11] : memref<1x10xf32, #tpu.memory_space<vmem>>, vector<1x10xf32>
      %cst_12 = arith.constant 0.000000e+00 : f32
      %15 = vector.broadcast %cst_12 : f32 to vector<1x10xf32>
      %16 = arith.select %13, %14, %15 : vector<1x10xf32>
      %c0_13 = arith.constant 0 : index
      %c0_14 = arith.constant 0 : index
      %17 = vector.load %arg6[%c0_13, %c0_14] : memref<2x10xf32, #tpu.memory_space<vmem>>, vector<2x10xf32>
      %18 = vector.broadcast %16 : vector<1x10xf32> to vector<2x10xf32>
      %19 = arith.addf %17, %18 : vector<2x10xf32>
      %c0_15 = arith.constant 0 : index
      %c0_16 = arith.constant 0 : index
      %20 = vector.load %arg5[%c0_15, %c0_16] : memref<2x10xf32, #tpu.memory_space<vmem>>, vector<2x10xf32>
      tpu.vector_store %arg5[%c0_15, %c0_16], %19 {strides = array<i32>} : memref<2x10xf32, #tpu.memory_space<vmem>>, vector<2x10xf32>,
    } else {
    }
    return
  }
  func.func @transform_0(%arg0: i32, %arg1: i32) -> (i32, i32) {
    %c4_i32 = arith.constant 4 : i32
    %0 = arith.muli %arg0, %c4_i32 : i32
    %1 = arith.addi %0, %arg1 : i32
    %c0_i32 = arith.constant 0 : i32
    %c0_i32_0 = arith.constant 0 : i32
    return %c0_i32, %1 : i32, i32
  }
  func.func @transform_1(%arg0: i32, %arg1: i32) -> (i32, i32) {
    %c4_i32 = arith.constant 4 : i32
    %0 = arith.muli %arg0, %c4_i32 : i32
    %1 = arith.addi %0, %arg1 : i32
    %c0_i32 = arith.constant 0 : i32
    %c0_i32_0 = arith.constant 0 : i32
    return %c0_i32, %1 : i32, i32
  }
  func.func @transform_2(%arg0: i32, %arg1: i32) -> (i32, i32) {
    %c0_i32 = arith.constant 0 : i32
    %c0_i32_0 = arith.constant 0 : i32
    %c0_i32_1 = arith.constant 0 : i32
    return %c0_i32, %c0_i32_0 : i32, i32
  }
  func.func @transform_3(%arg0: i32, %arg1: i32) -> (i32, i32) {
    %c0_i32 = arith.constant 0 : i32
    %c0_i32_0 = arith.constant 0 : i32
    %c0_i32_1 = arith.constant 0 : i32
    return %c0_i32, %c0_i32_0 : i32, i32
  }
}

</mosaic_0001>

<bundles_post_ra>
// kernel: _div_forward_impl.1
= control target key start
LH: loop header
LB: loop body
LE: loop exit
PB: predicated region body
PF: predicated region fallthrough
CT: control target
= control target key end

     0   :  { %8 = vsyncpa [#allocation4], 0  ;;  %s15492_s0 = inlined_call_operand.hbm [shape: f32[2,196608], index: 0, kind: input, shape index: {}]   ;;  %s15493_s1 = inlined_call_operand.hbm [shape: bf16[10,196608], index: 1, kind: input, shape index: {}]   ;;  %s15494_s2 = inlined_call_operand.hbm [shape: f32[1,10], index: 2, kind: input, shape index: {}]   ;;  %s15495_s3 = inlined_call_operand.hbm [shape: f32[2,10], index: 3, kind: output, shape index: {}]  }
   0x1   :  { %10 = vsyncpa [#allocation4 + $0x1], 0 }
   0x2   :  { %11 = vsyncpa [#allocation7], 0 }
   0x3   :  { %13 = vsyncpa [#allocation7 + $0x1], 0 }
   0x4   :  { %14 = vsyncpa [#allocation5], 0  ;;  %s13756_s12 = smov 0   ;;  %s13758_s13 = smov 0  }
   0x5   :  { %s13760_s14 = smov 0   ;;  %s13762_s15 = smov 0  }
   0x6   :  { %s13764_s16 = smov 0   ;;  %s13766_s17 = smov 0  }
   0x7 LB: > { %s13785_s18 = sadd.s32 4294967295, %s13725_s17   ;;  %s43_s19 = sadd.s32 1, %s13713_s14  ;;  %s13725_s17 = sphi %s13766_s17, %s20_s17   ;;  %s13721_s16 = sphi %s13764_s16, %s15516_s16   ;;  %s13717_s15 = sphi %s13762_s15, %s15515_s15   ;;  %s13713_s14 = sphi %s13760_s14, %s15514_s14   ;;  %s13709_s13 = sphi %s13758_s13, %s15513_s13   ;;  %s13705_s12 = sphi %s13756_s12, %s15512_s12  }
   0x8   : > { %p50_p0 = scmp.ne.s32.totalorder %s13713_s14, %s13709_s13  ;;  %p56_p1 = scmp.ne.s32.totalorder %s13709_s13, %s13705_s12 }
   0x9   : > { %p15496_p2 = scmp.eq.s32.totalorder %s13785_s18, 0  ;;  %p12966_p3 = scmp.ge.s32.totalorder %s13725_s17, 1 }
   0xa   : > { %p139_p4 = scmp.lt.s32.totalorder %s13725_s17, 5  ;;  %s13727_s22 = smov [#allocation8]  }
   0xb   : > { %p13796_p5 = por %p15496_p2, %p56_p1  ;;  %s152_s23 = sshll.u32 %s13727_s22, 4  ;;  %s153_s23 = int_to_ptr.vmem [resolvable:$true] %s152_s23 }
   0xc   : > { %p13800_p6 = pnand %p12966_p3, %p139_p4  ;;  %p51_p8 = scmp.eq.s32.totalorder %s13725_s17, 0 }
   0xd   : > { %s15499_s20 = scalar_select %p13796_p5, 1, 0 }
   0xe   : > { %s15500_s21 = scalar_select %p13800_p6, 1, 0 }
   0xf   : > { %p13382_p7 = pneg %p13800_p6  ;;  %s29_s25 = sadd.s32 1, %s13721_s16 }
  0x10   : > { %p13814_p10 = scmp.ge.s32.totalorder %s29_s25, 4  ;;  %p13821_p11 = por %p51_p8, %p50_p0 }
  0x11   : > { %p13809_p9 = pnand %p13382_p7, %p15496_p2  ;;  %s13549_s30 = scalar_lea.hbm %s15494_s2, 16 }
  0x12   : > { %s15502_s26 = scalar_select %p13814_p10, 1, 0 }
  0x13   : > { %s15503_s27 = scalar_select %p13821_p11, 1, 0 }
  0x14   : > { %p13550_p13 = scmp.ne.s32.totalorder %s15494_s2, %s13549_s30  ;;  %p13551_p1 = pneg %p13809_p9 }
  0x15   : > { %p13556_p0 = scmp.lt.u32.totalorder %s13549_s30, %s15494_s2 }
  0x16   : > { %p13552_p3 = pnand %p13551_p1, %p13550_p13 }
  0x18   : > { %p13553_p4 = pneg %p13552_p3 }
  0x1a   : > { %p13558_p7 = pnand %p13556_p0, %p13553_p4 }
  0x1c   : > { %13561 = shalt.err (!%p13558_p7)
}
  0x1d   : > { %s13562_s8 = scalar_lea.vmem %s153_s23, 16  ;;  %s13569_s9 = scalar_lea.vmem %s153_s23, 32 }
  0x1e   : > { %p13563_p8 = scmp.ne.s32.totalorder %s153_s23, %s13562_s8  ;;  %p13570_p5 = scmp.lt.s32.totalorder %s153_s23, %s153_s23 }
  0x1f   : > { %p13571_p6 = scmp.lt.s32.totalorder %s13569_s9, %s13562_s8 }
  0x20   : > { %p13565_p2 = pnand %p13563_p8, %p13551_p1 }
  0x21   : > { %p13572_p11 = por %p13571_p6, %p13570_p5 }
  0x22   : > { %p13566_p12 = pneg %p13565_p2 }
  0x24   : > { %p13573_p10 = pnand %p13572_p11, %p13566_p12 }
  0x26   : > { %13576 = shalt.err (!%p13573_p10)
}
  0x27   : > { %13385 = dma.hbm_to_vmem [thread:$0]  (!%p13809_p9), %s15494_s2, 16, %s153_s23, [#allocation7]  }
  0x28   : > { %p15504_p2 = scmp.ne.s32.totalorder %s15502_s26, 0  ;;  %s13847_s12 = sand.u32 1, %s13713_s14  }
  0x29   : > { %s13364_s22 = smul.u32 12288, %s13721_s16  ;;  %p15505_p6 = scmp.ne.s32.totalorder %s15503_s27, 0 }
  0x2a   : > { %s15518_s25 = smov (%p15504_p2, %s29_s25), 0  ;;  %s13366_s28 = smul.u32 768, %s13847_s12 }
  0x2b   : > { %s40_s24 = ssub.s32 %s13721_s16, %s15518_s25  ;;  %s13856_s4 = scalar_lea.hbm %s15492_s0, %s13364_s22 }
  0x2c   : > { %p41_p5 = scmp.eq.s32.totalorder %s40_s24, 0  ;;  %p15506_p9 = scmp.lt.s32.totalorder %s13725_s17, 4 }
  0x2d   : > { %s167_s5 = scalar_lea.vmem [#allocation3], %s13366_s28  ;;  %s13367_s7 = smul.u32 3072, %s13847_s12 }
  0x2e   : > { %p13862_p10 = pnand %p15506_p9, %p15505_p6  ;;  %s177_s6 = sshll.u32 %s167_s5, 4  ;;  %s13872_s6 = int_to_ptr.vmem [resolvable:$true] %s177_s6 }
  0x2f   : > { %s13869_s26 = scalar_select %p41_p5, %s13713_s14, %s43_s19  }
  0x30   : > { %s13365_s27 = smul.u32 24576, %s13721_s16  ;;  %s164_s8 = scalar_lea.sflag [#allocation4], %s13847_s12 }
  0x31   : > { %s13577_s9 = scalar_lea.hbm %s13856_s4, 12288  ;;  %p13579_p12 = pneg %p13862_p10 }
  0x32   : > { %p13578_p11 = scmp.ne.s32.totalorder %s13856_s4, %s13577_s9  ;;  %s13582_s19 = scalar_lea.hbm %s15492_s0, 49152 }
  0x33   : > { %p13583_p3 = scmp.lt.u32.totalorder %s13856_s4, %s15492_s0  ;;  %p13584_p4 = scmp.lt.u32.totalorder %s13582_s19, %s13577_s9 }
  0x34   : > { %p13580_p13 = pnand %p13579_p12, %p13578_p11  ;;  %p13586_p7 = scmp.lt.u32.totalorder %s13577_s9, %s13856_s4 }
  0x35   : > { %p13585_p0 = por %p13584_p4, %p13583_p3 }
  0x36   : > { %p13581_p1 = pneg %p13580_p13 }
  0x37   : > { %p13587_p8 = por %p13586_p7, %p13585_p0 }
  0x39   : > { %p13588_p2 = pnand %p13587_p8, %p13581_p1 }
  0x3b   : > { %13591 = shalt.err (!%p13588_p2)
}
  0x3c   : > { %s13592_s28 = scalar_lea.vmem %s13872_s6, 12288  ;;  %s13728_s29 = smov [#allocation3]  }
  0x3d   : > { %p13593_p5 = scmp.ne.s32.totalorder %s13872_s6, %s13592_s28  ;;  %s13597_s30 = sshll.u32 %s13728_s29, 4  ;;  %s13598_s30 = int_to_ptr.vmem [resolvable:$false] %s13597_s30 }
  0x3e   : > { %s13599_s5 = scalar_lea.vmem %s13598_s30, 24576  ;;  %p13600_p11 = scmp.lt.s32.totalorder %s13872_s6, %s13598_s30 }
  0x3f   : > { %p13595_p6 = pnand %p13593_p5, %p13579_p12  ;;  %p13601_p13 = scmp.lt.s32.totalorder %s13599_s5, %s13592_s28 }
  0x41   : > { %p13596_p9 = pneg %p13595_p6  ;;  %p13602_p3 = por %p13601_p13, %p13600_p11 }
  0x43   : > { %p13603_p4 = pnand %p13602_p3, %p13596_p9 }
  0x45   : > { %13606 = shalt.err (!%p13603_p4)
}
  0x46   : > { %13389 = dma.hbm_to_vmem [thread:$0]  (!%p13862_p10), %s13856_s4, 12288, %s13872_s6, %s164_s8  }
  0x47   : > { %s13906_s11 = scalar_lea.hbm %s15493_s1, %s13365_s27  ;;  %s188_s19 = scalar_lea.vmem [#allocation6], %s13367_s7 }
  0x48   : > { %s197_s22 = sshll.u32 %s188_s19, 4  ;;  %s184_s24 = sand.u32 1, %s13725_s17   ;;  %s13911_s22 = int_to_ptr.vmem [resolvable:$true] %s197_s22 }
  0x49   : > { %s13913_s28 = scalar_lea.sflag [#allocation7], %s184_s24  ;;  %s13607_s29 = scalar_lea.hbm %s13906_s11, 49152 }
  0x4a   : > { %p13608_p1 = scmp.ne.s32.totalorder %s13906_s11, %s13607_s29  ;;  %s13612_s12 = scalar_lea.hbm %s15493_s1, 196608 }
  0x4b   : > { %p13613_p8 = scmp.lt.u32.totalorder %s13906_s11, %s15493_s1  ;;  %p13614_p2 = scmp.lt.u32.totalorder %s13612_s12, %s13607_s29 }
  0x4c   : > { %p13610_p0 = pnand %p13608_p1, %p13579_p12  ;;  %p13616_p6 = scmp.lt.u32.totalorder %s13607_s29, %s13906_s11 }
  0x4d   : > { %p13615_p5 = por %p13614_p2, %p13613_p8 }
  0x4e   : > { %p13611_p7 = pneg %p13610_p0 }
  0x4f   : > { %p13617_p9 = por %p13616_p6, %p13615_p5 }
  0x51   : > { %p13618_p11 = pnand %p13617_p9, %p13611_p7 }
  0x53   : > { %13621 = shalt.err (!%p13618_p11)
}
  0x54   : > { %s13622_s7 = scalar_lea.vmem %s13911_s22, 49152  ;;  %s13729_s30 = smov [#allocation6]  }
  0x55   : > { %p13623_p13 = scmp.ne.s32.totalorder %s13911_s22, %s13622_s7  ;;  %s13627_s5 = sshll.u32 %s13729_s30, 4  ;;  %s13628_s5 = int_to_ptr.vmem [resolvable:$false] %s13627_s5 }
  0x56   : > { %s13629_s9 = scalar_lea.vmem %s13628_s5, 98304  ;;  %p13630_p1 = scmp.lt.s32.totalorder %s13911_s22, %s13628_s5 }
  0x57   : > { %p13625_p3 = pnand %p13623_p13, %p13579_p12  ;;  %p13631_p0 = scmp.lt.s32.totalorder %s13629_s9, %s13622_s7 }
  0x59   : > { %p13626_p4 = pneg %p13625_p3  ;;  %p13632_p8 = por %p13631_p0, %p13630_p1 }
  0x5b   : > { %p13633_p2 = pnand %p13632_p8, %p13626_p4 }
  0x5d   : > { %13636 = shalt.err (!%p13633_p2)
}
  0x5e   : > { %s13730_s10 = smov 98304   ;;  %s13731_s19 = smov 24576  }
  0x5f   : > { %s13732_s24 = smov 1536   ;;  %p15508_p12 = scmp.ne.s32.totalorder %s15500_s21, 0 }
  0x60   : > { %13392 = dma.hbm_to_vmem [thread:$0]  (!%p13862_p10), %s13906_s11, 49152, %s13911_s22, %s13913_s28, %s13730_s10, %s13731_s19, %s13732_s24  }
  0x61   : > { %209 = sbr.rel (%p15508_p12) target bundleno = 1149 (0x47d), region = 32  ;;  %s211_s29 = sand.u32 (!%p15508_p12), 1, %s13709_s13  }
  0x62   : > { %s13368_s4 = smul.u32 (!%p15508_p12), 768, %s211_s29  ;;  %s212_s6 = scalar_lea.sflag (!%p15508_p12), [#allocation4], %s211_s29 }
  0x63   : > { %p15509_p7 = scmp.ne.s32.totalorder (!%p15508_p12), %s15499_s20, 0 }
  0x64   : > { %s13942_s12 = scalar_lea.vmem (!%p15508_p12), [#allocation3], %s13368_s4 }
  0x68   : > { %13688 = dma.done.wait (%p15509_p7), %s212_s6, 12288  }
  0x69   : > { %13690 = vsyncadd (%p15509_p7), %s212_s6, 4294955008  ;;  %s220_s27 = sand.u32 1, %s13785_s18   ;;  %s13369_s23 = smul.u32 3072, %s211_s29 }
  0x6a   : > { %s221_s11 = scalar_lea.sflag [#allocation7], %s220_s27 }
  0x6b   : > { %s13949_s22 = scalar_lea.vmem [#allocation6], %s13369_s23 }
  0x6c   : > { %13692 = dma.done.wait (%p15509_p7), %s221_s11, 49152  }
  0x6d   : > { %13694 = vsyncadd (%p15509_p7), %s221_s11, 4294918144  ;;  %p15510_p10 = scmp.eq.s32.totalorder %s13785_s18, 0 }
  0x6f   : > { %13696 = dma.done.wait (%p15510_p10), [#allocation7], 16   ;;  %p15511_p5 = pmov %p15510_p10 }
  0x70   : > { %p12973_p6 = scmp.ne.s32.totalorder %s13717_s15, 0 }
  0x71   : > { %13698 = vsyncadd (%p15511_p5), [#allocation7], 4294967280  ;;  %vm262_vm0 = vcmask (!%p12973_p6), 74752   ;;  %v13733_v0 = vmov (!%p12973_p6), 0.0  }
  0x72   : > { %261 = sbr.rel (%p12973_p6) target bundleno = 121 (0x79), region = 48  ;;  %263 = vst.msk [vmem:[#allocation2] sm:$0x3] (!%p12973_p6), %vm262_vm0, %v13733_v0 }
  0x79 PF: > { %v2857_v1 = vld [vmem:[%s13949_s22] sm:$0xff]  ;;  %v2858_v3 = vld [vmem:[%s13949_s22 + $0x8] sm:$0xff]  ;;  %v461_v4 = vlaneseq  ;;  %v13734_v9 = vmov 1983009808   ;;  %v2859_v11 = vld [vmem:[%s13949_s22 + $0x10] sm:$0xff]  ;;  %vm12842_vm1 = vcmask 74752  }
  0x7a   : > { %v3049_v2 = vld [vmem:[%s13949_s22 + $0x600] sm:$0x11]  ;;  %v3050_v7 = vld [vmem:[%s13949_s22 + $0x608] sm:$0x11]  ;;  %v459_v10 = vunpack.c.l.s4 %v13734_v9  ;;  %v3051_v15 = vld [vmem:[%s13949_s22 + $0x610] sm:$0x11] }
  0x7b   : > { %v12975_v5 = vcombine.high %v2857_v1, %v3049_v2  ;;  %v12974_v6 = vcombine.low %v2857_v1, %v3049_v2  ;;  %v265_v8 = vld [vmem:[%s13942_s12] sm:$0xff]  ;;  %v12977_v12 = vcombine.high %v2858_v3, %v3050_v7  ;;  %v12976_v13 = vcombine.low %v2858_v3, %v3050_v7  ;;  %v2860_v16 = vld [vmem:[%s13949_s22 + $0x18] sm:$0xff]  ;;  %v266_v21 = vld [vmem:[%s13942_s12 + $0x8] sm:$0xff]  ;;  %p13358_p9 = scmp.ne.s32.totalorder %s13717_s15, 3 }
  0x7c   : > { %v462_v14 = vshrl.u32 %v461_v4, 7  ;;  %v3052_v17 = vld [vmem:[%s13949_s22 + $0x618] sm:$0x11]  ;;  %v460_v18 = vunpack.c.0.s8 %v459_v10  ;;  %v457_v19 = vcombine.high %v265_v8, %v265_v8  ;;  %v12979_v20 = vcombine.high %v2859_v11, %v3051_v15  ;;  %v267_v25 = vld [vmem:[%s13942_s12 + $0x10] sm:$0xff]  ;;  %v2861_v33 = vld [vmem:[%s13949_s22 + $0x20] sm:$0xff] }
  0x7d   : > { %5161 = vmatprep.subr.bf16.mxu0 %v12975_v5  ;;  %5201 = vmatprep.subr.bf16.mxu1 %v12977_v12  ;;  %v12981_v22 = vcombine.high %v2860_v16, %v3052_v17  ;;  %v474_v23 = vcombine.high %v266_v21, %v266_v21  ;;  %v491_v30 = vcombine.high %v267_v25, %v267_v25  ;;  %v3053_v38 = vld [vmem:[%s13949_s22 + $0x620] sm:$0x11]  ;;  %v2862_v39 = vld [vmem:[%s13949_s22 + $0x28] sm:$0xff]  ;;  %v268_v51 = vld [vmem:[%s13942_s12 + $0x18] sm:$0xff] }
  0x7e   : > { %5162 = vmatpush1.bf16.xpose.msra.mxu0 %v12974_v6  ;;  %5202 = vmatpush1.bf16.xpose.msra.mxu1 %v12976_v13  ;;  %v13970_v24 = vsub.s32 %v460_v18, %v462_v14  ;;  %v3054_v40 = vld [vmem:[%s13949_s22 + $0x628] sm:$0x11]  ;;  %v12978_v43 = vcombine.low %v2859_v11, %v3051_v15  ;;  %v12980_v44 = vcombine.low %v2860_v16, %v3052_v17  ;;  %v2863_v55 = vld [vmem:[%s13949_s22 + $0x30] sm:$0xff]  ;;  %v2864_v59 = vld [vmem:[%s13949_s22 + $0x38] sm:$0xff] }
  0x7f   : > { %5241 = vmatprep.subr.bf16.mxu0 %v12979_v20  ;;  %5281 = vmatprep.subr.bf16.mxu1 %v12981_v22  ;;  %v12983_v49 = vcombine.high %v2861_v33, %v3053_v38  ;;  %v12985_v50 = vcombine.high %v2862_v39, %v3054_v40  ;;  %v508_v54 = vcombine.high %v268_v51, %v268_v51  ;;  %v3055_v58 = vld [vmem:[%s13949_s22 + $0x630] sm:$0x11]  ;;  %v3056_v60 = vld [vmem:[%s13949_s22 + $0x638] sm:$0x11]  ;;  %v269_v5 = vld [vmem:[%s13942_s12 + $0x20] sm:$0xff] }
  0x80   : > { %v464_v26 = vrot.slane %v265_v8, %v13970_v24  ;;  %v471_v27 = vrot.slane %v457_v19, %v13970_v24  ;;  %v481_v28 = vrot.slane %v266_v21, %v13970_v24  ;;  %v488_v29 = vrot.slane %v474_v23, %v13970_v24  ;;  %v2865_v9 = vld [vmem:[%s13949_s22 + $0x40] sm:$0xff]  ;;  %v2866_v13 = vld [vmem:[%s13949_s22 + $0x48] sm:$0xff] }
  0x81   : > { %v498_v47 = vrot.slane %v267_v25, %v13970_v24  ;;  %v505_v48 = vrot.slane %v491_v30, %v13970_v24  ;;  %v12982_v61 = vcombine.low %v2861_v33, %v3053_v38  ;;  %v12984_v62 = vcombine.low %v2862_v39, %v3054_v40  ;;  %v3057_v12 = vld [vmem:[%s13949_s22 + $0x640] sm:$0x11]  ;;  %v3058_v14 = vld [vmem:[%s13949_s22 + $0x648] sm:$0x11]  ;;  %v3060_v33 = vld [vmem:[%s13949_s22 + $0x658] sm:$0x11] }
  0x82   : > { %v472_v31 = vcombine.high %v464_v26, %v464_v26  ;;  %v473_v32 = vcombine.high %v471_v27, %v471_v27  ;;  %v2473_v34 = vpack.c.bf16 %v464_v26, %v464_v26  ;;  %v2475_v35 = vpack.c.bf16 %v471_v27, %v471_v27  ;;  %v270_v23 = vld [vmem:[%s13942_s12 + $0x28] sm:$0xff] }
  0x83   : > { %v489_v36 = vcombine.high %v481_v28, %v481_v28  ;;  %v490_v37 = vcombine.high %v488_v29, %v488_v29  ;;  %v506_v52 = vcombine.high %v498_v47, %v498_v47  ;;  %v507_v53 = vcombine.high %v505_v48, %v505_v48 }
  0x84   : > { %v2474_v41 = vpack.c.bf16 %v472_v31, %v472_v31  ;;  %v2476_v42 = vpack.c.bf16 %v473_v32, %v473_v32  ;;  %v2477_v56 = vpack.c.bf16 %v481_v28, %v481_v28  ;;  %v2479_v57 = vpack.c.bf16 %v488_v29, %v488_v29  ;;  %v2867_v28 = vld [vmem:[%s13949_s22 + $0x50] sm:$0xff]  ;;  %v2868_v32 = vld [vmem:[%s13949_s22 + $0x58] sm:$0xff] }
  0x85   : > { %v2478_v45 = vpack.c.bf16 %v489_v36, %v489_v36  ;;  %v2480_v46 = vpack.c.bf16 %v490_v37, %v490_v37  ;;  %v2482_v63 = vpack.c.bf16 %v506_v52, %v506_v52  ;;  %v2484_v0 = vpack.c.bf16 %v507_v53, %v507_v53  ;;  %v3059_v31 = vld [vmem:[%s13949_s22 + $0x650] sm:$0x11] }
  0x86   : > { %5193 = vmatprep.mubr.bf16.mxu0 %v2474_v41  ;;  %5233 = vmatprep.mubr.bf16.mxu1 %v2476_v42  ;;  %v515_v1 = vrot.slane %v268_v51, %v13970_v24  ;;  %v522_v2 = vrot.slane %v508_v54, %v13970_v24  ;;  %v12987_v3 = vcombine.high %v2863_v55, %v3055_v58  ;;  %v271_v42 = vld [vmem:[%s13942_s12 + $0x30] sm:$0xff]  ;;  %v3062_v51 = vld [vmem:[%s13949_s22 + $0x668] sm:$0x11] }
  0x87   : > { %5194 = vmatmul.mubr.bf16.vlgmr.msra.gmra.mrb[0].mxu0 %v2473_v34  ;;  %5234 = vmatmul.mubr.bf16.vlgmr.msra.gmra.mrb[0].mxu1 %v2475_v35  ;;  %v12989_v4 = vcombine.high %v2864_v59, %v3056_v60  ;;  %v525_v8 = vcombine.high %v269_v5, %v269_v5  ;;  %v2481_v10 = vpack.c.bf16 %v498_v47, %v498_v47 }
  0x88   : > { %5242 = vmatpush1.bf16.xpose.msra.mxu0 %v12978_v43  ;;  %5282 = vmatpush1.bf16.xpose.msra.mxu1 %v12980_v44  ;;  %v523_v6 = vcombine.high %v515_v1, %v515_v1  ;;  %v524_v7 = vcombine.high %v522_v2, %v522_v2  ;;  %v2483_v11 = vpack.c.bf16 %v505_v48, %v505_v48 }
  0x89   : > { %5273 = vmatprep.mubr.bf16.mxu0 %v2478_v45  ;;  %5313 = vmatprep.mubr.bf16.mxu1 %v2480_v46  ;;  %v12986_v15 = vcombine.low %v2863_v55, %v3055_v58  ;;  %v12988_v16 = vcombine.low %v2864_v59, %v3056_v60  ;;  %v532_v19 = vrot.slane %v269_v5, %v13970_v24  ;;  %v2869_v46 = vld [vmem:[%s13949_s22 + $0x60] sm:$0xff]  ;;  %v272_v60 = vld [vmem:[%s13942_s12 + $0x38] sm:$0xff] }
  0x8a   : > { %5321 = vmatprep.subr.bf16.mxu0 %v12983_v49  ;;  %5361 = vmatprep.subr.bf16.mxu1 %v12985_v50  ;;  %v2486_v17 = vpack.c.bf16 %v523_v6, %v523_v6  ;;  %v2488_v18 = vpack.c.bf16 %v524_v7, %v524_v7  ;;  %v539_v20 = vrot.slane %v525_v8, %v13970_v24  ;;  %v3061_v49 = vld [vmem:[%s13949_s22 + $0x660] sm:$0x11]  ;;  %v2870_v50 = vld [vmem:[%s13949_s22 + $0x68] sm:$0xff]  ;;  %v3064_v5 = vld [vmem:[%s13949_s22 + $0x678] sm:$0x11] }
  0x8b   : > { %v12991_v21 = vcombine.high %v2865_v9, %v3057_v12  ;;  %v12993_v22 = vcombine.high %v2866_v13, %v3058_v14  ;;  %v540_v25 = vcombine.high %v532_v19, %v532_v19  ;;  %v542_v27 = vcombine.high %v270_v23, %v270_v23 }
  0x8c   : > { %v541_v26 = vcombine.high %v539_v20, %v539_v20  ;;  %v2485_v29 = vpack.c.bf16 %v515_v1, %v515_v1  ;;  %v2487_v30 = vpack.c.bf16 %v522_v2, %v522_v2  ;;  %v12990_v34 = vcombine.low %v2865_v9, %v3057_v12 }
  0x8d   : > { %v12992_v35 = vcombine.low %v2866_v13, %v3058_v14  ;;  %v2490_v36 = vpack.c.bf16 %v540_v25, %v540_v25  ;;  %v549_v38 = vrot.slane %v270_v23, %v13970_v24  ;;  %v556_v39 = vrot.slane %v542_v27, %v13970_v24  ;;  %v273_v14 = vld [vmem:[%s13942_s12 + $0x40] sm:$0xff]  ;;  %v3066_v23 = vld [vmem:[%s13949_s22 + $0x688] sm:$0x11] }
  0x8e   : > { %v2492_v37 = vpack.c.bf16 %v541_v26, %v541_v26  ;;  %v12995_v40 = vcombine.high %v2867_v28, %v3059_v31  ;;  %v12997_v41 = vcombine.high %v2868_v32, %v3060_v33  ;;  %v559_v45 = vcombine.high %v271_v42, %v271_v42 }
  0x8f   : > { %5274 = vmatmul.mubr.bf16.vlgmr.msra.gmra.mrb[4].mxu0 %v2477_v56  ;;  %5314 = vmatmul.mubr.bf16.vlgmr.msra.gmra.mrb[4].mxu1 %v2479_v57  ;;  %v557_v43 = vcombine.high %v549_v38, %v549_v38  ;;  %v558_v44 = vcombine.high %v556_v39, %v556_v39  ;;  %v2489_v47 = vpack.c.bf16 %v532_v19, %v532_v19 }
  0x90   : > { %5322 = vmatpush1.bf16.xpose.msra.mxu0 %v12982_v61  ;;  %5362 = vmatpush1.bf16.xpose.msra.mxu1 %v12984_v62  ;;  %v2491_v48 = vpack.c.bf16 %v539_v20, %v539_v20  ;;  %v12994_v52 = vcombine.low %v2867_v28, %v3059_v31  ;;  %v12996_v53 = vcombine.low %v2868_v32, %v3060_v33  ;;  %v274_v33 = vld [vmem:[%s13942_s12 + $0x48] sm:$0xff] }
  0x91   : > { %5353 = vmatprep.mubr.bf16.mxu0 %v2482_v63  ;;  %5393 = vmatprep.mubr.bf16.mxu1 %v2484_v0  ;;  %v2494_v54 = vpack.c.bf16 %v557_v43, %v557_v43  ;;  %v2496_v55 = vpack.c.bf16 %v558_v44, %v558_v44  ;;  %v566_v56 = vrot.slane %v271_v42, %v13970_v24  ;;  %v2871_v0 = vld [vmem:[%s13949_s22 + $0x70] sm:$0xff]  ;;  %v3068_v42 = vld [vmem:[%s13949_s22 + $0x698] sm:$0x11] }
  0x92   : > { %5401 = vmatprep.subr.bf16.mxu0 %v12987_v3  ;;  %5441 = vmatprep.subr.bf16.mxu1 %v12989_v4  ;;  %v573_v57 = vrot.slane %v559_v45, %v13970_v24  ;;  %v12999_v58 = vcombine.high %v2869_v46, %v3061_v49  ;;  %v13001_v59 = vcombine.high %v2870_v50, %v3062_v51  ;;  %v3063_v3 = vld [vmem:[%s13949_s22 + $0x670] sm:$0x11]  ;;  %v2872_v4 = vld [vmem:[%s13949_s22 + $0x78] sm:$0xff] }
  0x93   : > { %v574_v61 = vcombine.high %v566_v56, %v566_v56  ;;  %v576_v63 = vcombine.high %v272_v60, %v272_v60  ;;  %v2493_v1 = vpack.c.bf16 %v549_v38, %v549_v38  ;;  %v2495_v2 = vpack.c.bf16 %v556_v39, %v556_v39 }
  0x94   : > { %v575_v62 = vcombine.high %v573_v57, %v573_v57  ;;  %v12998_v6 = vcombine.low %v2869_v46, %v3061_v49  ;;  %v13000_v7 = vcombine.low %v2870_v50, %v3062_v51  ;;  %v13003_v12 = vcombine.high %v2871_v0, %v3063_v3  ;;  %v275_v51 = vld [vmem:[%s13942_s12 + $0x50] sm:$0xff] }
  0x95   : > { %v2498_v8 = vpack.c.bf16 %v574_v61, %v574_v61  ;;  %v13005_v13 = vcombine.high %v2872_v4, %v3064_v5  ;;  %v2497_v19 = vpack.c.bf16 %v566_v56, %v566_v56  ;;  %v2499_v20 = vpack.c.bf16 %v573_v57, %v573_v57 }
  0x96   : > { %v2500_v9 = vpack.c.bf16 %v575_v62, %v575_v62  ;;  %v13002_v25 = vcombine.low %v2871_v0, %v3063_v3  ;;  %v13004_v26 = vcombine.low %v2872_v4, %v3064_v5  ;;  %v276_v5 = vld [vmem:[%s13942_s12 + $0x58] sm:$0xff] }
  0x97   : > { %5354 = vmatmul.mubr.bf16.vlgmr.msra.gmra.mrb[8].mxu0 %v2481_v10  ;;  %5394 = vmatmul.mubr.bf16.vlgmr.msra.gmra.mrb[8].mxu1 %v2483_v11  ;;  %v583_v10 = vrot.slane %v272_v60, %v13970_v24  ;;  %v590_v11 = vrot.slane %v576_v63, %v13970_v24  ;;  %v3070_v60 = vld [vmem:[%s13949_s22 + $0x6a8] sm:$0x11] }
  0x98   : > { %5402 = vmatpush1.bf16.xpose.msra.mxu0 %v12986_v15  ;;  %5442 = vmatpush1.bf16.xpose.msra.mxu1 %v12988_v16 }
  0x99   : > { %5433 = vmatprep.mubr.bf16.mxu0 %v2486_v17  ;;  %5473 = vmatprep.mubr.bf16.mxu1 %v2488_v18  ;;  %v591_v15 = vcombine.high %v583_v10, %v583_v10  ;;  %v592_v16 = vcombine.high %v590_v11, %v590_v11  ;;  %v593_v17 = vcombine.high %v273_v14, %v273_v14  ;;  %v2873_v18 = vld [vmem:[%s13949_s22 + $0x80] sm:$0xff] }
  0x9a   : > { %5481 = vmatprep.subr.bf16.mxu0 %v12991_v21  ;;  %5521 = vmatprep.subr.bf16.mxu1 %v12993_v22  ;;  %v3065_v21 = vld [vmem:[%s13949_s22 + $0x680] sm:$0x11]  ;;  %v2874_v22 = vld [vmem:[%s13949_s22 + $0x88] sm:$0xff]  ;;  %v2501_v38 = vpack.c.bf16 %v583_v10, %v583_v10  ;;  %v2503_v39 = vpack.c.bf16 %v590_v11, %v590_v11 }
  0x9b   : > { %v2502_v27 = vpack.c.bf16 %v591_v15, %v591_v15  ;;  %v2504_v28 = vpack.c.bf16 %v592_v16, %v592_v16  ;;  %v13007_v31 = vcombine.high %v2873_v18, %v3065_v21  ;;  %v13009_v32 = vcombine.high %v2874_v22, %v3066_v23 }
  0x9c   : > { %v13006_v43 = vcombine.low %v2873_v18, %v3065_v21  ;;  %v13008_v44 = vcombine.low %v2874_v22, %v3066_v23  ;;  %v277_v23 = vld [vmem:[%s13942_s12 + $0x60] sm:$0xff] }
  0x9f   : > { %5434 = vmatmul.mubr.bf16.vlgmr.msra.gmra.mrb[12].mxu0 %v2485_v29  ;;  %5474 = vmatmul.mubr.bf16.vlgmr.msra.gmra.mrb[12].mxu1 %v2487_v30  ;;  %v600_v29 = vrot.slane %v273_v14, %v13970_v24  ;;  %v607_v30 = vrot.slane %v593_v17, %v13970_v24  ;;  %v3072_v14 = vld [vmem:[%s13949_s22 + $0x6b8] sm:$0x11] }
  0xa0   : > { %5482 = vmatpush1.bf16.xpose.msra.mxu0 %v12990_v34  ;;  %5522 = vmatpush1.bf16.xpose.msra.mxu1 %v12992_v35 }
  0xa1   : > { %5513 = vmatprep.mubr.bf16.mxu0 %v2490_v36  ;;  %5553 = vmatprep.mubr.bf16.mxu1 %v2492_v37  ;;  %v608_v34 = vcombine.high %v600_v29, %v600_v29  ;;  %v609_v35 = vcombine.high %v607_v30, %v607_v30  ;;  %v610_v36 = vcombine.high %v274_v33, %v274_v33  ;;  %v2875_v37 = vld [vmem:[%s13949_s22 + $0x90] sm:$0xff] }
  0xa2   : > { %5561 = vmatprep.subr.bf16.mxu0 %v12995_v40  ;;  %5601 = vmatprep.subr.bf16.mxu1 %v12997_v41  ;;  %v3067_v40 = vld [vmem:[%s13949_s22 + $0x690] sm:$0x11]  ;;  %v2876_v41 = vld [vmem:[%s13949_s22 + $0x98] sm:$0xff]  ;;  %v2505_v56 = vpack.c.bf16 %v600_v29, %v600_v29  ;;  %v2507_v57 = vpack.c.bf16 %v607_v30, %v607_v30 }
  0xa3   : > { %v2506_v45 = vpack.c.bf16 %v608_v34, %v608_v34  ;;  %v2508_v46 = vpack.c.bf16 %v609_v35, %v609_v35  ;;  %v13011_v49 = vcombine.high %v2875_v37, %v3067_v40  ;;  %v13013_v50 = vcombine.high %v2876_v41, %v3068_v42 }
  0xa4   : > { %v13010_v61 = vcombine.low %v2875_v37, %v3067_v40  ;;  %v13012_v62 = vcombine.low %v2876_v41, %v3068_v42  ;;  %v278_v42 = vld [vmem:[%s13942_s12 + $0x68] sm:$0xff] }
  0xa7   : > { %5514 = vmatmul.mubr.bf16.vlgmr.msra.gmra.mrb[16].mxu0 %v2489_v47  ;;  %5554 = vmatmul.mubr.bf16.vlgmr.msra.gmra.mrb[16].mxu1 %v2491_v48  ;;  %v617_v47 = vrot.slane %v274_v33, %v13970_v24  ;;  %v624_v48 = vrot.slane %v610_v36, %v13970_v24  ;;  %v3074_v33 = vld [vmem:[%s13949_s22 + $0x6c8] sm:$0x11] }
  0xa8   : > { %5562 = vmatpush1.bf16.xpose.msra.mxu0 %v12994_v52  ;;  %5602 = vmatpush1.bf16.xpose.msra.mxu1 %v12996_v53 }
  0xa9   : > { %5593 = vmatprep.mubr.bf16.mxu0 %v2494_v54  ;;  %5633 = vmatprep.mubr.bf16.mxu1 %v2496_v55  ;;  %v625_v52 = vcombine.high %v617_v47, %v617_v47  ;;  %v626_v53 = vcombine.high %v624_v48, %v624_v48  ;;  %v627_v54 = vcombine.high %v275_v51, %v275_v51  ;;  %v2877_v55 = vld [vmem:[%s13949_s22 + $0xa0] sm:$0xff] }
  0xaa   : > { %5641 = vmatprep.subr.bf16.mxu0 %v12999_v58  ;;  %5681 = vmatprep.subr.bf16.mxu1 %v13001_v59  ;;  %v3069_v58 = vld [vmem:[%s13949_s22 + $0x6a0] sm:$0x11]  ;;  %v2878_v59 = vld [vmem:[%s13949_s22 + $0xa8] sm:$0xff]  ;;  %v2509_v10 = vpack.c.bf16 %v617_v47, %v617_v47  ;;  %v2511_v11 = vpack.c.bf16 %v624_v48, %v624_v48 }
  0xab   : > { %v2510_v63 = vpack.c.bf16 %v625_v52, %v625_v52  ;;  %v2512_v0 = vpack.c.bf16 %v626_v53, %v626_v53  ;;  %v13015_v3 = vcombine.high %v2877_v55, %v3069_v58  ;;  %v13017_v4 = vcombine.high %v2878_v59, %v3070_v60 }
  0xac   : > { %v13014_v15 = vcombine.low %v2877_v55, %v3069_v58  ;;  %v13016_v16 = vcombine.low %v2878_v59, %v3070_v60  ;;  %v279_v60 = vld [vmem:[%s13942_s12 + $0x70] sm:$0xff] }
  0xaf   : > { %5594 = vmatmul.mubr.bf16.vlgmr.msra.gmra.mrb[20].mxu0 %v2493_v1  ;;  %5634 = vmatmul.mubr.bf16.vlgmr.msra.gmra.mrb[20].mxu1 %v2495_v2  ;;  %v634_v1 = vrot.slane %v275_v51, %v13970_v24  ;;  %v641_v2 = vrot.slane %v627_v54, %v13970_v24  ;;  %v3076_v51 = vld [vmem:[%s13949_s22 + $0x6d8] sm:$0x11] }
  0xb0   : > { %5642 = vmatpush1.bf16.xpose.msra.mxu0 %v12998_v6  ;;  %5682 = vmatpush1.bf16.xpose.msra.mxu1 %v13000_v7 }
  0xb1   : > { %5673 = vmatprep.mubr.bf16.mxu0 %v2498_v8  ;;  %5713 = vmatprep.mubr.bf16.mxu1 %v2500_v9  ;;  %v642_v6 = vcombine.high %v634_v1, %v634_v1  ;;  %v643_v7 = vcombine.high %v641_v2, %v641_v2  ;;  %v644_v8 = vcombine.high %v276_v5, %v276_v5  ;;  %v2879_v9 = vld [vmem:[%s13949_s22 + $0xb0] sm:$0xff] }
  0xb2   : > { %5721 = vmatprep.subr.bf16.mxu0 %v13003_v12  ;;  %5761 = vmatprep.subr.bf16.mxu1 %v13005_v13  ;;  %v3071_v12 = vld [vmem:[%s13949_s22 + $0x6b0] sm:$0x11]  ;;  %v2880_v13 = vld [vmem:[%s13949_s22 + $0xb8] sm:$0xff]  ;;  %v2513_v29 = vpack.c.bf16 %v634_v1, %v634_v1  ;;  %v2515_v30 = vpack.c.bf16 %v641_v2, %v641_v2 }
  0xb3   : > { %v2514_v17 = vpack.c.bf16 %v642_v6, %v642_v6  ;;  %v2516_v18 = vpack.c.bf16 %v643_v7, %v643_v7  ;;  %v13019_v21 = vcombine.high %v2879_v9, %v3071_v12  ;;  %v13021_v22 = vcombine.high %v2880_v13, %v3072_v14 }
  0xb4   : > { %v13018_v34 = vcombine.low %v2879_v9, %v3071_v12  ;;  %v13020_v35 = vcombine.low %v2880_v13, %v3072_v14  ;;  %v280_v14 = vld [vmem:[%s13942_s12 + $0x78] sm:$0xff] }
  0xb7   : > { %5674 = vmatmul.mubr.bf16.vlgmr.msra.gmra.mrb[24].mxu0 %v2497_v19  ;;  %5714 = vmatmul.mubr.bf16.vlgmr.msra.gmra.mrb[24].mxu1 %v2499_v20  ;;  %v651_v19 = vrot.slane %v276_v5, %v13970_v24  ;;  %v658_v20 = vrot.slane %v644_v8, %v13970_v24  ;;  %v3078_v5 = vld [vmem:[%s13949_s22 + $0x6e8] sm:$0x11] }
  0xb8   : > { %5722 = vmatpush1.bf16.xpose.msra.mxu0 %v13002_v25  ;;  %5762 = vmatpush1.bf16.xpose.msra.mxu1 %v13004_v26 }
  0xb9   : > { %5753 = vmatprep.mubr.bf16.mxu0 %v2502_v27  ;;  %5793 = vmatprep.mubr.bf16.mxu1 %v2504_v28  ;;  %v659_v25 = vcombine.high %v651_v19, %v651_v19  ;;  %v660_v26 = vcombine.high %v658_v20, %v658_v20  ;;  %v661_v27 = vcombine.high %v277_v23, %v277_v23  ;;  %v2881_v28 = vld [vmem:[%s13949_s22 + $0xc0] sm:$0xff] }
  0xba   : > { %5801 = vmatprep.subr.bf16.mxu0 %v13007_v31  ;;  %5841 = vmatprep.subr.bf16.mxu1 %v13009_v32  ;;  %v3073_v31 = vld [vmem:[%s13949_s22 + $0x6c0] sm:$0x11]  ;;  %v2882_v32 = vld [vmem:[%s13949_s22 + $0xc8] sm:$0xff]  ;;  %v2517_v47 = vpack.c.bf16 %v651_v19, %v651_v19  ;;  %v2519_v48 = vpack.c.bf16 %v658_v20, %v658_v20 }
  0xbb   : > { %v2518_v36 = vpack.c.bf16 %v659_v25, %v659_v25  ;;  %v2520_v37 = vpack.c.bf16 %v660_v26, %v660_v26  ;;  %v13023_v40 = vcombine.high %v2881_v28, %v3073_v31  ;;  %v13025_v41 = vcombine.high %v2882_v32, %v3074_v33 }
  0xbc   : > { %v13022_v52 = vcombine.low %v2881_v28, %v3073_v31  ;;  %v13024_v53 = vcombine.low %v2882_v32, %v3074_v33  ;;  %v281_v33 = vld [vmem:[%s13942_s12 + $0x80] sm:$0xff] }
  0xbf   : > { %5754 = vmatmul.mubr.bf16.vlgmr.msra.gmra.mrb[28].mxu0 %v2501_v38  ;;  %5794 = vmatmul.mubr.bf16.vlgmr.msra.gmra.mrb[28].mxu1 %v2503_v39  ;;  %v668_v38 = vrot.slane %v277_v23, %v13970_v24  ;;  %v675_v39 = vrot.slane %v661_v27, %v13970_v24  ;;  %v3080_v23 = vld [vmem:[%s13949_s22 + $0x6f8] sm:$0x11] }
  0xc0   : > { %5802 = vmatpush1.bf16.xpose.msra.mxu0 %v13006_v43  ;;  %5842 = vmatpush1.bf16.xpose.msra.mxu1 %v13008_v44 }
  0xc1   : > { %5833 = vmatprep.mubr.bf16.mxu0 %v2506_v45  ;;  %5873 = vmatprep.mubr.bf16.mxu1 %v2508_v46  ;;  %v676_v43 = vcombine.high %v668_v38, %v668_v38  ;;  %v677_v44 = vcombine.high %v675_v39, %v675_v39  ;;  %v678_v45 = vcombine.high %v278_v42, %v278_v42  ;;  %v2883_v46 = vld [vmem:[%s13949_s22 + $0xd0] sm:$0xff] }
  0xc2   : > { %5881 = vmatprep.subr.bf16.mxu0 %v13011_v49  ;;  %5921 = vmatprep.subr.bf16.mxu1 %v13013_v50  ;;  %v3075_v49 = vld [vmem:[%s13949_s22 + $0x6d0] sm:$0x11]  ;;  %v2884_v50 = vld [vmem:[%s13949_s22 + $0xd8] sm:$0xff]  ;;  %v2521_v1 = vpack.c.bf16 %v668_v38, %v668_v38  ;;  %v2523_v2 = vpack.c.bf16 %v675_v39, %v675_v39 }
  0xc3   : > { %v2522_v54 = vpack.c.bf16 %v676_v43, %v676_v43  ;;  %v2524_v55 = vpack.c.bf16 %v677_v44, %v677_v44  ;;  %v13027_v58 = vcombine.high %v2883_v46, %v3075_v49  ;;  %v13029_v59 = vcombine.high %v2884_v50, %v3076_v51 }
  0xc4   : > { %v13026_v6 = vcombine.low %v2883_v46, %v3075_v49  ;;  %v13028_v7 = vcombine.low %v2884_v50, %v3076_v51  ;;  %v282_v51 = vld [vmem:[%s13942_s12 + $0x88] sm:$0xff] }
  0xc7   : > { %5834 = vmatmul.mubr.bf16.vlgmr.msra.gmra.mrb[32].mxu0 %v2505_v56  ;;  %5874 = vmatmul.mubr.bf16.vlgmr.msra.gmra.mrb[32].mxu1 %v2507_v57  ;;  %v685_v56 = vrot.slane %v278_v42, %v13970_v24  ;;  %v692_v57 = vrot.slane %v678_v45, %v13970_v24  ;;  %v3082_v42 = vld [vmem:[%s13949_s22 + $0x708] sm:$0x11] }
  0xc8   : > { %5882 = vmatpush1.bf16.xpose.msra.mxu0 %v13010_v61  ;;  %5922 = vmatpush1.bf16.xpose.msra.mxu1 %v13012_v62 }
  0xc9   : > { %5913 = vmatprep.mubr.bf16.mxu0 %v2510_v63  ;;  %5953 = vmatprep.mubr.bf16.mxu1 %v2512_v0  ;;  %v693_v61 = vcombine.high %v685_v56, %v685_v56  ;;  %v694_v62 = vcombine.high %v692_v57, %v692_v57  ;;  %v695_v63 = vcombine.high %v279_v60, %v279_v60  ;;  %v2885_v0 = vld [vmem:[%s13949_s22 + $0xe0] sm:$0xff] }
  0xca   : > { %5961 = vmatprep.subr.bf16.mxu0 %v13015_v3  ;;  %6001 = vmatprep.subr.bf16.mxu1 %v13017_v4  ;;  %v3077_v3 = vld [vmem:[%s13949_s22 + $0x6e0] sm:$0x11]  ;;  %v2886_v4 = vld [vmem:[%s13949_s22 + $0xe8] sm:$0xff]  ;;  %v2525_v19 = vpack.c.bf16 %v685_v56, %v685_v56  ;;  %v2527_v20 = vpack.c.bf16 %v692_v57, %v692_v57 }
  0xcb   : > { %v2526_v8 = vpack.c.bf16 %v693_v61, %v693_v61  ;;  %v2528_v9 = vpack.c.bf16 %v694_v62, %v694_v62  ;;  %v13031_v12 = vcombine.high %v2885_v0, %v3077_v3  ;;  %v13033_v13 = vcombine.high %v2886_v4, %v3078_v5 }
  0xcc   : > { %v13030_v25 = vcombine.low %v2885_v0, %v3077_v3  ;;  %v13032_v26 = vcombine.low %v2886_v4, %v3078_v5  ;;  %v283_v5 = vld [vmem:[%s13942_s12 + $0x90] sm:$0xff] }
  0xcf   : > { %5914 = vmatmul.mubr.bf16.vlgmr.msra.gmra.mrb[36].mxu0 %v2509_v10  ;;  %5954 = vmatmul.mubr.bf16.vlgmr.msra.gmra.mrb[36].mxu1 %v2511_v11  ;;  %v702_v10 = vrot.slane %v279_v60, %v13970_v24  ;;  %v709_v11 = vrot.slane %v695_v63, %v13970_v24  ;;  %v3084_v60 = vld [vmem:[%s13949_s22 + $0x718] sm:$0x11] }
  0xd0   : > { %5962 = vmatpush1.bf16.xpose.msra.mxu0 %v13014_v15  ;;  %6002 = vmatpush1.bf16.xpose.msra.mxu1 %v13016_v16 }
  0xd1   : > { %5993 = vmatprep.mubr.bf16.mxu0 %v2514_v17  ;;  %6033 = vmatprep.mubr.bf16.mxu1 %v2516_v18  ;;  %v710_v15 = vcombine.high %v702_v10, %v702_v10  ;;  %v711_v16 = vcombine.high %v709_v11, %v709_v11  ;;  %v712_v17 = vcombine.high %v280_v14, %v280_v14  ;;  %v2887_v18 = vld [vmem:[%s13949_s22 + $0xf0] sm:$0xff] }
  0xd2   : > { %6041 = vmatprep.subr.bf16.mxu0 %v13019_v21  ;;  %6081 = vmatprep.subr.bf16.mxu1 %v13021_v22  ;;  %v3079_v21 = vld [vmem:[%s13949_s22 + $0x6f0] sm:$0x11]  ;;  %v2888_v22 = vld [vmem:[%s13949_s22 + $0xf8] sm:$0xff]  ;;  %v2529_v38 = vpack.c.bf16 %v702_v10, %v702_v10  ;;  %v2531_v39 = vpack.c.bf16 %v709_v11, %v709_v11 }
  0xd3   : > { %v2530_v27 = vpack.c.bf16 %v710_v15, %v710_v15  ;;  %v2532_v28 = vpack.c.bf16 %v711_v16, %v711_v16  ;;  %v13035_v31 = vcombine.high %v2887_v18, %v3079_v21  ;;  %v13037_v32 = vcombine.high %v2888_v22, %v3080_v23 }
  0xd4   : > { %v13034_v43 = vcombine.low %v2887_v18, %v3079_v21  ;;  %v13036_v44 = vcombine.low %v2888_v22, %v3080_v23  ;;  %v284_v23 = vld [vmem:[%s13942_s12 + $0x98] sm:$0xff] }
  0xd7   : > { %5994 = vmatmul.mubr.bf16.vlgmr.msra.gmra.mrb[40].mxu0 %v2513_v29  ;;  %6034 = vmatmul.mubr.bf16.vlgmr.msra.gmra.mrb[40].mxu1 %v2515_v30  ;;  %v719_v29 = vrot.slane %v280_v14, %v13970_v24  ;;  %v726_v30 = vrot.slane %v712_v17, %v13970_v24  ;;  %v3086_v14 = vld [vmem:[%s13949_s22 + $0x728] sm:$0x11] }
  0xd8   : > { %6042 = vmatpush1.bf16.xpose.msra.mxu0 %v13018_v34  ;;  %6082 = vmatpush1.bf16.xpose.msra.mxu1 %v13020_v35 }
  0xd9   : > { %6073 = vmatprep.mubr.bf16.mxu0 %v2518_v36  ;;  %6113 = vmatprep.mubr.bf16.mxu1 %v2520_v37  ;;  %v727_v34 = vcombine.high %v719_v29, %v719_v29  ;;  %v728_v35 = vcombine.high %v726_v30, %v726_v30  ;;  %v729_v36 = vcombine.high %v281_v33, %v281_v33  ;;  %v2889_v37 = vld [vmem:[%s13949_s22 + $0x100] sm:$0xff] }
  0xda   : > { %6121 = vmatprep.subr.bf16.mxu0 %v13023_v40  ;;  %6161 = vmatprep.subr.bf16.mxu1 %v13025_v41  ;;  %v3081_v40 = vld [vmem:[%s13949_s22 + $0x700] sm:$0x11]  ;;  %v2890_v41 = vld [vmem:[%s13949_s22 + $0x108] sm:$0xff]  ;;  %v2533_v56 = vpack.c.bf16 %v719_v29, %v719_v29  ;;  %v2535_v57 = vpack.c.bf16 %v726_v30, %v726_v30 }
  0xdb   : > { %v2534_v45 = vpack.c.bf16 %v727_v34, %v727_v34  ;;  %v2536_v46 = vpack.c.bf16 %v728_v35, %v728_v35  ;;  %v13039_v49 = vcombine.high %v2889_v37, %v3081_v40  ;;  %v13041_v50 = vcombine.high %v2890_v41, %v3082_v42 }
  0xdc   : > { %v13038_v61 = vcombine.low %v2889_v37, %v3081_v40  ;;  %v13040_v62 = vcombine.low %v2890_v41, %v3082_v42  ;;  %v285_v42 = vld [vmem:[%s13942_s12 + $0xa0] sm:$0xff] }
  0xdf   : > { %6074 = vmatmul.mubr.bf16.vlgmr.msra.gmra.mrb[44].mxu0 %v2517_v47  ;;  %6114 = vmatmul.mubr.bf16.vlgmr.msra.gmra.mrb[44].mxu1 %v2519_v48  ;;  %v736_v47 = vrot.slane %v281_v33, %v13970_v24  ;;  %v743_v48 = vrot.slane %v729_v36, %v13970_v24  ;;  %v3088_v33 = vld [vmem:[%s13949_s22 + $0x738] sm:$0x11] }
  0xe0   : > { %6122 = vmatpush1.bf16.xpose.msra.mxu0 %v13022_v52  ;;  %6162 = vmatpush1.bf16.xpose.msra.mxu1 %v13024_v53 }
  0xe1   : > { %6153 = vmatprep.mubr.bf16.mxu0 %v2522_v54  ;;  %6193 = vmatprep.mubr.bf16.mxu1 %v2524_v55  ;;  %v744_v52 = vcombine.high %v736_v47, %v736_v47  ;;  %v745_v53 = vcombine.high %v743_v48, %v743_v48  ;;  %v746_v54 = vcombine.high %v282_v51, %v282_v51  ;;  %v2891_v55 = vld [vmem:[%s13949_s22 + $0x110] sm:$0xff] }
  0xe2   : > { %6201 = vmatprep.subr.bf16.mxu0 %v13027_v58  ;;  %6241 = vmatprep.subr.bf16.mxu1 %v13029_v59  ;;  %v3083_v58 = vld [vmem:[%s13949_s22 + $0x710] sm:$0x11]  ;;  %v2892_v59 = vld [vmem:[%s13949_s22 + $0x118] sm:$0xff]  ;;  %v2537_v10 = vpack.c.bf16 %v736_v47, %v736_v47  ;;  %v2539_v11 = vpack.c.bf16 %v743_v48, %v743_v48 }
  0xe3   : > { %v2538_v63 = vpack.c.bf16 %v744_v52, %v744_v52  ;;  %v2540_v0 = vpack.c.bf16 %v745_v53, %v745_v53  ;;  %v13043_v3 = vcombine.high %v2891_v55, %v3083_v58  ;;  %v13045_v4 = vcombine.high %v2892_v59, %v3084_v60 }
  0xe4   : > { %v13042_v15 = vcombine.low %v2891_v55, %v3083_v58  ;;  %v13044_v16 = vcombine.low %v2892_v59, %v3084_v60  ;;  %v286_v60 = vld [vmem:[%s13942_s12 + $0xa8] sm:$0xff] }
  0xe7   : > { %6154 = vmatmul.mubr.bf16.vlgmr.msra.gmra.mrb[48].mxu0 %v2521_v1  ;;  %6194 = vmatmul.mubr.bf16.vlgmr.msra.gmra.mrb[48].mxu1 %v2523_v2  ;;  %v753_v1 = vrot.slane %v282_v51, %v13970_v24  ;;  %v760_v2 = vrot.slane %v746_v54, %v13970_v24  ;;  %v3090_v51 = vld [vmem:[%s13949_s22 + $0x748] sm:$0x11] }
  0xe8   : > { %6202 = vmatpush1.bf16.xpose.msra.mxu0 %v13026_v6  ;;  %6242 = vmatpush1.bf16.xpose.msra.mxu1 %v13028_v7 }
  0xe9   : > { %6233 = vmatprep.mubr.bf16.mxu0 %v2526_v8  ;;  %6273 = vmatprep.mubr.bf16.mxu1 %v2528_v9  ;;  %v761_v6 = vcombine.high %v753_v1, %v753_v1  ;;  %v762_v7 = vcombine.high %v760_v2, %v760_v2  ;;  %v763_v8 = vcombine.high %v283_v5, %v283_v5  ;;  %v2893_v9 = vld [vmem:[%s13949_s22 + $0x120] sm:$0xff] }
  0xea   : > { %6281 = vmatprep.subr.bf16.mxu0 %v13031_v12  ;;  %6321 = vmatprep.subr.bf16.mxu1 %v13033_v13  ;;  %v3085_v12 = vld [vmem:[%s13949_s22 + $0x720] sm:$0x11]  ;;  %v2894_v13 = vld [vmem:[%s13949_s22 + $0x128] sm:$0xff]  ;;  %v2541_v29 = vpack.c.bf16 %v753_v1, %v753_v1  ;;  %v2543_v30 = vpack.c.bf16 %v760_v2, %v760_v2 }
  0xeb   : > { %v2542_v17 = vpack.c.bf16 %v761_v6, %v761_v6  ;;  %v2544_v18 = vpack.c.bf16 %v762_v7, %v762_v7  ;;  %v13047_v21 = vcombine.high %v2893_v9, %v3085_v12  ;;  %v13049_v22 = vcombine.high %v2894_v13, %v3086_v14 }
  0xec   : > { %v13046_v34 = vcombine.low %v2893_v9, %v3085_v12  ;;  %v13048_v35 = vcombine.low %v2894_v13, %v3086_v14  ;;  %v287_v14 = vld [vmem:[%s13942_s12 + $0xb0] sm:$0xff] }
  0xef   : > { %6234 = vmatmul.mubr.bf16.vlgmr.msra.gmra.mrb[52].mxu0 %v2525_v19  ;;  %6274 = vmatmul.mubr.bf16.vlgmr.msra.gmra.mrb[52].mxu1 %v2527_v20  ;;  %v770_v19 = vrot.slane %v283_v5, %v13970_v24  ;;  %v777_v20 = vrot.slane %v763_v8, %v13970_v24  ;;  %v3092_v5 = vld [vmem:[%s13949_s22 + $0x758] sm:$0x11] }
  0xf0   : > { %6282 = vmatpush1.bf16.xpose.msra.mxu0 %v13030_v25  ;;  %6322 = vmatpush1.bf16.xpose.msra.mxu1 %v13032_v26 }
  0xf1   : > { %6313 = vmatprep.mubr.bf16.mxu0 %v2530_v27  ;;  %6353 = vmatprep.mubr.bf16.mxu1 %v2532_v28  ;;  %v778_v25 = vcombine.high %v770_v19, %v770_v19  ;;  %v779_v26 = vcombine.high %v777_v20, %v777_v20  ;;  %v780_v27 = vcombine.high %v284_v23, %v284_v23  ;;  %v2895_v28 = vld [vmem:[%s13949_s22 + $0x130] sm:$0xff] }
  0xf2   : > { %6361 = vmatprep.subr.bf16.mxu0 %v13035_v31  ;;  %6401 = vmatprep.subr.bf16.mxu1 %v13037_v32  ;;  %v3087_v31 = vld [vmem:[%s13949_s22 + $0x730] sm:$0x11]  ;;  %v2896_v32 = vld [vmem:[%s13949_s22 + $0x138] sm:$0xff]  ;;  %v2545_v47 = vpack.c.bf16 %v770_v19, %v770_v19  ;;  %v2547_v48 = vpack.c.bf16 %v777_v20, %v777_v20 }
  0xf3   : > { %v2546_v36 = vpack.c.bf16 %v778_v25, %v778_v25  ;;  %v2548_v37 = vpack.c.bf16 %v779_v26, %v779_v26  ;;  %v13051_v40 = vcombine.high %v2895_v28, %v3087_v31  ;;  %v13053_v41 = vcombine.high %v2896_v32, %v3088_v33 }
  0xf4   : > { %v13050_v52 = vcombine.low %v2895_v28, %v3087_v31  ;;  %v13052_v53 = vcombine.low %v2896_v32, %v3088_v33  ;;  %v288_v33 = vld [vmem:[%s13942_s12 + $0xb8] sm:$0xff] }
  0xf7   : > { %6314 = vmatmul.mubr.bf16.vlgmr.msra.gmra.mrb[56].mxu0 %v2529_v38  ;;  %6354 = vmatmul.mubr.bf16.vlgmr.msra.gmra.mrb[56].mxu1 %v2531_v39  ;;  %v787_v38 = vrot.slane %v284_v23, %v13970_v24  ;;  %v794_v39 = vrot.slane %v780_v27, %v13970_v24  ;;  %v3094_v23 = vld [vmem:[%s13949_s22 + $0x768] sm:$0x11] }
  0xf8   : > { %6362 = vmatpush1.bf16.xpose.msra.mxu0 %v13034_v43  ;;  %6402 = vmatpush1.bf16.xpose.msra.mxu1 %v13036_v44 }
  0xf9   : > { %6393 = vmatprep.mubr.bf16.mxu0 %v2534_v45  ;;  %6433 = vmatprep.mubr.bf16.mxu1 %v2536_v46  ;;  %v795_v43 = vcombine.high %v787_v38, %v787_v38  ;;  %v796_v44 = vcombine.high %v794_v39, %v794_v39  ;;  %v797_v45 = vcombine.high %v285_v42, %v285_v42  ;;  %v2897_v46 = vld [vmem:[%s13949_s22 + $0x140] sm:$0xff] }
  0xfa   : > { %6441 = vmatprep.subr.bf16.mxu0 %v13039_v49  ;;  %6481 = vmatprep.subr.bf16.mxu1 %v13041_v50  ;;  %v3089_v49 = vld [vmem:[%s13949_s22 + $0x740] sm:$0x11]  ;;  %v2898_v50 = vld [vmem:[%s13949_s22 + $0x148] sm:$0xff]  ;;  %v2549_v1 = vpack.c.bf16 %v787_v38, %v787_v38  ;;  %v2551_v2 = vpack.c.bf16 %v794_v39, %v794_v39 }
  0xfb   : > { %v2550_v54 = vpack.c.bf16 %v795_v43, %v795_v43  ;;  %v2552_v55 = vpack.c.bf16 %v796_v44, %v796_v44  ;;  %v13055_v58 = vcombine.high %v2897_v46, %v3089_v49  ;;  %v13057_v59 = vcombine.high %v2898_v50, %v3090_v51 }
  0xfc   : > { %v13054_v6 = vcombine.low %v2897_v46, %v3089_v49  ;;  %v13056_v7 = vcombine.low %v2898_v50, %v3090_v51  ;;  %v289_v51 = vld [vmem:[%s13942_s12 + $0xc0] sm:$0xff] }
  0xff   : > { %6394 = vmatmul.mubr.bf16.vlgmr.msra.gmra.mrb[60].mxu0 %v2533_v56  ;;  %6434 = vmatmul.mubr.bf16.vlgmr.msra.gmra.mrb[60].mxu1 %v2535_v57  ;;  %v804_v56 = vrot.slane %v285_v42, %v13970_v24  ;;  %v811_v57 = vrot.slane %v797_v45, %v13970_v24  ;;  %v3096_v42 = vld [vmem:[%s13949_s22 + $0x778] sm:$0x11] }
 0x100   : > { %6442 = vmatpush1.bf16.xpose.msra.mxu0 %v13038_v61  ;;  %6482 = vmatpush1.bf16.xpose.msra.mxu1 %v13040_v62 }
 0x101   : > { %6473 = vmatprep.mubr.bf16.mxu0 %v2538_v63  ;;  %6513 = vmatprep.mubr.bf16.mxu1 %v2540_v0  ;;  %v812_v61 = vcombine.high %v804_v56, %v804_v56  ;;  %v813_v62 = vcombine.high %v811_v57, %v811_v57  ;;  %v814_v63 = vcombine.high %v286_v60, %v286_v60  ;;  %v2899_v0 = vld [vmem:[%s13949_s22 + $0x150] sm:$0xff] }
 0x102   : > { %6521 = vmatprep.subr.bf16.mxu0 %v13043_v3  ;;  %6561 = vmatprep.subr.bf16.mxu1 %v13045_v4  ;;  %v3091_v3 = vld [vmem:[%s13949_s22 + $0x750] sm:$0x11]  ;;  %v2900_v4 = vld [vmem:[%s13949_s22 + $0x158] sm:$0xff]  ;;  %v2553_v19 = vpack.c.bf16 %v804_v56, %v804_v56  ;;  %v2555_v20 = vpack.c.bf16 %v811_v57, %v811_v57 }
 0x103   : > { %v2554_v8 = vpack.c.bf16 %v812_v61, %v812_v61  ;;  %v2556_v9 = vpack.c.bf16 %v813_v62, %v813_v62  ;;  %v13059_v12 = vcombine.high %v2899_v0, %v3091_v3  ;;  %v13061_v13 = vcombine.high %v2900_v4, %v3092_v5 }
 0x104   : > { %v13058_v25 = vcombine.low %v2899_v0, %v3091_v3  ;;  %v13060_v26 = vcombine.low %v2900_v4, %v3092_v5  ;;  %v290_v5 = vld [vmem:[%s13942_s12 + $0xc8] sm:$0xff] }
 0x107   : > { %6474 = vmatmul.mubr.bf16.vlgmr.msra.gmra.mrb[64].mxu0 %v2537_v10  ;;  %6514 = vmatmul.mubr.bf16.vlgmr.msra.gmra.mrb[64].mxu1 %v2539_v11  ;;  %v821_v10 = vrot.slane %v286_v60, %v13970_v24  ;;  %v828_v11 = vrot.slane %v814_v63, %v13970_v24  ;;  %v3098_v60 = vld [vmem:[%s13949_s22 + $0x788] sm:$0x11] }
 0x108   : > { %6522 = vmatpush1.bf16.xpose.msra.mxu0 %v13042_v15  ;;  %6562 = vmatpush1.bf16.xpose.msra.mxu1 %v13044_v16 }
 0x109   : > { %6553 = vmatprep.mubr.bf16.mxu0 %v2542_v17  ;;  %6593 = vmatprep.mubr.bf16.mxu1 %v2544_v18  ;;  %v829_v15 = vcombine.high %v821_v10, %v821_v10  ;;  %v830_v16 = vcombine.high %v828_v11, %v828_v11  ;;  %v831_v17 = vcombine.high %v287_v14, %v287_v14  ;;  %v2901_v18 = vld [vmem:[%s13949_s22 + $0x160] sm:$0xff] }
 0x10a   : > { %6601 = vmatprep.subr.bf16.mxu0 %v13047_v21  ;;  %6641 = vmatprep.subr.bf16.mxu1 %v13049_v22  ;;  %v3093_v21 = vld [vmem:[%s13949_s22 + $0x760] sm:$0x11]  ;;  %v2902_v22 = vld [vmem:[%s13949_s22 + $0x168] sm:$0xff]  ;;  %v2557_v38 = vpack.c.bf16 %v821_v10, %v821_v10  ;;  %v2559_v39 = vpack.c.bf16 %v828_v11, %v828_v11 }
 0x10b   : > { %v2558_v27 = vpack.c.bf16 %v829_v15, %v829_v15  ;;  %v2560_v28 = vpack.c.bf16 %v830_v16, %v830_v16  ;;  %v13063_v31 = vcombine.high %v2901_v18, %v3093_v21  ;;  %v13065_v32 = vcombine.high %v2902_v22, %v3094_v23 }
 0x10c   : > { %v13062_v43 = vcombine.low %v2901_v18, %v3093_v21  ;;  %v13064_v44 = vcombine.low %v2902_v22, %v3094_v23  ;;  %v291_v23 = vld [vmem:[%s13942_s12 + $0xd0] sm:$0xff] }
 0x10f   : > { %6554 = vmatmul.mubr.bf16.vlgmr.msra.gmra.mrb[68].mxu0 %v2541_v29  ;;  %6594 = vmatmul.mubr.bf16.vlgmr.msra.gmra.mrb[68].mxu1 %v2543_v30  ;;  %v838_v29 = vrot.slane %v287_v14, %v13970_v24  ;;  %v845_v30 = vrot.slane %v831_v17, %v13970_v24  ;;  %v3100_v14 = vld [vmem:[%s13949_s22 + $0x798] sm:$0x11] }
 0x110   : > { %6602 = vmatpush1.bf16.xpose.msra.mxu0 %v13046_v34  ;;  %6642 = vmatpush1.bf16.xpose.msra.mxu1 %v13048_v35 }
 0x111   : > { %6633 = vmatprep.mubr.bf16.mxu0 %v2546_v36  ;;  %6673 = vmatprep.mubr.bf16.mxu1 %v2548_v37  ;;  %v846_v34 = vcombine.high %v838_v29, %v838_v29  ;;  %v847_v35 = vcombine.high %v845_v30, %v845_v30  ;;  %v848_v36 = vcombine.high %v288_v33, %v288_v33  ;;  %v2903_v37 = vld [vmem:[%s13949_s22 + $0x170] sm:$0xff] }
 0x112   : > { %6681 = vmatprep.subr.bf16.mxu0 %v13051_v40  ;;  %6721 = vmatprep.subr.bf16.mxu1 %v13053_v41  ;;  %v3095_v40 = vld [vmem:[%s13949_s22 + $0x770] sm:$0x11]  ;;  %v2904_v41 = vld [vmem:[%s13949_s22 + $0x178] sm:$0xff]  ;;  %v2561_v56 = vpack.c.bf16 %v838_v29, %v838_v29  ;;  %v2563_v57 = vpack.c.bf16 %v845_v30, %v845_v30 }
 0x113   : > { %v2562_v45 = vpack.c.bf16 %v846_v34, %v846_v34  ;;  %v2564_v46 = vpack.c.bf16 %v847_v35, %v847_v35  ;;  %v13067_v49 = vcombine.high %v2903_v37, %v3095_v40  ;;  %v13069_v50 = vcombine.high %v2904_v41, %v3096_v42 }
 0x114   : > { %v13066_v61 = vcombine.low %v2903_v37, %v3095_v40  ;;  %v13068_v62 = vcombine.low %v2904_v41, %v3096_v42  ;;  %v292_v42 = vld [vmem:[%s13942_s12 + $0xd8] sm:$0xff] }
 0x117   : > { %6634 = vmatmul.mubr.bf16.vlgmr.msra.gmra.mrb[72].mxu0 %v2545_v47  ;;  %6674 = vmatmul.mubr.bf16.vlgmr.msra.gmra.mrb[72].mxu1 %v2547_v48  ;;  %v855_v47 = vrot.slane %v288_v33, %v13970_v24  ;;  %v862_v48 = vrot.slane %v848_v36, %v13970_v24  ;;  %v3102_v33 = vld [vmem:[%s13949_s22 + $0x7a8] sm:$0x11] }
 0x118   : > { %6682 = vmatpush1.bf16.xpose.msra.mxu0 %v13050_v52  ;;  %6722 = vmatpush1.bf16.xpose.msra.mxu1 %v13052_v53 }
 0x119   : > { %6713 = vmatprep.mubr.bf16.mxu0 %v2550_v54  ;;  %6753 = vmatprep.mubr.bf16.mxu1 %v2552_v55  ;;  %v863_v52 = vcombine.high %v855_v47, %v855_v47  ;;  %v864_v53 = vcombine.high %v862_v48, %v862_v48  ;;  %v865_v54 = vcombine.high %v289_v51, %v289_v51  ;;  %v2905_v55 = vld [vmem:[%s13949_s22 + $0x180] sm:$0xff] }
 0x11a   : > { %6761 = vmatprep.subr.bf16.mxu0 %v13055_v58  ;;  %6801 = vmatprep.subr.bf16.mxu1 %v13057_v59  ;;  %v3097_v58 = vld [vmem:[%s13949_s22 + $0x780] sm:$0x11]  ;;  %v2906_v59 = vld [vmem:[%s13949_s22 + $0x188] sm:$0xff]  ;;  %v2565_v10 = vpack.c.bf16 %v855_v47, %v855_v47  ;;  %v2567_v11 = vpack.c.bf16 %v862_v48, %v862_v48 }
 0x11b   : > { %v2566_v63 = vpack.c.bf16 %v863_v52, %v863_v52  ;;  %v2568_v0 = vpack.c.bf16 %v864_v53, %v864_v53  ;;  %v13071_v3 = vcombine.high %v2905_v55, %v3097_v58  ;;  %v13073_v4 = vcombine.high %v2906_v59, %v3098_v60 }
 0x11c   : > { %v13070_v15 = vcombine.low %v2905_v55, %v3097_v58  ;;  %v13072_v16 = vcombine.low %v2906_v59, %v3098_v60  ;;  %v293_v60 = vld [vmem:[%s13942_s12 + $0xe0] sm:$0xff] }
 0x11f   : > { %6714 = vmatmul.mubr.bf16.vlgmr.msra.gmra.mrb[76].mxu0 %v2549_v1  ;;  %6754 = vmatmul.mubr.bf16.vlgmr.msra.gmra.mrb[76].mxu1 %v2551_v2  ;;  %v872_v1 = vrot.slane %v289_v51, %v13970_v24  ;;  %v879_v2 = vrot.slane %v865_v54, %v13970_v24  ;;  %v3104_v51 = vld [vmem:[%s13949_s22 + $0x7b8] sm:$0x11] }
 0x120   : > { %6762 = vmatpush1.bf16.xpose.msra.mxu0 %v13054_v6  ;;  %6802 = vmatpush1.bf16.xpose.msra.mxu1 %v13056_v7 }
 0x121   : > { %6793 = vmatprep.mubr.bf16.mxu0 %v2554_v8  ;;  %6833 = vmatprep.mubr.bf16.mxu1 %v2556_v9  ;;  %v880_v6 = vcombine.high %v872_v1, %v872_v1  ;;  %v881_v7 = vcombine.high %v879_v2, %v879_v2  ;;  %v882_v8 = vcombine.high %v290_v5, %v290_v5  ;;  %v2907_v9 = vld [vmem:[%s13949_s22 + $0x190] sm:$0xff] }
 0x122   : > { %6841 = vmatprep.subr.bf16.mxu0 %v13059_v12  ;;  %6881 = vmatprep.subr.bf16.mxu1 %v13061_v13  ;;  %v3099_v12 = vld [vmem:[%s13949_s22 + $0x790] sm:$0x11]  ;;  %v2908_v13 = vld [vmem:[%s13949_s22 + $0x198] sm:$0xff]  ;;  %v2569_v29 = vpack.c.bf16 %v872_v1, %v872_v1  ;;  %v2571_v30 = vpack.c.bf16 %v879_v2, %v879_v2 }
 0x123   : > { %v2570_v17 = vpack.c.bf16 %v880_v6, %v880_v6  ;;  %v2572_v18 = vpack.c.bf16 %v881_v7, %v881_v7  ;;  %v13075_v21 = vcombine.high %v2907_v9, %v3099_v12  ;;  %v13077_v22 = vcombine.high %v2908_v13, %v3100_v14 }
 0x124   : > { %v13074_v34 = vcombine.low %v2907_v9, %v3099_v12  ;;  %v13076_v35 = vcombine.low %v2908_v13, %v3100_v14  ;;  %v294_v14 = vld [vmem:[%s13942_s12 + $0xe8] sm:$0xff] }
 0x127   : > { %6794 = vmatmul.mubr.bf16.vlgmr.msra.gmra.mrb[80].mxu0 %v2553_v19  ;;  %6834 = vmatmul.mubr.bf16.vlgmr.msra.gmra.mrb[80].mxu1 %v2555_v20  ;;  %v889_v19 = vrot.slane %v290_v5, %v13970_v24  ;;  %v896_v20 = vrot.slane %v882_v8, %v13970_v24  ;;  %v3106_v5 = vld [vmem:[%s13949_s22 + $0x7c8] sm:$0x11] }
 0x128   : > { %6842 = vmatpush1.bf16.xpose.msra.mxu0 %v13058_v25  ;;  %6882 = vmatpush1.bf16.xpose.msra.mxu1 %v13060_v26 }
 0x129   : > { %6873 = vmatprep.mubr.bf16.mxu0 %v2558_v27  ;;  %6913 = vmatprep.mubr.bf16.mxu1 %v2560_v28  ;;  %v897_v25 = vcombine.high %v889_v19, %v889_v19  ;;  %v898_v26 = vcombine.high %v896_v20, %v896_v20  ;;  %v899_v27 = vcombine.high %v291_v23, %v291_v23  ;;  %v2909_v28 = vld [vmem:[%s13949_s22 + $0x1a0] sm:$0xff] }
 0x12a   : > { %6921 = vmatprep.subr.bf16.mxu0 %v13063_v31  ;;  %6961 = vmatprep.subr.bf16.mxu1 %v13065_v32  ;;  %v3101_v31 = vld [vmem:[%s13949_s22 + $0x7a0] sm:$0x11]  ;;  %v2910_v32 = vld [vmem:[%s13949_s22 + $0x1a8] sm:$0xff]  ;;  %v2573_v47 = vpack.c.bf16 %v889_v19, %v889_v19  ;;  %v2575_v48 = vpack.c.bf16 %v896_v20, %v896_v20  ;;  %v3107_v20 = vld [vmem:[%s13949_s22 + $0x7d0] sm:$0x11] }
 0x12b   : > { %v2574_v36 = vpack.c.bf16 %v897_v25, %v897_v25  ;;  %v2576_v37 = vpack.c.bf16 %v898_v26, %v898_v26  ;;  %v13079_v40 = vcombine.high %v2909_v28, %v3101_v31  ;;  %v13081_v41 = vcombine.high %v2910_v32, %v3102_v33 }
 0x12c   : > { %v13078_v52 = vcombine.low %v2909_v28, %v3101_v31  ;;  %v13080_v53 = vcombine.low %v2910_v32, %v3102_v33  ;;  %v2916_v28 = vld [vmem:[%s13949_s22 + $0x1d8] sm:$0xff] }
 0x12f   : > { %6874 = vmatmul.mubr.bf16.vlgmr.msra.gmra.mrb[84].mxu0 %v2557_v38  ;;  %6914 = vmatmul.mubr.bf16.vlgmr.msra.gmra.mrb[84].mxu1 %v2559_v39  ;;  %v906_v38 = vrot.slane %v291_v23, %v13970_v24  ;;  %v913_v39 = vrot.slane %v899_v27, %v13970_v24  ;;  %v2915_v27 = vld [vmem:[%s13949_s22 + $0x1d0] sm:$0xff] }
 0x130   : > { %6922 = vmatpush1.bf16.xpose.msra.mxu0 %v13062_v43  ;;  %6962 = vmatpush1.bf16.xpose.msra.mxu1 %v13064_v44 }
 0x131   : > { %6953 = vmatprep.mubr.bf16.mxu0 %v2562_v45  ;;  %6993 = vmatprep.mubr.bf16.mxu1 %v2564_v46  ;;  %v914_v43 = vcombine.high %v906_v38, %v906_v38  ;;  %v915_v44 = vcombine.high %v913_v39, %v913_v39  ;;  %v916_v45 = vcombine.high %v292_v42, %v292_v42  ;;  %v2911_v46 = vld [vmem:[%s13949_s22 + $0x1b0] sm:$0xff] }
 0x132   : > { %7001 = vmatprep.subr.bf16.mxu0 %v13067_v49  ;;  %7041 = vmatprep.subr.bf16.mxu1 %v13069_v50  ;;  %v3103_v49 = vld [vmem:[%s13949_s22 + $0x7b0] sm:$0x11]  ;;  %v2912_v50 = vld [vmem:[%s13949_s22 + $0x1b8] sm:$0xff]  ;;  %v2577_v1 = vpack.c.bf16 %v906_v38, %v906_v38  ;;  %v2579_v2 = vpack.c.bf16 %v913_v39, %v913_v39  ;;  %v14191_v38 = vrot.slane %v294_v14, %v13970_v24 }
 0x133   : > { %v2578_v54 = vpack.c.bf16 %v914_v43, %v914_v43  ;;  %v2580_v55 = vpack.c.bf16 %v915_v44, %v915_v44  ;;  %v13083_v58 = vcombine.high %v2911_v46, %v3103_v49  ;;  %v13085_v59 = vcombine.high %v2912_v50, %v3104_v51 }
 0x134   : > { %v13082_v6 = vcombine.low %v2911_v46, %v3103_v49  ;;  %v13084_v7 = vcombine.low %v2912_v50, %v3104_v51  ;;  %v965_v43 = vcombine.high %v14191_v38, %v14191_v38 }
 0x137   : > { %6954 = vmatmul.mubr.bf16.vlgmr.msra.gmra.mrb[88].mxu0 %v2561_v56  ;;  %6994 = vmatmul.mubr.bf16.vlgmr.msra.gmra.mrb[88].mxu1 %v2563_v57  ;;  %v14157_v56 = vrot.slane %v292_v42, %v13970_v24  ;;  %v14160_v57 = vrot.slane %v916_v45, %v13970_v24  ;;  %v295_v42 = vld [vmem:[%s13942_s12 + $0xf0] sm:$0xff] }
 0x138   : > { %7002 = vmatpush1.bf16.xpose.msra.mxu0 %v13066_v61  ;;  %7042 = vmatpush1.bf16.xpose.msra.mxu1 %v13068_v62  ;;  %v967_v45 = vcombine.high %v295_v42, %v295_v42 }
 0x139   : > { %7033 = vmatprep.mubr.bf16.mxu0 %v2566_v63  ;;  %7073 = vmatprep.mubr.bf16.mxu1 %v2568_v0  ;;  %v931_v61 = vcombine.high %v14157_v56, %v14157_v56  ;;  %v932_v62 = vcombine.high %v14160_v57, %v14160_v57  ;;  %v933_v63 = vcombine.high %v293_v60, %v293_v60  ;;  %v2913_v0 = vld [vmem:[%s13949_s22 + $0x1c0] sm:$0xff] }
 0x13a   : > { %7081 = vmatprep.subr.bf16.mxu0 %v13071_v3  ;;  %7121 = vmatprep.subr.bf16.mxu1 %v13073_v4  ;;  %v3105_v3 = vld [vmem:[%s13949_s22 + $0x7c0] sm:$0x11]  ;;  %v2914_v4 = vld [vmem:[%s13949_s22 + $0x1c8] sm:$0xff]  ;;  %v2581_v25 = vpack.c.bf16 %v14157_v56, %v14157_v56  ;;  %v2583_v26 = vpack.c.bf16 %v14160_v57, %v14160_v57 }
 0x13b   : > { %v2582_v8 = vpack.c.bf16 %v931_v61, %v931_v61  ;;  %v2584_v9 = vpack.c.bf16 %v932_v62, %v932_v62  ;;  %v13087_v12 = vcombine.high %v2913_v0, %v3105_v3  ;;  %v13089_v13 = vcombine.high %v2914_v4, %v3106_v5  ;;  %v3110_v56 = vld [vmem:[%s13949_s22 + $0x7e8] sm:$0x11] }
 0x13c   : > { %v13086_v32 = vcombine.low %v2913_v0, %v3105_v3  ;;  %v13088_v33 = vcombine.low %v2914_v4, %v3106_v5  ;;  %v14210_v61 = vrot.slane %v295_v42, %v13970_v24  ;;  %v14213_v3 = vrot.slane %v967_v45, %v13970_v24 }
 0x13e   : > { %v2593_v45 = vpack.c.bf16 %v14210_v61, %v14210_v61 }
 0x13f   : > { %7034 = vmatmul.mubr.bf16.vlgmr.msra.gmra.mrb[92].mxu0 %v2565_v10  ;;  %7074 = vmatmul.mubr.bf16.vlgmr.msra.gmra.mrb[92].mxu1 %v2567_v11  ;;  %v14172_v10 = vrot.slane %v293_v60, %v13970_v24  ;;  %v14175_v11 = vrot.slane %v933_v63, %v13970_v24 }
 0x140   : > { %7082 = vmatpush1.bf16.xpose.msra.mxu0 %v13070_v15  ;;  %7122 = vmatpush1.bf16.xpose.msra.mxu1 %v13072_v16 }
 0x141   : > { %7113 = vmatprep.mubr.bf16.mxu0 %v2570_v17  ;;  %7153 = vmatprep.mubr.bf16.mxu1 %v2572_v18  ;;  %v948_v15 = vcombine.high %v14172_v10, %v14172_v10  ;;  %v949_v16 = vcombine.high %v14175_v11, %v14175_v11  ;;  %v950_v17 = vcombine.high %v294_v14, %v294_v14 }
 0x142   : > { %7161 = vmatprep.subr.bf16.mxu0 %v13075_v21  ;;  %7201 = vmatprep.subr.bf16.mxu1 %v13077_v22 }
 0x143   : > { %v14194_v39 = vrot.slane %v950_v17, %v13970_v24 }
 0x145   : > { %v966_v44 = vcombine.high %v14194_v39, %v14194_v39  ;;  %v2591_v17 = vpack.c.bf16 %v14194_v39, %v14194_v39 }
 0x147   : > { %7114 = vmatmul.mubr.bf16.vlgmr.msra.gmra.mrb[96].mxu0 %v2569_v29  ;;  %7154 = vmatmul.mubr.bf16.vlgmr.msra.gmra.mrb[96].mxu1 %v2571_v30  ;;  %v3108_v29 = vld [vmem:[%s13949_s22 + $0x7d8] sm:$0x11] }
 0x148   : > { %7162 = vmatpush1.bf16.xpose.msra.mxu0 %v13074_v34  ;;  %7202 = vmatpush1.bf16.xpose.msra.mxu1 %v13076_v35  ;;  %v13092_v60 = vcombine.low %v2916_v28, %v3108_v29 }
 0x149   : > { %7193 = vmatprep.mubr.bf16.mxu0 %v2574_v36  ;;  %7233 = vmatprep.mubr.bf16.mxu1 %v2576_v37  ;;  %v2586_v36 = vpack.c.bf16 %v948_v15, %v948_v15  ;;  %v2588_v37 = vpack.c.bf16 %v949_v16, %v949_v16  ;;  %v2589_v16 = vpack.c.bf16 %v14191_v38, %v14191_v38 }
 0x14a   : > { %7241 = vmatprep.subr.bf16.mxu0 %v13079_v40  ;;  %7281 = vmatprep.subr.bf16.mxu1 %v13081_v41  ;;  %v13091_v40 = vcombine.high %v2915_v27, %v3107_v20  ;;  %v13093_v41 = vcombine.high %v2916_v28, %v3108_v29 }
 0x14f   : > { %7194 = vmatmul.mubr.bf16.vlgmr.msra.gmra.mrb[100].mxu0 %v2573_v47  ;;  %7234 = vmatmul.mubr.bf16.vlgmr.msra.gmra.mrb[100].mxu1 %v2575_v48  ;;  %v3109_v48 = vld [vmem:[%s13949_s22 + $0x7e0] sm:$0x11] }
 0x150   : > { %7242 = vmatpush1.bf16.xpose.msra.mxu0 %v13078_v52  ;;  %7282 = vmatpush1.bf16.xpose.msra.mxu1 %v13080_v53  ;;  %v2585_v52 = vpack.c.bf16 %v14172_v10, %v14172_v10  ;;  %v2587_v53 = vpack.c.bf16 %v14175_v11, %v14175_v11 }
 0x151   : > { %7273 = vmatprep.mubr.bf16.mxu0 %v2578_v54  ;;  %7313 = vmatprep.mubr.bf16.mxu1 %v2580_v55  ;;  %v2917_v54 = vld [vmem:[%s13949_s22 + $0x1e0] sm:$0xff]  ;;  %v2918_v55 = vld [vmem:[%s13949_s22 + $0x1e8] sm:$0xff] }
 0x152   : > { %7321 = vmatprep.subr.bf16.mxu0 %v13083_v58  ;;  %7361 = vmatprep.subr.bf16.mxu1 %v13085_v59  ;;  %v13090_v59 = vcombine.low %v2915_v27, %v3107_v20  ;;  %v13095_v4 = vcombine.high %v2917_v54, %v3109_v48  ;;  %v13097_v5 = vcombine.high %v2918_v55, %v3110_v56  ;;  %v3112_v20 = vld [vmem:[%s13949_s22 + $0x7f8] sm:$0x11] }
 0x157   : > { %7274 = vmatmul.mubr.bf16.vlgmr.msra.gmra.mrb[104].mxu0 %v2577_v1  ;;  %7314 = vmatmul.mubr.bf16.vlgmr.msra.gmra.mrb[104].mxu1 %v2579_v2  ;;  %v2590_v1 = vpack.c.bf16 %v965_v43, %v965_v43  ;;  %v2592_v2 = vpack.c.bf16 %v966_v44, %v966_v44 }
 0x158   : > { %7322 = vmatpush1.bf16.xpose.msra.mxu0 %v13082_v6  ;;  %7362 = vmatpush1.bf16.xpose.msra.mxu1 %v13084_v7  ;;  %v296_v6 = vld [vmem:[%s13942_s12 + $0xf8] sm:$0xff]  ;;  %v982_v7 = vcombine.high %v14210_v61, %v14210_v61 }
 0x159   : > { %7353 = vmatprep.mubr.bf16.mxu0 %v2582_v8  ;;  %7393 = vmatprep.mubr.bf16.mxu1 %v2584_v9  ;;  %v983_v8 = vcombine.high %v14213_v3, %v14213_v3  ;;  %v984_v9 = vcombine.high %v296_v6, %v296_v6 }
 0x15a   : > { %v5195_v18 = vpop.f32.mrb[0].mxu0  ;;  %v5235_v19 = vpop.f32.mrb[0].mxu1  ;;  %7401 = vmatprep.subr.bf16.mxu0 %v13087_v12  ;;  %7441 = vmatprep.subr.bf16.mxu1 %v13089_v13  ;;  %v3111_v12 = vld [vmem:[%s13949_s22 + $0x7f0] sm:$0x11] }
 0x15b   : > { %v5236_v21 = vadd.f32 %v5235_v19, %v5195_v18  ;;  %v5197_v22 = vpop.f32.mrb[1].mxu0  ;;  %v5237_v23 = vpop.f32.mrb[1].mxu1  ;;  %v2919_v18 = vld [vmem:[%s13949_s22 + $0x1f0] sm:$0xff]  ;;  %v2920_v19 = vld [vmem:[%s13949_s22 + $0x1f8] sm:$0xff] }
 0x15c   : > { %v5198_v30 = vpop.f32.mrb[2].mxu0  ;;  %v5238_v31 = vpop.f32.mrb[2].mxu1  ;;  %v13094_v23 = vcombine.low %v2917_v54, %v3109_v48  ;;  %v2922_v48 = vld [vmem:[%s13949_s22 + $0x208] sm:$0xff] }
 0x15d   : > { %v5199_v34 = vpop.f32.mrb[3].mxu0  ;;  %v5239_v35 = vpop.f32.mrb[3].mxu1  ;;  %v2596_v30 = vpack.c.bf16 %v983_v8, %v983_v8  ;;  %v14229_v31 = vrot.slane %v296_v6, %v13970_v24 }
 0x15e   : > { %v13101_v34 = vcombine.high %v2920_v19, %v3112_v20  ;;  %v297_v35 = vld [vmem:[%s13942_s12 + $0x100] sm:$0xff] }
 0x15f   : > { %7354 = vmatmul.mubr.bf16.vlgmr.msra.gmra.mrb[108].mxu0 %v2581_v25  ;;  %7394 = vmatmul.mubr.bf16.vlgmr.msra.gmra.mrb[108].mxu1 %v2583_v26  ;;  %v13096_v25 = vcombine.low %v2918_v55, %v3110_v56  ;;  %v2594_v26 = vpack.c.bf16 %v982_v7, %v982_v7  ;;  %v1001_v38 = vcombine.high %v297_v35, %v297_v35 }
 0x160   : > { %7402 = vmatpush1.bf16.xpose.msra.mxu0 %v13086_v32  ;;  %7442 = vmatpush1.bf16.xpose.msra.mxu1 %v13088_v33  ;;  %v14232_v32 = vrot.slane %v984_v9, %v13970_v24  ;;  %v13099_v33 = vcombine.high %v2919_v18, %v3111_v12  ;;  %v14248_v54 = vrot.slane %v297_v35, %v13970_v24 }
 0x161   : > { %7433 = vmatprep.mubr.bf16.mxu0 %v2586_v36  ;;  %7473 = vmatprep.mubr.bf16.mxu1 %v2588_v37  ;;  %v999_v36 = vcombine.high %v14229_v31, %v14229_v31  ;;  %v2597_v9 = vpack.c.bf16 %v14229_v31, %v14229_v31 }
 0x162   : > { %v5275_v46 = vpop.f32.mrb[4].mxu0  ;;  %v5315_v47 = vpop.f32.mrb[4].mxu1  ;;  %7481 = vmatprep.subr.bf16.mxu0 %v13091_v40  ;;  %7521 = vmatprep.subr.bf16.mxu1 %v13093_v41  ;;  %v1000_v37 = vcombine.high %v14232_v32, %v14232_v32  ;;  %v3113_v41 = vld [vmem:[%s13949_s22 + $0x800] sm:$0x11] }
 0x163   : > { %v5276_v49 = vadd.f32 %v5275_v46, %v5236_v21  ;;  %v5277_v50 = vpop.f32.mrb[5].mxu0  ;;  %v5317_v51 = vpop.f32.mrb[5].mxu1  ;;  %v2595_v46 = vpack.c.bf16 %v14213_v3, %v14213_v3 }
 0x164   : > { %v5278_v57 = vpop.f32.mrb[6].mxu0  ;;  %v5318_v58 = vpop.f32.mrb[6].mxu1 }
 0x165   : > { %v5316_v62 = vadd.f32 %v5315_v47, %v5276_v49  ;;  %v5279_v63 = vpop.f32.mrb[7].mxu0  ;;  %v5319_v0 = vpop.f32.mrb[7].mxu1  ;;  %v2921_v47 = vld [vmem:[%s13949_s22 + $0x200] sm:$0xff]  ;;  %v3114_v49 = vld [vmem:[%s13949_s22 + $0x808] sm:$0x11]  ;;  %v2598_v58 = vpack.c.bf16 %v999_v36, %v999_v36 }
 0x166   : > { %v13103_v61 = vcombine.high %v2921_v47, %v3113_v41  ;;  %v298_v63 = vld [vmem:[%s13942_s12 + $0x108] sm:$0xff]  ;;  %v1016_v0 = vcombine.high %v14248_v54, %v14248_v54 }
 0x167   : > { %7434 = vmatmul.mubr.bf16.vlgmr.msra.gmra.mrb[112].mxu0 %v2585_v52  ;;  %7474 = vmatmul.mubr.bf16.vlgmr.msra.gmra.mrb[112].mxu1 %v2587_v53  ;;  %v13098_v52 = vcombine.low %v2919_v18, %v3111_v12  ;;  %v13100_v53 = vcombine.low %v2920_v19, %v3112_v20  ;;  %v2924_v12 = vld [vmem:[%s13949_s22 + $0x218] sm:$0xff] }
 0x168   : > { %7482 = vmatpush1.bf16.xpose.msra.mxu0 %v13090_v59  ;;  %7522 = vmatpush1.bf16.xpose.msra.mxu1 %v13092_v60  ;;  %v2600_v59 = vpack.c.bf16 %v1000_v37, %v1000_v37  ;;  %v14251_v60 = vrot.slane %v1001_v38, %v13970_v24  ;;  %v2602_v18 = vpack.c.bf16 %v1016_v0, %v1016_v0 }
 0x169   : > { %7513 = vmatprep.mubr.bf16.mxu0 %v2590_v1  ;;  %7553 = vmatprep.mubr.bf16.mxu1 %v2592_v2  ;;  %v1018_v2 = vcombine.high %v298_v63, %v298_v63  ;;  %v2601_v38 = vpack.c.bf16 %v14248_v54, %v14248_v54 }
 0x16a   : > { %v5355_v10 = vpop.f32.mrb[8].mxu0  ;;  %v5395_v11 = vpop.f32.mrb[8].mxu1  ;;  %7561 = vmatprep.subr.bf16.mxu0 %v13095_v4  ;;  %7601 = vmatprep.subr.bf16.mxu1 %v13097_v5  ;;  %v1017_v1 = vcombine.high %v14251_v60, %v14251_v60  ;;  %v3115_v5 = vld [vmem:[%s13949_s22 + $0x810] sm:$0x11] }
 0x16b   : > { %v5356_v13 = vadd.f32 %v5355_v10, %v5316_v62  ;;  %v5357_v14 = vpop.f32.mrb[9].mxu0  ;;  %v5397_v15 = vpop.f32.mrb[9].mxu1  ;;  %v13105_v62 = vcombine.high %v2922_v48, %v3114_v49  ;;  %v2599_v10 = vpack.c.bf16 %v14232_v32, %v14232_v32 }
 0x16c   : > { %v5358_v21 = vpop.f32.mrb[10].mxu0  ;;  %v5398_v22 = vpop.f32.mrb[10].mxu1 }
 0x16d   : > { %v5396_v27 = vadd.f32 %v5395_v11, %v5356_v13  ;;  %v5359_v28 = vpop.f32.mrb[11].mxu0  ;;  %v5399_v29 = vpop.f32.mrb[11].mxu1  ;;  %v2923_v11 = vld [vmem:[%s13949_s22 + $0x210] sm:$0xff]  ;;  %v3116_v13 = vld [vmem:[%s13949_s22 + $0x818] sm:$0x11]  ;;  %v2604_v22 = vpack.c.bf16 %v1017_v1, %v1017_v1 }
 0x16e   : > { %v299_v28 = vld [vmem:[%s13942_s12 + $0x110] sm:$0xff] }
 0x16f   : > { %7514 = vmatmul.mubr.bf16.vlgmr.msra.gmra.mrb[116].mxu0 %v2589_v16  ;;  %7554 = vmatmul.mubr.bf16.vlgmr.msra.gmra.mrb[116].mxu1 %v2591_v17  ;;  %v13102_v16 = vcombine.low %v2921_v47, %v3113_v41  ;;  %v13104_v17 = vcombine.low %v2922_v48, %v3114_v49  ;;  %v1035_v31 = vcombine.high %v299_v28, %v299_v28  ;;  %v2926_v41 = vld [vmem:[%s13949_s22 + $0x228] sm:$0xff] }
 0x170   : > { %7562 = vmatpush1.bf16.xpose.msra.mxu0 %v13094_v23  ;;  %7602 = vmatpush1.bf16.xpose.msra.mxu1 %v13096_v25  ;;  %v14267_v23 = vrot.slane %v298_v63, %v13970_v24  ;;  %v14270_v25 = vrot.slane %v1018_v2, %v13970_v24  ;;  %v14286_v47 = vrot.slane %v299_v28, %v13970_v24 }
 0x171   : > { %7593 = vmatprep.mubr.bf16.mxu0 %v2594_v26  ;;  %7633 = vmatprep.mubr.bf16.mxu1 %v2596_v30  ;;  %v13107_v26 = vcombine.high %v2923_v11, %v3115_v5 }
 0x172   : > { %v5435_v39 = vpop.f32.mrb[12].mxu0  ;;  %v5475_v40 = vpop.f32.mrb[12].mxu1  ;;  %7641 = vmatprep.subr.bf16.mxu0 %v13099_v33  ;;  %7681 = vmatprep.subr.bf16.mxu1 %v13101_v34  ;;  %v1033_v29 = vcombine.high %v14267_v23, %v14267_v23  ;;  %v1034_v30 = vcombine.high %v14270_v25, %v14270_v25  ;;  %v3117_v34 = vld [vmem:[%s13949_s22 + $0x820] sm:$0x11]  ;;  %v2605_v2 = vpack.c.bf16 %v14267_v23, %v14267_v23 }
 0x173   : > { %v5436_v42 = vadd.f32 %v5435_v39, %v5396_v27  ;;  %v5437_v43 = vpop.f32.mrb[13].mxu0  ;;  %v5477_v44 = vpop.f32.mrb[13].mxu1  ;;  %v13109_v27 = vcombine.high %v2924_v12, %v3116_v13  ;;  %v2603_v39 = vpack.c.bf16 %v14251_v60, %v14251_v60 }
 0x174   : > { %v5438_v50 = vpop.f32.mrb[14].mxu0  ;;  %v5478_v51 = vpop.f32.mrb[14].mxu1 }
 0x175   : > { %v5476_v55 = vadd.f32 %v5475_v40, %v5436_v42  ;;  %v5439_v56 = vpop.f32.mrb[15].mxu0  ;;  %v5479_v57 = vpop.f32.mrb[15].mxu1  ;;  %v2925_v40 = vld [vmem:[%s13949_s22 + $0x220] sm:$0xff]  ;;  %v3118_v42 = vld [vmem:[%s13949_s22 + $0x828] sm:$0x11]  ;;  %v2606_v51 = vpack.c.bf16 %v1033_v29, %v1033_v29 }
 0x176   : > { %v13111_v54 = vcombine.high %v2925_v40, %v3117_v34  ;;  %v300_v56 = vld [vmem:[%s13942_s12 + $0x118] sm:$0xff]  ;;  %v1050_v57 = vcombine.high %v14286_v47, %v14286_v47 }
 0x177   : > { %7594 = vmatmul.mubr.bf16.vlgmr.msra.gmra.mrb[120].mxu0 %v2593_v45  ;;  %7634 = vmatmul.mubr.bf16.vlgmr.msra.gmra.mrb[120].mxu1 %v2595_v46  ;;  %v13106_v45 = vcombine.low %v2923_v11, %v3115_v5  ;;  %v13108_v46 = vcombine.low %v2924_v12, %v3116_v13  ;;  %v2928_v5 = vld [vmem:[%s13949_s22 + $0x238] sm:$0xff] }
 0x178   : > { %7642 = vmatpush1.bf16.xpose.msra.mxu0 %v13098_v52  ;;  %7682 = vmatpush1.bf16.xpose.msra.mxu1 %v13100_v53  ;;  %v2608_v52 = vpack.c.bf16 %v1034_v30, %v1034_v30  ;;  %v14289_v53 = vrot.slane %v1035_v31, %v13970_v24  ;;  %v2610_v11 = vpack.c.bf16 %v1050_v57, %v1050_v57 }
 0x179   : > { %7673 = vmatprep.mubr.bf16.mxu0 %v2598_v58  ;;  %7713 = vmatprep.mubr.bf16.mxu1 %v2600_v59  ;;  %v1052_v59 = vcombine.high %v300_v56, %v300_v56  ;;  %v2609_v31 = vpack.c.bf16 %v14286_v47, %v14286_v47 }
 0x17a   : > { %v5515_v3 = vpop.f32.mrb[16].mxu0  ;;  %v5555_v4 = vpop.f32.mrb[16].mxu1  ;;  %7721 = vmatprep.subr.bf16.mxu0 %v13103_v61  ;;  %7761 = vmatprep.subr.bf16.mxu1 %v13105_v62  ;;  %v1051_v58 = vcombine.high %v14289_v53, %v14289_v53  ;;  %v3119_v62 = vld [vmem:[%s13949_s22 + $0x830] sm:$0x11] }
 0x17b   : > { %v5516_v6 = vadd.f32 %v5515_v3, %v5476_v55  ;;  %v5517_v7 = vpop.f32.mrb[17].mxu0  ;;  %v5557_v8 = vpop.f32.mrb[17].mxu1  ;;  %v13113_v55 = vcombine.high %v2926_v41, %v3118_v42  ;;  %v2607_v3 = vpack.c.bf16 %v14270_v25, %v14270_v25 }
 0x17c   : > { %v5518_v14 = vpop.f32.mrb[18].mxu0  ;;  %v5558_v15 = vpop.f32.mrb[18].mxu1 }
 0x17d   : > { %v5556_v19 = vadd.f32 %v5555_v4, %v5516_v6  ;;  %v5519_v20 = vpop.f32.mrb[19].mxu0  ;;  %v5559_v21 = vpop.f32.mrb[19].mxu1  ;;  %v2927_v4 = vld [vmem:[%s13949_s22 + $0x230] sm:$0xff]  ;;  %v3120_v6 = vld [vmem:[%s13949_s22 + $0x838] sm:$0x11]  ;;  %v2612_v15 = vpack.c.bf16 %v1051_v58, %v1051_v58 }
 0x17e   : > { %v301_v20 = vld [vmem:[%s13942_s12 + $0x120] sm:$0xff] }
 0x17f   : > { %7674 = vmatmul.mubr.bf16.vlgmr.msra.gmra.mrb[124].mxu0 %v2597_v9  ;;  %7714 = vmatmul.mubr.bf16.vlgmr.msra.gmra.mrb[124].mxu1 %v2599_v10  ;;  %v13110_v9 = vcombine.low %v2925_v40, %v3117_v34  ;;  %v13112_v10 = vcombine.low %v2926_v41, %v3118_v42  ;;  %v1069_v23 = vcombine.high %v301_v20, %v301_v20  ;;  %v2930_v34 = vld [vmem:[%s13949_s22 + $0x248] sm:$0xff] }
 0x180   : > { %7722 = vmatpush1.bf16.xpose.msra.mxu0 %v13102_v16  ;;  %7762 = vmatpush1.bf16.xpose.msra.mxu1 %v13104_v17  ;;  %v14305_v16 = vrot.slane %v300_v56, %v13970_v24  ;;  %v14308_v17 = vrot.slane %v1052_v59, %v13970_v24  ;;  %v14324_v40 = vrot.slane %v301_v20, %v13970_v24 }
 0x181   : > { %7753 = vmatprep.mubr.bf16.mxu0 %v2602_v18  ;;  %7793 = vmatprep.mubr.bf16.mxu1 %v2604_v22  ;;  %v13115_v18 = vcombine.high %v2927_v4, %v3119_v62 }
 0x182   : > { %v5595_v32 = vpop.f32.mrb[20].mxu0  ;;  %v5635_v33 = vpop.f32.mrb[20].mxu1  ;;  %7801 = vmatprep.subr.bf16.mxu0 %v13107_v26  ;;  %7841 = vmatprep.subr.bf16.mxu1 %v13109_v27  ;;  %v1067_v21 = vcombine.high %v14305_v16, %v14305_v16  ;;  %v1068_v22 = vcombine.high %v14308_v17, %v14308_v17  ;;  %v3121_v27 = vld [vmem:[%s13949_s22 + $0x840] sm:$0x11]  ;;  %v2613_v59 = vpack.c.bf16 %v14305_v16, %v14305_v16 }
 0x183   : > { %v5596_v35 = vadd.f32 %v5595_v32, %v5556_v19  ;;  %v5597_v36 = vpop.f32.mrb[21].mxu0  ;;  %v5637_v37 = vpop.f32.mrb[21].mxu1  ;;  %v13117_v19 = vcombine.high %v2928_v5, %v3120_v6  ;;  %v2611_v32 = vpack.c.bf16 %v14289_v53, %v14289_v53 }
 0x184   : > { %v5598_v43 = vpop.f32.mrb[22].mxu0  ;;  %v5638_v44 = vpop.f32.mrb[22].mxu1 }
 0x185   : > { %v5636_v48 = vadd.f32 %v5635_v33, %v5596_v35  ;;  %v5599_v49 = vpop.f32.mrb[23].mxu0  ;;  %v5639_v50 = vpop.f32.mrb[23].mxu1  ;;  %v2929_v33 = vld [vmem:[%s13949_s22 + $0x240] sm:$0xff]  ;;  %v3122_v35 = vld [vmem:[%s13949_s22 + $0x848] sm:$0x11]  ;;  %v2614_v44 = vpack.c.bf16 %v1067_v21, %v1067_v21 }
 0x186   : > { %v13119_v47 = vcombine.high %v2929_v33, %v3121_v27  ;;  %v302_v49 = vld [vmem:[%s13942_s12 + $0x128] sm:$0xff]  ;;  %v1084_v50 = vcombine.high %v14324_v40, %v14324_v40 }
 0x187   : > { %7754 = vmatmul.mubr.bf16.vlgmr.msra.gmra.mrb[128].mxu0 %v2601_v38  ;;  %7794 = vmatmul.mubr.bf16.vlgmr.msra.gmra.mrb[128].mxu1 %v2603_v39  ;;  %v13114_v38 = vcombine.low %v2927_v4, %v3119_v62  ;;  %v13116_v39 = vcombine.low %v2928_v5, %v3120_v6  ;;  %v2932_v62 = vld [vmem:[%s13949_s22 + $0x258] sm:$0xff] }
 0x188   : > { %7802 = vmatpush1.bf16.xpose.msra.mxu0 %v13106_v45  ;;  %7842 = vmatpush1.bf16.xpose.msra.mxu1 %v13108_v46  ;;  %v2616_v45 = vpack.c.bf16 %v1068_v22, %v1068_v22  ;;  %v14327_v46 = vrot.slane %v1069_v23, %v13970_v24  ;;  %v2618_v4 = vpack.c.bf16 %v1084_v50, %v1084_v50 }
 0x189   : > { %7833 = vmatprep.mubr.bf16.mxu0 %v2606_v51  ;;  %7873 = vmatprep.mubr.bf16.mxu1 %v2608_v52  ;;  %v1086_v52 = vcombine.high %v302_v49, %v302_v49  ;;  %v2617_v23 = vpack.c.bf16 %v14324_v40, %v14324_v40 }
 0x18a   : > { %v5675_v60 = vpop.f32.mrb[24].mxu0  ;;  %v5715_v61 = vpop.f32.mrb[24].mxu1  ;;  %7881 = vmatprep.subr.bf16.mxu0 %v13111_v54  ;;  %7921 = vmatprep.subr.bf16.mxu1 %v13113_v55  ;;  %v1085_v51 = vcombine.high %v14327_v46, %v14327_v46  ;;  %v3123_v55 = vld [vmem:[%s13949_s22 + $0x850] sm:$0x11] }
 0x18b   : > { %v5676_v63 = vadd.f32 %v5675_v60, %v5636_v48  ;;  %v5677_v0 = vpop.f32.mrb[25].mxu0  ;;  %v5717_v1 = vpop.f32.mrb[25].mxu1  ;;  %v13121_v48 = vcombine.high %v2930_v34, %v3122_v35  ;;  %v2615_v60 = vpack.c.bf16 %v14308_v17, %v14308_v17 }
 0x18c   : > { %v5678_v7 = vpop.f32.mrb[26].mxu0  ;;  %v5718_v8 = vpop.f32.mrb[26].mxu1 }
 0x18d   : > { %v5716_v12 = vadd.f32 %v5715_v61, %v5676_v63  ;;  %v5679_v13 = vpop.f32.mrb[27].mxu0  ;;  %v5719_v14 = vpop.f32.mrb[27].mxu1  ;;  %v2931_v61 = vld [vmem:[%s13949_s22 + $0x250] sm:$0xff]  ;;  %v3124_v63 = vld [vmem:[%s13949_s22 + $0x858] sm:$0x11]  ;;  %v2620_v8 = vpack.c.bf16 %v1085_v51, %v1085_v51 }
 0x18e   : > { %v303_v13 = vld [vmem:[%s13942_s12 + $0x130] sm:$0xff] }
 0x18f   : > { %7834 = vmatmul.mubr.bf16.vlgmr.msra.gmra.mrb[132].mxu0 %v2605_v2  ;;  %7874 = vmatmul.mubr.bf16.vlgmr.msra.gmra.mrb[132].mxu1 %v2607_v3  ;;  %v13118_v2 = vcombine.low %v2929_v33, %v3121_v27  ;;  %v13120_v3 = vcombine.low %v2930_v34, %v3122_v35  ;;  %v1103_v16 = vcombine.high %v303_v13, %v303_v13  ;;  %v2934_v27 = vld [vmem:[%s13949_s22 + $0x268] sm:$0xff] }
 0x190   : > { %7882 = vmatpush1.bf16.xpose.msra.mxu0 %v13110_v9  ;;  %7922 = vmatpush1.bf16.xpose.msra.mxu1 %v13112_v10  ;;  %v14343_v9 = vrot.slane %v302_v49, %v13970_v24  ;;  %v14346_v10 = vrot.slane %v1086_v52, %v13970_v24  ;;  %v14362_v33 = vrot.slane %v303_v13, %v13970_v24 }
 0x191   : > { %7913 = vmatprep.mubr.bf16.mxu0 %v2610_v11  ;;  %7953 = vmatprep.mubr.bf16.mxu1 %v2612_v15  ;;  %v13123_v11 = vcombine.high %v2931_v61, %v3123_v55 }
 0x192   : > { %v5755_v25 = vpop.f32.mrb[28].mxu0  ;;  %v5795_v26 = vpop.f32.mrb[28].mxu1  ;;  %7961 = vmatprep.subr.bf16.mxu0 %v13115_v18  ;;  %8001 = vmatprep.subr.bf16.mxu1 %v13117_v19  ;;  %v1101_v14 = vcombine.high %v14343_v9, %v14343_v9  ;;  %v1102_v15 = vcombine.high %v14346_v10, %v14346_v10  ;;  %v3125_v19 = vld [vmem:[%s13949_s22 + $0x860] sm:$0x11]  ;;  %v2621_v52 = vpack.c.bf16 %v14343_v9, %v14343_v9 }
 0x193   : > { %v5756_v28 = vadd.f32 %v5755_v25, %v5716_v12  ;;  %v5757_v29 = vpop.f32.mrb[29].mxu0  ;;  %v5797_v30 = vpop.f32.mrb[29].mxu1  ;;  %v13125_v12 = vcombine.high %v2932_v62, %v3124_v63  ;;  %v2619_v25 = vpack.c.bf16 %v14327_v46, %v14327_v46 }
 0x194   : > { %v5758_v36 = vpop.f32.mrb[30].mxu0  ;;  %v5798_v37 = vpop.f32.mrb[30].mxu1 }
 0x195   : > { %v5796_v41 = vadd.f32 %v5795_v26, %v5756_v28  ;;  %v5759_v42 = vpop.f32.mrb[31].mxu0  ;;  %v5799_v43 = vpop.f32.mrb[31].mxu1  ;;  %v2933_v26 = vld [vmem:[%s13949_s22 + $0x260] sm:$0xff]  ;;  %v3126_v28 = vld [vmem:[%s13949_s22 + $0x868] sm:$0x11]  ;;  %v2622_v37 = vpack.c.bf16 %v1101_v14, %v1101_v14 }
 0x196   : > { %v13127_v40 = vcombine.high %v2933_v26, %v3125_v19  ;;  %v304_v42 = vld [vmem:[%s13942_s12 + $0x138] sm:$0xff]  ;;  %v1118_v43 = vcombine.high %v14362_v33, %v14362_v33 }
 0x197   : > { %7914 = vmatmul.mubr.bf16.vlgmr.msra.gmra.mrb[136].mxu0 %v2609_v31  ;;  %7954 = vmatmul.mubr.bf16.vlgmr.msra.gmra.mrb[136].mxu1 %v2611_v32  ;;  %v13122_v31 = vcombine.low %v2931_v61, %v3123_v55  ;;  %v13124_v32 = vcombine.low %v2932_v62, %v3124_v63  ;;  %v2936_v55 = vld [vmem:[%s13949_s22 + $0x278] sm:$0xff] }
 0x198   : > { %7962 = vmatpush1.bf16.xpose.msra.mxu0 %v13114_v38  ;;  %8002 = vmatpush1.bf16.xpose.msra.mxu1 %v13116_v39  ;;  %v2624_v38 = vpack.c.bf16 %v1102_v15, %v1102_v15  ;;  %v14365_v39 = vrot.slane %v1103_v16, %v13970_v24  ;;  %v2626_v61 = vpack.c.bf16 %v1118_v43, %v1118_v43 }
 0x199   : > { %7993 = vmatprep.mubr.bf16.mxu0 %v2614_v44  ;;  %8033 = vmatprep.mubr.bf16.mxu1 %v2616_v45  ;;  %v1120_v45 = vcombine.high %v304_v42, %v304_v42  ;;  %v2625_v16 = vpack.c.bf16 %v14362_v33, %v14362_v33 }
 0x19a   : > { %v5835_v53 = vpop.f32.mrb[32].mxu0  ;;  %v5875_v54 = vpop.f32.mrb[32].mxu1  ;;  %8041 = vmatprep.subr.bf16.mxu0 %v13119_v47  ;;  %8081 = vmatprep.subr.bf16.mxu1 %v13121_v48  ;;  %v1119_v44 = vcombine.high %v14365_v39, %v14365_v39  ;;  %v3127_v48 = vld [vmem:[%s13949_s22 + $0x870] sm:$0x11] }
 0x19b   : > { %v5836_v56 = vadd.f32 %v5835_v53, %v5796_v41  ;;  %v5837_v57 = vpop.f32.mrb[33].mxu0  ;;  %v5877_v58 = vpop.f32.mrb[33].mxu1  ;;  %v13129_v41 = vcombine.high %v2934_v27, %v3126_v28  ;;  %v2623_v53 = vpack.c.bf16 %v14346_v10, %v14346_v10 }
 0x19c   : > { %v5838_v0 = vpop.f32.mrb[34].mxu0  ;;  %v5878_v1 = vpop.f32.mrb[34].mxu1 }
 0x19d   : > { %v5876_v5 = vadd.f32 %v5875_v54, %v5836_v56  ;;  %v5839_v6 = vpop.f32.mrb[35].mxu0  ;;  %v5879_v7 = vpop.f32.mrb[35].mxu1  ;;  %v2935_v54 = vld [vmem:[%s13949_s22 + $0x270] sm:$0xff]  ;;  %v3128_v56 = vld [vmem:[%s13949_s22 + $0x878] sm:$0x11]  ;;  %v2628_v1 = vpack.c.bf16 %v1119_v44, %v1119_v44 }
 0x19e   : > { %v305_v6 = vld [vmem:[%s13942_s12 + $0x140] sm:$0xff] }
 0x19f   : > { %7994 = vmatmul.mubr.bf16.vlgmr.msra.gmra.mrb[140].mxu0 %v2613_v59  ;;  %8034 = vmatmul.mubr.bf16.vlgmr.msra.gmra.mrb[140].mxu1 %v2615_v60  ;;  %v13126_v59 = vcombine.low %v2933_v26, %v3125_v19  ;;  %v13128_v60 = vcombine.low %v2934_v27, %v3126_v28  ;;  %v1137_v9 = vcombine.high %v305_v6, %v305_v6  ;;  %v2938_v19 = vld [vmem:[%s13949_s22 + $0x288] sm:$0xff] }
 0x1a0   : > { %8042 = vmatpush1.bf16.xpose.msra.mxu0 %v13118_v2  ;;  %8082 = vmatpush1.bf16.xpose.msra.mxu1 %v13120_v3  ;;  %v14381_v2 = vrot.slane %v304_v42, %v13970_v24  ;;  %v14384_v3 = vrot.slane %v1120_v45, %v13970_v24  ;;  %v14400_v26 = vrot.slane %v305_v6, %v13970_v24 }
 0x1a1   : > { %8073 = vmatprep.mubr.bf16.mxu0 %v2618_v4  ;;  %8113 = vmatprep.mubr.bf16.mxu1 %v2620_v8  ;;  %v13131_v4 = vcombine.high %v2935_v54, %v3127_v48 }
 0x1a2   : > { %v5915_v17 = vpop.f32.mrb[36].mxu0  ;;  %v5955_v18 = vpop.f32.mrb[36].mxu1  ;;  %8121 = vmatprep.subr.bf16.mxu0 %v13123_v11  ;;  %8161 = vmatprep.subr.bf16.mxu1 %v13125_v12  ;;  %v1135_v7 = vcombine.high %v14381_v2, %v14381_v2  ;;  %v1136_v8 = vcombine.high %v14384_v3, %v14384_v3  ;;  %v3129_v12 = vld [vmem:[%s13949_s22 + $0x880] sm:$0x11]  ;;  %v2629_v45 = vpack.c.bf16 %v14381_v2, %v14381_v2 }
 0x1a3   : > { %v5916_v20 = vadd.f32 %v5915_v17, %v5876_v5  ;;  %v5917_v21 = vpop.f32.mrb[37].mxu0  ;;  %v5957_v22 = vpop.f32.mrb[37].mxu1  ;;  %v13133_v5 = vcombine.high %v2936_v55, %v3128_v56  ;;  %v2627_v17 = vpack.c.bf16 %v14365_v39, %v14365_v39 }
 0x1a4   : > { %v5918_v29 = vpop.f32.mrb[38].mxu0  ;;  %v5958_v30 = vpop.f32.mrb[38].mxu1 }
 0x1a5   : > { %v5956_v34 = vadd.f32 %v5955_v18, %v5916_v20  ;;  %v5919_v35 = vpop.f32.mrb[39].mxu0  ;;  %v5959_v36 = vpop.f32.mrb[39].mxu1  ;;  %v2937_v18 = vld [vmem:[%s13949_s22 + $0x280] sm:$0xff]  ;;  %v3130_v20 = vld [vmem:[%s13949_s22 + $0x888] sm:$0x11]  ;;  %v2630_v30 = vpack.c.bf16 %v1135_v7, %v1135_v7 }
 0x1a6   : > { %v13135_v33 = vcombine.high %v2937_v18, %v3129_v12  ;;  %v306_v35 = vld [vmem:[%s13942_s12 + $0x148] sm:$0xff]  ;;  %v1152_v36 = vcombine.high %v14400_v26, %v14400_v26 }
 0x1a7   : > { %8074 = vmatmul.mubr.bf16.vlgmr.msra.gmra.mrb[144].mxu0 %v2617_v23  ;;  %8114 = vmatmul.mubr.bf16.vlgmr.msra.gmra.mrb[144].mxu1 %v2619_v25  ;;  %v13130_v23 = vcombine.low %v2935_v54, %v3127_v48  ;;  %v13132_v25 = vcombine.low %v2936_v55, %v3128_v56  ;;  %v2940_v48 = vld [vmem:[%s13949_s22 + $0x298] sm:$0xff] }
 0x1a8   : > { %8122 = vmatpush1.bf16.xpose.msra.mxu0 %v13122_v31  ;;  %8162 = vmatpush1.bf16.xpose.msra.mxu1 %v13124_v32  ;;  %v2632_v31 = vpack.c.bf16 %v1136_v8, %v1136_v8  ;;  %v14403_v32 = vrot.slane %v1137_v9, %v13970_v24  ;;  %v2634_v54 = vpack.c.bf16 %v1152_v36, %v1152_v36 }
 0x1a9   : > { %8153 = vmatprep.mubr.bf16.mxu0 %v2622_v37  ;;  %8193 = vmatprep.mubr.bf16.mxu1 %v2624_v38  ;;  %v1154_v38 = vcombine.high %v306_v35, %v306_v35  ;;  %v2633_v9 = vpack.c.bf16 %v14400_v26, %v14400_v26 }
 0x1aa   : > { %v5995_v46 = vpop.f32.mrb[40].mxu0  ;;  %v6035_v47 = vpop.f32.mrb[40].mxu1  ;;  %8201 = vmatprep.subr.bf16.mxu0 %v13127_v40  ;;  %8241 = vmatprep.subr.bf16.mxu1 %v13129_v41  ;;  %v1153_v37 = vcombine.high %v14403_v32, %v14403_v32  ;;  %v3131_v41 = vld [vmem:[%s13949_s22 + $0x890] sm:$0x11] }
 0x1ab   : > { %v5996_v49 = vadd.f32 %v5995_v46, %v5956_v34  ;;  %v5997_v50 = vpop.f32.mrb[41].mxu0  ;;  %v6037_v51 = vpop.f32.mrb[41].mxu1  ;;  %v13137_v34 = vcombine.high %v2938_v19, %v3130_v20  ;;  %v2631_v46 = vpack.c.bf16 %v14384_v3, %v14384_v3 }
 0x1ac   : > { %v5998_v57 = vpop.f32.mrb[42].mxu0  ;;  %v6038_v58 = vpop.f32.mrb[42].mxu1 }
 0x1ad   : > { %v6036_v62 = vadd.f32 %v6035_v47, %v5996_v49  ;;  %v5999_v63 = vpop.f32.mrb[43].mxu0  ;;  %v6039_v0 = vpop.f32.mrb[43].mxu1  ;;  %v2939_v47 = vld [vmem:[%s13949_s22 + $0x290] sm:$0xff]  ;;  %v3132_v49 = vld [vmem:[%s13949_s22 + $0x898] sm:$0x11]  ;;  %v2636_v58 = vpack.c.bf16 %v1153_v37, %v1153_v37 }
 0x1ae   : > { %v307_v63 = vld [vmem:[%s13942_s12 + $0x150] sm:$0xff] }
 0x1af   : > { %8154 = vmatmul.mubr.bf16.vlgmr.msra.gmra.mrb[148].mxu0 %v2621_v52  ;;  %8194 = vmatmul.mubr.bf16.vlgmr.msra.gmra.mrb[148].mxu1 %v2623_v53  ;;  %v13134_v52 = vcombine.low %v2937_v18, %v3129_v12  ;;  %v13136_v53 = vcombine.low %v2938_v19, %v3130_v20  ;;  %v1171_v2 = vcombine.high %v307_v63, %v307_v63  ;;  %v2942_v12 = vld [vmem:[%s13949_s22 + $0x2a8] sm:$0xff] }
 0x1b0   : > { %8202 = vmatpush1.bf16.xpose.msra.mxu0 %v13126_v59  ;;  %8242 = vmatpush1.bf16.xpose.msra.mxu1 %v13128_v60  ;;  %v14419_v59 = vrot.slane %v306_v35, %v13970_v24  ;;  %v14422_v60 = vrot.slane %v1154_v38, %v13970_v24  ;;  %v14438_v18 = vrot.slane %v307_v63, %v13970_v24 }
 0x1b1   : > { %8233 = vmatprep.mubr.bf16.mxu0 %v2626_v61  ;;  %8273 = vmatprep.mubr.bf16.mxu1 %v2628_v1  ;;  %v13139_v61 = vcombine.high %v2939_v47, %v3131_v41 }
 0x1b2   : > { %v6075_v10 = vpop.f32.mrb[44].mxu0  ;;  %v6115_v11 = vpop.f32.mrb[44].mxu1  ;;  %8281 = vmatprep.subr.bf16.mxu0 %v13131_v4  ;;  %8321 = vmatprep.subr.bf16.mxu1 %v13133_v5  ;;  %v1169_v0 = vcombine.high %v14419_v59, %v14419_v59  ;;  %v1170_v1 = vcombine.high %v14422_v60, %v14422_v60  ;;  %v3133_v5 = vld [vmem:[%s13949_s22 + $0x8a0] sm:$0x11]  ;;  %v2637_v38 = vpack.c.bf16 %v14419_v59, %v14419_v59 }
 0x1b3   : > { %v6076_v13 = vadd.f32 %v6075_v10, %v6036_v62  ;;  %v6077_v14 = vpop.f32.mrb[45].mxu0  ;;  %v6117_v15 = vpop.f32.mrb[45].mxu1  ;;  %v13141_v62 = vcombine.high %v2940_v48, %v3132_v49  ;;  %v2635_v10 = vpack.c.bf16 %v14403_v32, %v14403_v32 }
 0x1b4   : > { %v6078_v21 = vpop.f32.mrb[46].mxu0  ;;  %v6118_v22 = vpop.f32.mrb[46].mxu1 }
 0x1b5   : > { %v6116_v27 = vadd.f32 %v6115_v11, %v6076_v13  ;;  %v6079_v28 = vpop.f32.mrb[47].mxu0  ;;  %v6119_v29 = vpop.f32.mrb[47].mxu1  ;;  %v2941_v11 = vld [vmem:[%s13949_s22 + $0x2a0] sm:$0xff]  ;;  %v3134_v13 = vld [vmem:[%s13949_s22 + $0x8a8] sm:$0x11]  ;;  %v2638_v22 = vpack.c.bf16 %v1169_v0, %v1169_v0 }
 0x1b6   : > { %v13143_v26 = vcombine.high %v2941_v11, %v3133_v5  ;;  %v308_v28 = vld [vmem:[%s13942_s12 + $0x158] sm:$0xff]  ;;  %v1186_v29 = vcombine.high %v14438_v18, %v14438_v18 }
 0x1b7   : > { %8234 = vmatmul.mubr.bf16.vlgmr.msra.gmra.mrb[152].mxu0 %v2625_v16  ;;  %8274 = vmatmul.mubr.bf16.vlgmr.msra.gmra.mrb[152].mxu1 %v2627_v17  ;;  %v13138_v16 = vcombine.low %v2939_v47, %v3131_v41  ;;  %v13140_v17 = vcombine.low %v2940_v48, %v3132_v49  ;;  %v2944_v41 = vld [vmem:[%s13949_s22 + $0x2b8] sm:$0xff] }
 0x1b8   : > { %8282 = vmatpush1.bf16.xpose.msra.mxu0 %v13130_v23  ;;  %8322 = vmatpush1.bf16.xpose.msra.mxu1 %v13132_v25  ;;  %v2640_v23 = vpack.c.bf16 %v1170_v1, %v1170_v1  ;;  %v14441_v25 = vrot.slane %v1171_v2, %v13970_v24  ;;  %v2642_v47 = vpack.c.bf16 %v1186_v29, %v1186_v29 }
 0x1b9   : > { %8313 = vmatprep.mubr.bf16.mxu0 %v2630_v30  ;;  %8353 = vmatprep.mubr.bf16.mxu1 %v2632_v31  ;;  %v1188_v31 = vcombine.high %v308_v28, %v308_v28  ;;  %v2641_v2 = vpack.c.bf16 %v14438_v18, %v14438_v18 }
 0x1ba   : > { %v6155_v39 = vpop.f32.mrb[48].mxu0  ;;  %v6195_v40 = vpop.f32.mrb[48].mxu1  ;;  %8361 = vmatprep.subr.bf16.mxu0 %v13135_v33  ;;  %8401 = vmatprep.subr.bf16.mxu1 %v13137_v34  ;;  %v1187_v30 = vcombine.high %v14441_v25, %v14441_v25  ;;  %v3135_v34 = vld [vmem:[%s13949_s22 + $0x8b0] sm:$0x11] }
 0x1bb   : > { %v6156_v42 = vadd.f32 %v6155_v39, %v6116_v27  ;;  %v6157_v43 = vpop.f32.mrb[49].mxu0  ;;  %v6197_v44 = vpop.f32.mrb[49].mxu1  ;;  %v13145_v27 = vcombine.high %v2942_v12, %v3134_v13  ;;  %v2639_v39 = vpack.c.bf16 %v14422_v60, %v14422_v60 }
 0x1bc   : > { %v6158_v50 = vpop.f32.mrb[50].mxu0  ;;  %v6198_v51 = vpop.f32.mrb[50].mxu1 }
 0x1bd   : > { %v6196_v55 = vadd.f32 %v6195_v40, %v6156_v42  ;;  %v6159_v56 = vpop.f32.mrb[51].mxu0  ;;  %v6199_v57 = vpop.f32.mrb[51].mxu1  ;;  %v2943_v40 = vld [vmem:[%s13949_s22 + $0x2b0] sm:$0xff]  ;;  %v3136_v42 = vld [vmem:[%s13949_s22 + $0x8b8] sm:$0x11]  ;;  %v2644_v51 = vpack.c.bf16 %v1187_v30, %v1187_v30 }
 0x1be   : > { %v309_v56 = vld [vmem:[%s13942_s12 + $0x160] sm:$0xff] }
 0x1bf   : > { %8314 = vmatmul.mubr.bf16.vlgmr.msra.gmra.mrb[156].mxu0 %v2629_v45  ;;  %8354 = vmatmul.mubr.bf16.vlgmr.msra.gmra.mrb[156].mxu1 %v2631_v46  ;;  %v13142_v45 = vcombine.low %v2941_v11, %v3133_v5  ;;  %v13144_v46 = vcombine.low %v2942_v12, %v3134_v13  ;;  %v1205_v59 = vcombine.high %v309_v56, %v309_v56  ;;  %v2946_v5 = vld [vmem:[%s13949_s22 + $0x2c8] sm:$0xff] }
 0x1c0   : > { %8362 = vmatpush1.bf16.xpose.msra.mxu0 %v13134_v52  ;;  %8402 = vmatpush1.bf16.xpose.msra.mxu1 %v13136_v53  ;;  %v14457_v52 = vrot.slane %v308_v28, %v13970_v24  ;;  %v14460_v53 = vrot.slane %v1188_v31, %v13970_v24  ;;  %v14476_v11 = vrot.slane %v309_v56, %v13970_v24 }
 0x1c1   : > { %8393 = vmatprep.mubr.bf16.mxu0 %v2634_v54  ;;  %8433 = vmatprep.mubr.bf16.mxu1 %v2636_v58  ;;  %v13147_v54 = vcombine.high %v2943_v40, %v3135_v34 }
 0x1c2   : > { %v6235_v3 = vpop.f32.mrb[52].mxu0  ;;  %v6275_v4 = vpop.f32.mrb[52].mxu1  ;;  %8441 = vmatprep.subr.bf16.mxu0 %v13139_v61  ;;  %8481 = vmatprep.subr.bf16.mxu1 %v13141_v62  ;;  %v1203_v57 = vcombine.high %v14457_v52, %v14457_v52  ;;  %v1204_v58 = vcombine.high %v14460_v53, %v14460_v53  ;;  %v3137_v62 = vld [vmem:[%s13949_s22 + $0x8c0] sm:$0x11]  ;;  %v2645_v31 = vpack.c.bf16 %v14457_v52, %v14457_v52 }
 0x1c3   : > { %v6236_v6 = vadd.f32 %v6235_v3, %v6196_v55  ;;  %v6237_v7 = vpop.f32.mrb[53].mxu0  ;;  %v6277_v8 = vpop.f32.mrb[53].mxu1  ;;  %v13149_v55 = vcombine.high %v2944_v41, %v3136_v42  ;;  %v2643_v3 = vpack.c.bf16 %v14441_v25, %v14441_v25 }
 0x1c4   : > { %v6238_v14 = vpop.f32.mrb[54].mxu0  ;;  %v6278_v15 = vpop.f32.mrb[54].mxu1 }
 0x1c5   : > { %v6276_v19 = vadd.f32 %v6275_v4, %v6236_v6  ;;  %v6239_v20 = vpop.f32.mrb[55].mxu0  ;;  %v6279_v21 = vpop.f32.mrb[55].mxu1  ;;  %v2945_v4 = vld [vmem:[%s13949_s22 + $0x2c0] sm:$0xff]  ;;  %v3138_v6 = vld [vmem:[%s13949_s22 + $0x8c8] sm:$0x11]  ;;  %v2646_v15 = vpack.c.bf16 %v1203_v57, %v1203_v57 }
 0x1c6   : > { %v13151_v18 = vcombine.high %v2945_v4, %v3137_v62  ;;  %v310_v20 = vld [vmem:[%s13942_s12 + $0x168] sm:$0xff]  ;;  %v1220_v21 = vcombine.high %v14476_v11, %v14476_v11 }
 0x1c7   : > { %8394 = vmatmul.mubr.bf16.vlgmr.msra.gmra.mrb[160].mxu0 %v2633_v9  ;;  %8434 = vmatmul.mubr.bf16.vlgmr.msra.gmra.mrb[160].mxu1 %v2635_v10  ;;  %v13146_v9 = vcombine.low %v2943_v40, %v3135_v34  ;;  %v13148_v10 = vcombine.low %v2944_v41, %v3136_v42  ;;  %v2948_v34 = vld [vmem:[%s13949_s22 + $0x2d8] sm:$0xff] }
 0x1c8   : > { %8442 = vmatpush1.bf16.xpose.msra.mxu0 %v13138_v16  ;;  %8482 = vmatpush1.bf16.xpose.msra.mxu1 %v13140_v17  ;;  %v2648_v16 = vpack.c.bf16 %v1204_v58, %v1204_v58  ;;  %v14479_v17 = vrot.slane %v1205_v59, %v13970_v24  ;;  %v2650_v40 = vpack.c.bf16 %v1220_v21, %v1220_v21 }
 0x1c9   : > { %8473 = vmatprep.mubr.bf16.mxu0 %v2638_v22  ;;  %8513 = vmatprep.mubr.bf16.mxu1 %v2640_v23  ;;  %v1222_v23 = vcombine.high %v310_v20, %v310_v20  ;;  %v2649_v59 = vpack.c.bf16 %v14476_v11, %v14476_v11 }
 0x1ca   : > { %v6315_v32 = vpop.f32.mrb[56].mxu0  ;;  %v6355_v33 = vpop.f32.mrb[56].mxu1  ;;  %8521 = vmatprep.subr.bf16.mxu0 %v13143_v26  ;;  %8561 = vmatprep.subr.bf16.mxu1 %v13145_v27  ;;  %v1221_v22 = vcombine.high %v14479_v17, %v14479_v17  ;;  %v3139_v27 = vld [vmem:[%s13949_s22 + $0x8d0] sm:$0x11] }
 0x1cb   : > { %v6316_v35 = vadd.f32 %v6315_v32, %v6276_v19  ;;  %v6317_v36 = vpop.f32.mrb[57].mxu0  ;;  %v6357_v37 = vpop.f32.mrb[57].mxu1  ;;  %v13153_v19 = vcombine.high %v2946_v5, %v3138_v6  ;;  %v2647_v32 = vpack.c.bf16 %v14460_v53, %v14460_v53 }
 0x1cc   : > { %v6318_v43 = vpop.f32.mrb[58].mxu0  ;;  %v6358_v44 = vpop.f32.mrb[58].mxu1 }
 0x1cd   : > { %v6356_v48 = vadd.f32 %v6355_v33, %v6316_v35  ;;  %v6319_v49 = vpop.f32.mrb[59].mxu0  ;;  %v6359_v50 = vpop.f32.mrb[59].mxu1  ;;  %v2947_v33 = vld [vmem:[%s13949_s22 + $0x2d0] sm:$0xff]  ;;  %v3140_v35 = vld [vmem:[%s13949_s22 + $0x8d8] sm:$0x11]  ;;  %v2652_v44 = vpack.c.bf16 %v1221_v22, %v1221_v22 }
 0x1ce   : > { %v311_v49 = vld [vmem:[%s13942_s12 + $0x170] sm:$0xff] }
 0x1cf   : > { %8474 = vmatmul.mubr.bf16.vlgmr.msra.gmra.mrb[164].mxu0 %v2637_v38  ;;  %8514 = vmatmul.mubr.bf16.vlgmr.msra.gmra.mrb[164].mxu1 %v2639_v39  ;;  %v13150_v38 = vcombine.low %v2945_v4, %v3137_v62  ;;  %v13152_v39 = vcombine.low %v2946_v5, %v3138_v6  ;;  %v1239_v52 = vcombine.high %v311_v49, %v311_v49  ;;  %v2950_v62 = vld [vmem:[%s13949_s22 + $0x2e8] sm:$0xff] }
 0x1d0   : > { %8522 = vmatpush1.bf16.xpose.msra.mxu0 %v13142_v45  ;;  %8562 = vmatpush1.bf16.xpose.msra.mxu1 %v13144_v46  ;;  %v14495_v45 = vrot.slane %v310_v20, %v13970_v24  ;;  %v14498_v46 = vrot.slane %v1222_v23, %v13970_v24  ;;  %v14514_v4 = vrot.slane %v311_v49, %v13970_v24 }
 0x1d1   : > { %8553 = vmatprep.mubr.bf16.mxu0 %v2642_v47  ;;  %8593 = vmatprep.mubr.bf16.mxu1 %v2644_v51  ;;  %v13155_v47 = vcombine.high %v2947_v33, %v3139_v27 }
 0x1d2   : > { %v6395_v60 = vpop.f32.mrb[60].mxu0  ;;  %v6435_v61 = vpop.f32.mrb[60].mxu1  ;;  %8601 = vmatprep.subr.bf16.mxu0 %v13147_v54  ;;  %8641 = vmatprep.subr.bf16.mxu1 %v13149_v55  ;;  %v1237_v50 = vcombine.high %v14495_v45, %v14495_v45  ;;  %v1238_v51 = vcombine.high %v14498_v46, %v14498_v46  ;;  %v3141_v55 = vld [vmem:[%s13949_s22 + $0x8e0] sm:$0x11]  ;;  %v2653_v23 = vpack.c.bf16 %v14495_v45, %v14495_v45 }
 0x1d3   : > { %v6396_v63 = vadd.f32 %v6395_v60, %v6356_v48  ;;  %v6397_v0 = vpop.f32.mrb[61].mxu0  ;;  %v6437_v1 = vpop.f32.mrb[61].mxu1  ;;  %v13157_v48 = vcombine.high %v2948_v34, %v3140_v35  ;;  %v2651_v60 = vpack.c.bf16 %v14479_v17, %v14479_v17 }
 0x1d4   : > { %v6398_v7 = vpop.f32.mrb[62].mxu0  ;;  %v6438_v8 = vpop.f32.mrb[62].mxu1 }
 0x1d5   : > { %v6436_v12 = vadd.f32 %v6435_v61, %v6396_v63  ;;  %v6399_v13 = vpop.f32.mrb[63].mxu0  ;;  %v6439_v14 = vpop.f32.mrb[63].mxu1  ;;  %v2949_v61 = vld [vmem:[%s13949_s22 + $0x2e0] sm:$0xff]  ;;  %v3142_v63 = vld [vmem:[%s13949_s22 + $0x8e8] sm:$0x11]  ;;  %v2654_v8 = vpack.c.bf16 %v1237_v50, %v1237_v50 }
 0x1d6   : > { %v13159_v11 = vcombine.high %v2949_v61, %v3141_v55  ;;  %v312_v13 = vld [vmem:[%s13942_s12 + $0x178] sm:$0xff]  ;;  %v1254_v14 = vcombine.high %v14514_v4, %v14514_v4 }
 0x1d7   : > { %8554 = vmatmul.mubr.bf16.vlgmr.msra.gmra.mrb[168].mxu0 %v2641_v2  ;;  %8594 = vmatmul.mubr.bf16.vlgmr.msra.gmra.mrb[168].mxu1 %v2643_v3  ;;  %v13154_v2 = vcombine.low %v2947_v33, %v3139_v27  ;;  %v13156_v3 = vcombine.low %v2948_v34, %v3140_v35  ;;  %v2952_v27 = vld [vmem:[%s13949_s22 + $0x2f8] sm:$0xff] }
 0x1d8   : > { %8602 = vmatpush1.bf16.xpose.msra.mxu0 %v13146_v9  ;;  %8642 = vmatpush1.bf16.xpose.msra.mxu1 %v13148_v10  ;;  %v2656_v9 = vpack.c.bf16 %v1238_v51, %v1238_v51  ;;  %v14517_v10 = vrot.slane %v1239_v52, %v13970_v24  ;;  %v2658_v33 = vpack.c.bf16 %v1254_v14, %v1254_v14 }
 0x1d9   : > { %8633 = vmatprep.mubr.bf16.mxu0 %v2646_v15  ;;  %8673 = vmatprep.mubr.bf16.mxu1 %v2648_v16  ;;  %v1256_v16 = vcombine.high %v312_v13, %v312_v13  ;;  %v2657_v52 = vpack.c.bf16 %v14514_v4, %v14514_v4 }
 0x1da   : > { %v6475_v25 = vpop.f32.mrb[64].mxu0  ;;  %v6515_v26 = vpop.f32.mrb[64].mxu1  ;;  %8681 = vmatprep.subr.bf16.mxu0 %v13151_v18  ;;  %8721 = vmatprep.subr.bf16.mxu1 %v13153_v19  ;;  %v1255_v15 = vcombine.high %v14517_v10, %v14517_v10  ;;  %v3143_v19 = vld [vmem:[%s13949_s22 + $0x8f0] sm:$0x11] }
 0x1db   : > { %v6476_v28 = vadd.f32 %v6475_v25, %v6436_v12  ;;  %v6477_v29 = vpop.f32.mrb[65].mxu0  ;;  %v6517_v30 = vpop.f32.mrb[65].mxu1  ;;  %v13161_v12 = vcombine.high %v2950_v62, %v3142_v63  ;;  %v2655_v25 = vpack.c.bf16 %v14498_v46, %v14498_v46 }
 0x1dc   : > { %v6478_v36 = vpop.f32.mrb[66].mxu0  ;;  %v6518_v37 = vpop.f32.mrb[66].mxu1 }
 0x1dd   : > { %v6516_v41 = vadd.f32 %v6515_v26, %v6476_v28  ;;  %v6479_v42 = vpop.f32.mrb[67].mxu0  ;;  %v6519_v43 = vpop.f32.mrb[67].mxu1  ;;  %v2951_v26 = vld [vmem:[%s13949_s22 + $0x2f0] sm:$0xff]  ;;  %v3144_v28 = vld [vmem:[%s13949_s22 + $0x8f8] sm:$0x11]  ;;  %v2660_v37 = vpack.c.bf16 %v1255_v15, %v1255_v15 }
 0x1de   : > { %v313_v42 = vld [vmem:[%s13942_s12 + $0x180] sm:$0xff] }
 0x1df   : > { %8634 = vmatmul.mubr.bf16.vlgmr.msra.gmra.mrb[172].mxu0 %v2645_v31  ;;  %8674 = vmatmul.mubr.bf16.vlgmr.msra.gmra.mrb[172].mxu1 %v2647_v32  ;;  %v13158_v31 = vcombine.low %v2949_v61, %v3141_v55  ;;  %v13160_v32 = vcombine.low %v2950_v62, %v3142_v63  ;;  %v1273_v45 = vcombine.high %v313_v42, %v313_v42  ;;  %v2954_v55 = vld [vmem:[%s13949_s22 + $0x308] sm:$0xff] }
 0x1e0   : > { %8682 = vmatpush1.bf16.xpose.msra.mxu0 %v13150_v38  ;;  %8722 = vmatpush1.bf16.xpose.msra.mxu1 %v13152_v39  ;;  %v14533_v38 = vrot.slane %v312_v13, %v13970_v24  ;;  %v14536_v39 = vrot.slane %v1256_v16, %v13970_v24  ;;  %v14552_v61 = vrot.slane %v313_v42, %v13970_v24 }
 0x1e1   : > { %8713 = vmatprep.mubr.bf16.mxu0 %v2650_v40  ;;  %8753 = vmatprep.mubr.bf16.mxu1 %v2652_v44  ;;  %v13163_v40 = vcombine.high %v2951_v26, %v3143_v19 }
 0x1e2   : > { %v6555_v53 = vpop.f32.mrb[68].mxu0  ;;  %v6595_v54 = vpop.f32.mrb[68].mxu1  ;;  %8761 = vmatprep.subr.bf16.mxu0 %v13155_v47  ;;  %8801 = vmatprep.subr.bf16.mxu1 %v13157_v48  ;;  %v1271_v43 = vcombine.high %v14533_v38, %v14533_v38  ;;  %v1272_v44 = vcombine.high %v14536_v39, %v14536_v39  ;;  %v3145_v48 = vld [vmem:[%s13949_s22 + $0x900] sm:$0x11]  ;;  %v2661_v16 = vpack.c.bf16 %v14533_v38, %v14533_v38 }
 0x1e3   : > { %v6556_v56 = vadd.f32 %v6555_v53, %v6516_v41  ;;  %v6557_v57 = vpop.f32.mrb[69].mxu0  ;;  %v6597_v58 = vpop.f32.mrb[69].mxu1  ;;  %v13165_v41 = vcombine.high %v2952_v27, %v3144_v28  ;;  %v2659_v53 = vpack.c.bf16 %v14517_v10, %v14517_v10 }
 0x1e4   : > { %v6558_v0 = vpop.f32.mrb[70].mxu0  ;;  %v6598_v1 = vpop.f32.mrb[70].mxu1 }
 0x1e5   : > { %v6596_v5 = vadd.f32 %v6595_v54, %v6556_v56  ;;  %v6559_v6 = vpop.f32.mrb[71].mxu0  ;;  %v6599_v7 = vpop.f32.mrb[71].mxu1  ;;  %v2953_v54 = vld [vmem:[%s13949_s22 + $0x300] sm:$0xff]  ;;  %v3146_v56 = vld [vmem:[%s13949_s22 + $0x908] sm:$0x11]  ;;  %v2662_v1 = vpack.c.bf16 %v1271_v43, %v1271_v43 }
 0x1e6   : > { %v13167_v4 = vcombine.high %v2953_v54, %v3145_v48  ;;  %v314_v6 = vld [vmem:[%s13942_s12 + $0x188] sm:$0xff]  ;;  %v1288_v7 = vcombine.high %v14552_v61, %v14552_v61 }
 0x1e7   : > { %8714 = vmatmul.mubr.bf16.vlgmr.msra.gmra.mrb[176].mxu0 %v2649_v59  ;;  %8754 = vmatmul.mubr.bf16.vlgmr.msra.gmra.mrb[176].mxu1 %v2651_v60  ;;  %v13162_v59 = vcombine.low %v2951_v26, %v3143_v19  ;;  %v13164_v60 = vcombine.low %v2952_v27, %v3144_v28  ;;  %v2956_v19 = vld [vmem:[%s13949_s22 + $0x318] sm:$0xff] }
 0x1e8   : > { %8762 = vmatpush1.bf16.xpose.msra.mxu0 %v13154_v2  ;;  %8802 = vmatpush1.bf16.xpose.msra.mxu1 %v13156_v3  ;;  %v2664_v2 = vpack.c.bf16 %v1272_v44, %v1272_v44  ;;  %v14555_v3 = vrot.slane %v1273_v45, %v13970_v24  ;;  %v2666_v26 = vpack.c.bf16 %v1288_v7, %v1288_v7 }
 0x1e9   : > { %8793 = vmatprep.mubr.bf16.mxu0 %v2654_v8  ;;  %8833 = vmatprep.mubr.bf16.mxu1 %v2656_v9  ;;  %v1290_v9 = vcombine.high %v314_v6, %v314_v6  ;;  %v2665_v45 = vpack.c.bf16 %v14552_v61, %v14552_v61 }
 0x1ea   : > { %v6635_v17 = vpop.f32.mrb[72].mxu0  ;;  %v6675_v18 = vpop.f32.mrb[72].mxu1  ;;  %8841 = vmatprep.subr.bf16.mxu0 %v13159_v11  ;;  %8881 = vmatprep.subr.bf16.mxu1 %v13161_v12  ;;  %v1289_v8 = vcombine.high %v14555_v3, %v14555_v3  ;;  %v3147_v12 = vld [vmem:[%s13949_s22 + $0x910] sm:$0x11] }
 0x1eb   : > { %v6636_v20 = vadd.f32 %v6635_v17, %v6596_v5  ;;  %v6637_v21 = vpop.f32.mrb[73].mxu0  ;;  %v6677_v22 = vpop.f32.mrb[73].mxu1  ;;  %v13169_v5 = vcombine.high %v2954_v55, %v3146_v56  ;;  %v2663_v17 = vpack.c.bf16 %v14536_v39, %v14536_v39 }
 0x1ec   : > { %v6638_v29 = vpop.f32.mrb[74].mxu0  ;;  %v6678_v30 = vpop.f32.mrb[74].mxu1 }
 0x1ed   : > { %v6676_v34 = vadd.f32 %v6675_v18, %v6636_v20  ;;  %v6639_v35 = vpop.f32.mrb[75].mxu0  ;;  %v6679_v36 = vpop.f32.mrb[75].mxu1  ;;  %v2955_v18 = vld [vmem:[%s13949_s22 + $0x310] sm:$0xff]  ;;  %v3148_v20 = vld [vmem:[%s13949_s22 + $0x918] sm:$0x11]  ;;  %v2668_v30 = vpack.c.bf16 %v1289_v8, %v1289_v8 }
 0x1ee   : > { %v315_v35 = vld [vmem:[%s13942_s12 + $0x190] sm:$0xff] }
 0x1ef   : > { %8794 = vmatmul.mubr.bf16.vlgmr.msra.gmra.mrb[180].mxu0 %v2653_v23  ;;  %8834 = vmatmul.mubr.bf16.vlgmr.msra.gmra.mrb[180].mxu1 %v2655_v25  ;;  %v13166_v23 = vcombine.low %v2953_v54, %v3145_v48  ;;  %v13168_v25 = vcombine.low %v2954_v55, %v3146_v56  ;;  %v1307_v38 = vcombine.high %v315_v35, %v315_v35  ;;  %v2958_v48 = vld [vmem:[%s13949_s22 + $0x328] sm:$0xff] }
 0x1f0   : > { %8842 = vmatpush1.bf16.xpose.msra.mxu0 %v13158_v31  ;;  %8882 = vmatpush1.bf16.xpose.msra.mxu1 %v13160_v32  ;;  %v14571_v31 = vrot.slane %v314_v6, %v13970_v24  ;;  %v14574_v32 = vrot.slane %v1290_v9, %v13970_v24  ;;  %v14590_v54 = vrot.slane %v315_v35, %v13970_v24 }
 0x1f1   : > { %8873 = vmatprep.mubr.bf16.mxu0 %v2658_v33  ;;  %8913 = vmatprep.mubr.bf16.mxu1 %v2660_v37  ;;  %v13171_v33 = vcombine.high %v2955_v18, %v3147_v12 }
 0x1f2   : > { %v6715_v46 = vpop.f32.mrb[76].mxu0  ;;  %v6755_v47 = vpop.f32.mrb[76].mxu1  ;;  %8921 = vmatprep.subr.bf16.mxu0 %v13163_v40  ;;  %8961 = vmatprep.subr.bf16.mxu1 %v13165_v41  ;;  %v1305_v36 = vcombine.high %v14571_v31, %v14571_v31  ;;  %v1306_v37 = vcombine.high %v14574_v32, %v14574_v32  ;;  %v3149_v41 = vld [vmem:[%s13949_s22 + $0x920] sm:$0x11]  ;;  %v2669_v9 = vpack.c.bf16 %v14571_v31, %v14571_v31 }
 0x1f3   : > { %v6716_v49 = vadd.f32 %v6715_v46, %v6676_v34  ;;  %v6717_v50 = vpop.f32.mrb[77].mxu0  ;;  %v6757_v51 = vpop.f32.mrb[77].mxu1  ;;  %v13173_v34 = vcombine.high %v2956_v19, %v3148_v20  ;;  %v2667_v46 = vpack.c.bf16 %v14555_v3, %v14555_v3 }
 0x1f4   : > { %v6718_v57 = vpop.f32.mrb[78].mxu0  ;;  %v6758_v58 = vpop.f32.mrb[78].mxu1 }
 0x1f5   : > { %v6756_v62 = vadd.f32 %v6755_v47, %v6716_v49  ;;  %v6719_v63 = vpop.f32.mrb[79].mxu0  ;;  %v6759_v0 = vpop.f32.mrb[79].mxu1  ;;  %v2957_v47 = vld [vmem:[%s13949_s22 + $0x320] sm:$0xff]  ;;  %v3150_v49 = vld [vmem:[%s13949_s22 + $0x928] sm:$0x11]  ;;  %v2670_v58 = vpack.c.bf16 %v1305_v36, %v1305_v36 }
 0x1f6   : > { %v13175_v61 = vcombine.high %v2957_v47, %v3149_v41  ;;  %v316_v63 = vld [vmem:[%s13942_s12 + $0x198] sm:$0xff]  ;;  %v1322_v0 = vcombine.high %v14590_v54, %v14590_v54 }
 0x1f7   : > { %8874 = vmatmul.mubr.bf16.vlgmr.msra.gmra.mrb[184].mxu0 %v2657_v52  ;;  %8914 = vmatmul.mubr.bf16.vlgmr.msra.gmra.mrb[184].mxu1 %v2659_v53  ;;  %v13170_v52 = vcombine.low %v2955_v18, %v3147_v12  ;;  %v13172_v53 = vcombine.low %v2956_v19, %v3148_v20  ;;  %v2960_v12 = vld [vmem:[%s13949_s22 + $0x338] sm:$0xff] }
 0x1f8   : > { %8922 = vmatpush1.bf16.xpose.msra.mxu0 %v13162_v59  ;;  %8962 = vmatpush1.bf16.xpose.msra.mxu1 %v13164_v60  ;;  %v2672_v59 = vpack.c.bf16 %v1306_v37, %v1306_v37  ;;  %v14593_v60 = vrot.slane %v1307_v38, %v13970_v24  ;;  %v2674_v18 = vpack.c.bf16 %v1322_v0, %v1322_v0 }
 0x1f9   : > { %8953 = vmatprep.mubr.bf16.mxu0 %v2662_v1  ;;  %8993 = vmatprep.mubr.bf16.mxu1 %v2664_v2  ;;  %v1324_v2 = vcombine.high %v316_v63, %v316_v63  ;;  %v2673_v38 = vpack.c.bf16 %v14590_v54, %v14590_v54 }
 0x1fa   : > { %v6795_v10 = vpop.f32.mrb[80].mxu0  ;;  %v6835_v11 = vpop.f32.mrb[80].mxu1  ;;  %9001 = vmatprep.subr.bf16.mxu0 %v13167_v4  ;;  %9041 = vmatprep.subr.bf16.mxu1 %v13169_v5  ;;  %v1323_v1 = vcombine.high %v14593_v60, %v14593_v60  ;;  %v3151_v5 = vld [vmem:[%s13949_s22 + $0x930] sm:$0x11] }
 0x1fb   : > { %v6796_v13 = vadd.f32 %v6795_v10, %v6756_v62  ;;  %v6797_v14 = vpop.f32.mrb[81].mxu0  ;;  %v6837_v15 = vpop.f32.mrb[81].mxu1  ;;  %v13177_v62 = vcombine.high %v2958_v48, %v3150_v49  ;;  %v2671_v10 = vpack.c.bf16 %v14574_v32, %v14574_v32 }
 0x1fc   : > { %v6798_v21 = vpop.f32.mrb[82].mxu0  ;;  %v6838_v22 = vpop.f32.mrb[82].mxu1 }
 0x1fd   : > { %v6836_v27 = vadd.f32 %v6835_v11, %v6796_v13  ;;  %v6799_v28 = vpop.f32.mrb[83].mxu0  ;;  %v6839_v29 = vpop.f32.mrb[83].mxu1  ;;  %v2959_v11 = vld [vmem:[%s13949_s22 + $0x330] sm:$0xff]  ;;  %v3152_v13 = vld [vmem:[%s13949_s22 + $0x938] sm:$0x11]  ;;  %v2676_v22 = vpack.c.bf16 %v1323_v1, %v1323_v1 }
 0x1fe   : > { %v317_v28 = vld [vmem:[%s13942_s12 + $0x1a0] sm:$0xff] }
 0x1ff   : > { %8954 = vmatmul.mubr.bf16.vlgmr.msra.gmra.mrb[188].mxu0 %v2661_v16  ;;  %8994 = vmatmul.mubr.bf16.vlgmr.msra.gmra.mrb[188].mxu1 %v2663_v17  ;;  %v13174_v16 = vcombine.low %v2957_v47, %v3149_v41  ;;  %v13176_v17 = vcombine.low %v2958_v48, %v3150_v49  ;;  %v1341_v31 = vcombine.high %v317_v28, %v317_v28  ;;  %v2962_v41 = vld [vmem:[%s13949_s22 + $0x348] sm:$0xff] }
 0x200   : > { %9002 = vmatpush1.bf16.xpose.msra.mxu0 %v13166_v23  ;;  %9042 = vmatpush1.bf16.xpose.msra.mxu1 %v13168_v25  ;;  %v14609_v23 = vrot.slane %v316_v63, %v13970_v24  ;;  %v14612_v25 = vrot.slane %v1324_v2, %v13970_v24  ;;  %v14628_v47 = vrot.slane %v317_v28, %v13970_v24 }
 0x201   : > { %9033 = vmatprep.mubr.bf16.mxu0 %v2666_v26  ;;  %9073 = vmatprep.mubr.bf16.mxu1 %v2668_v30  ;;  %v13179_v26 = vcombine.high %v2959_v11, %v3151_v5 }
 0x202   : > { %v6875_v39 = vpop.f32.mrb[84].mxu0  ;;  %v6915_v40 = vpop.f32.mrb[84].mxu1  ;;  %9081 = vmatprep.subr.bf16.mxu0 %v13171_v33  ;;  %9121 = vmatprep.subr.bf16.mxu1 %v13173_v34  ;;  %v1339_v29 = vcombine.high %v14609_v23, %v14609_v23  ;;  %v1340_v30 = vcombine.high %v14612_v25, %v14612_v25  ;;  %v3153_v34 = vld [vmem:[%s13949_s22 + $0x940] sm:$0x11]  ;;  %v2677_v2 = vpack.c.bf16 %v14609_v23, %v14609_v23 }
 0x203   : > { %v6876_v42 = vadd.f32 %v6875_v39, %v6836_v27  ;;  %v6877_v43 = vpop.f32.mrb[85].mxu0  ;;  %v6917_v44 = vpop.f32.mrb[85].mxu1  ;;  %v13181_v27 = vcombine.high %v2960_v12, %v3152_v13  ;;  %v2675_v39 = vpack.c.bf16 %v14593_v60, %v14593_v60 }
 0x204   : > { %v6878_v50 = vpop.f32.mrb[86].mxu0  ;;  %v6918_v51 = vpop.f32.mrb[86].mxu1 }
 0x205   : > { %v6916_v55 = vadd.f32 %v6915_v40, %v6876_v42  ;;  %v6879_v56 = vpop.f32.mrb[87].mxu0  ;;  %v6919_v57 = vpop.f32.mrb[87].mxu1  ;;  %v2961_v40 = vld [vmem:[%s13949_s22 + $0x340] sm:$0xff]  ;;  %v3154_v42 = vld [vmem:[%s13949_s22 + $0x948] sm:$0x11]  ;;  %v2678_v51 = vpack.c.bf16 %v1339_v29, %v1339_v29 }
 0x206   : > { %v13183_v54 = vcombine.high %v2961_v40, %v3153_v34  ;;  %v318_v56 = vld [vmem:[%s13942_s12 + $0x1a8] sm:$0xff]  ;;  %v1356_v57 = vcombine.high %v14628_v47, %v14628_v47 }
 0x207   : > { %9034 = vmatmul.mubr.bf16.vlgmr.msra.gmra.mrb[192].mxu0 %v2665_v45  ;;  %9074 = vmatmul.mubr.bf16.vlgmr.msra.gmra.mrb[192].mxu1 %v2667_v46  ;;  %v13178_v45 = vcombine.low %v2959_v11, %v3151_v5  ;;  %v13180_v46 = vcombine.low %v2960_v12, %v3152_v13  ;;  %v2964_v5 = vld [vmem:[%s13949_s22 + $0x358] sm:$0xff] }
 0x208   : > { %9082 = vmatpush1.bf16.xpose.msra.mxu0 %v13170_v52  ;;  %9122 = vmatpush1.bf16.xpose.msra.mxu1 %v13172_v53  ;;  %v2680_v52 = vpack.c.bf16 %v1340_v30, %v1340_v30  ;;  %v14631_v53 = vrot.slane %v1341_v31, %v13970_v24  ;;  %v2682_v11 = vpack.c.bf16 %v1356_v57, %v1356_v57 }
 0x209   : > { %9113 = vmatprep.mubr.bf16.mxu0 %v2670_v58  ;;  %9153 = vmatprep.mubr.bf16.mxu1 %v2672_v59  ;;  %v1358_v59 = vcombine.high %v318_v56, %v318_v56  ;;  %v2681_v31 = vpack.c.bf16 %v14628_v47, %v14628_v47 }
 0x20a   : > { %v6955_v3 = vpop.f32.mrb[88].mxu0  ;;  %v6995_v4 = vpop.f32.mrb[88].mxu1  ;;  %9161 = vmatprep.subr.bf16.mxu0 %v13175_v61  ;;  %9201 = vmatprep.subr.bf16.mxu1 %v13177_v62  ;;  %v1357_v58 = vcombine.high %v14631_v53, %v14631_v53  ;;  %v3155_v62 = vld [vmem:[%s13949_s22 + $0x950] sm:$0x11] }
 0x20b   : > { %v6956_v6 = vadd.f32 %v6955_v3, %v6916_v55  ;;  %v6957_v7 = vpop.f32.mrb[89].mxu0  ;;  %v6997_v8 = vpop.f32.mrb[89].mxu1  ;;  %v13185_v55 = vcombine.high %v2962_v41, %v3154_v42  ;;  %v2679_v3 = vpack.c.bf16 %v14612_v25, %v14612_v25 }
 0x20c   : > { %v6958_v14 = vpop.f32.mrb[90].mxu0  ;;  %v6998_v15 = vpop.f32.mrb[90].mxu1 }
 0x20d   : > { %v6996_v19 = vadd.f32 %v6995_v4, %v6956_v6  ;;  %v6959_v20 = vpop.f32.mrb[91].mxu0  ;;  %v6999_v21 = vpop.f32.mrb[91].mxu1  ;;  %v2963_v4 = vld [vmem:[%s13949_s22 + $0x350] sm:$0xff]  ;;  %v3156_v6 = vld [vmem:[%s13949_s22 + $0x958] sm:$0x11]  ;;  %v2684_v15 = vpack.c.bf16 %v1357_v58, %v1357_v58 }
 0x20e   : > { %v319_v20 = vld [vmem:[%s13942_s12 + $0x1b0] sm:$0xff] }
 0x20f   : > { %9114 = vmatmul.mubr.bf16.vlgmr.msra.gmra.mrb[196].mxu0 %v2669_v9  ;;  %9154 = vmatmul.mubr.bf16.vlgmr.msra.gmra.mrb[196].mxu1 %v2671_v10  ;;  %v13182_v9 = vcombine.low %v2961_v40, %v3153_v34  ;;  %v13184_v10 = vcombine.low %v2962_v41, %v3154_v42  ;;  %v1375_v23 = vcombine.high %v319_v20, %v319_v20  ;;  %v2966_v34 = vld [vmem:[%s13949_s22 + $0x368] sm:$0xff] }
 0x210   : > { %9162 = vmatpush1.bf16.xpose.msra.mxu0 %v13174_v16  ;;  %9202 = vmatpush1.bf16.xpose.msra.mxu1 %v13176_v17  ;;  %v14647_v16 = vrot.slane %v318_v56, %v13970_v24  ;;  %v14650_v17 = vrot.slane %v1358_v59, %v13970_v24  ;;  %v14666_v40 = vrot.slane %v319_v20, %v13970_v24 }
 0x211   : > { %9193 = vmatprep.mubr.bf16.mxu0 %v2674_v18  ;;  %9233 = vmatprep.mubr.bf16.mxu1 %v2676_v22  ;;  %v13187_v18 = vcombine.high %v2963_v4, %v3155_v62 }
 0x212   : > { %v7035_v32 = vpop.f32.mrb[92].mxu0  ;;  %v7075_v33 = vpop.f32.mrb[92].mxu1  ;;  %9241 = vmatprep.subr.bf16.mxu0 %v13179_v26  ;;  %9281 = vmatprep.subr.bf16.mxu1 %v13181_v27  ;;  %v1373_v21 = vcombine.high %v14647_v16, %v14647_v16  ;;  %v1374_v22 = vcombine.high %v14650_v17, %v14650_v17  ;;  %v3157_v27 = vld [vmem:[%s13949_s22 + $0x960] sm:$0x11]  ;;  %v2685_v59 = vpack.c.bf16 %v14647_v16, %v14647_v16 }
 0x213   : > { %v7036_v35 = vadd.f32 %v7035_v32, %v6996_v19  ;;  %v7037_v36 = vpop.f32.mrb[93].mxu0  ;;  %v7077_v37 = vpop.f32.mrb[93].mxu1  ;;  %v13189_v19 = vcombine.high %v2964_v5, %v3156_v6  ;;  %v2683_v32 = vpack.c.bf16 %v14631_v53, %v14631_v53 }
 0x214   : > { %v7038_v43 = vpop.f32.mrb[94].mxu0  ;;  %v7078_v44 = vpop.f32.mrb[94].mxu1 }
 0x215   : > { %v7076_v48 = vadd.f32 %v7075_v33, %v7036_v35  ;;  %v7039_v49 = vpop.f32.mrb[95].mxu0  ;;  %v7079_v50 = vpop.f32.mrb[95].mxu1  ;;  %v2965_v33 = vld [vmem:[%s13949_s22 + $0x360] sm:$0xff]  ;;  %v3158_v35 = vld [vmem:[%s13949_s22 + $0x968] sm:$0x11]  ;;  %v2686_v44 = vpack.c.bf16 %v1373_v21, %v1373_v21 }
 0x216   : > { %v13191_v47 = vcombine.high %v2965_v33, %v3157_v27  ;;  %v320_v49 = vld [vmem:[%s13942_s12 + $0x1b8] sm:$0xff]  ;;  %v1390_v50 = vcombine.high %v14666_v40, %v14666_v40 }
 0x217   : > { %9194 = vmatmul.mubr.bf16.vlgmr.msra.gmra.mrb[200].mxu0 %v2673_v38  ;;  %9234 = vmatmul.mubr.bf16.vlgmr.msra.gmra.mrb[200].mxu1 %v2675_v39  ;;  %v13186_v38 = vcombine.low %v2963_v4, %v3155_v62  ;;  %v13188_v39 = vcombine.low %v2964_v5, %v3156_v6  ;;  %v2968_v62 = vld [vmem:[%s13949_s22 + $0x378] sm:$0xff] }
 0x218   : > { %9242 = vmatpush1.bf16.xpose.msra.mxu0 %v13178_v45  ;;  %9282 = vmatpush1.bf16.xpose.msra.mxu1 %v13180_v46  ;;  %v2688_v45 = vpack.c.bf16 %v1374_v22, %v1374_v22  ;;  %v14669_v46 = vrot.slane %v1375_v23, %v13970_v24  ;;  %v2690_v4 = vpack.c.bf16 %v1390_v50, %v1390_v50 }
 0x219   : > { %9273 = vmatprep.mubr.bf16.mxu0 %v2678_v51  ;;  %9313 = vmatprep.mubr.bf16.mxu1 %v2680_v52  ;;  %v1392_v52 = vcombine.high %v320_v49, %v320_v49  ;;  %v2689_v23 = vpack.c.bf16 %v14666_v40, %v14666_v40 }
 0x21a   : > { %v7115_v60 = vpop.f32.mrb[96].mxu0  ;;  %v7155_v61 = vpop.f32.mrb[96].mxu1  ;;  %9321 = vmatprep.subr.bf16.mxu0 %v13183_v54  ;;  %9361 = vmatprep.subr.bf16.mxu1 %v13185_v55  ;;  %v1391_v51 = vcombine.high %v14669_v46, %v14669_v46  ;;  %v3159_v55 = vld [vmem:[%s13949_s22 + $0x970] sm:$0x11] }
 0x21b   : > { %v7116_v63 = vadd.f32 %v7115_v60, %v7076_v48  ;;  %v7117_v0 = vpop.f32.mrb[97].mxu0  ;;  %v7157_v1 = vpop.f32.mrb[97].mxu1  ;;  %v13193_v48 = vcombine.high %v2966_v34, %v3158_v35  ;;  %v2687_v60 = vpack.c.bf16 %v14650_v17, %v14650_v17 }
 0x21c   : > { %v7118_v7 = vpop.f32.mrb[98].mxu0  ;;  %v7158_v8 = vpop.f32.mrb[98].mxu1 }
 0x21d   : > { %v7156_v12 = vadd.f32 %v7155_v61, %v7116_v63  ;;  %v7119_v13 = vpop.f32.mrb[99].mxu0  ;;  %v7159_v14 = vpop.f32.mrb[99].mxu1  ;;  %v2967_v61 = vld [vmem:[%s13949_s22 + $0x370] sm:$0xff]  ;;  %v3160_v63 = vld [vmem:[%s13949_s22 + $0x978] sm:$0x11]  ;;  %v2692_v8 = vpack.c.bf16 %v1391_v51, %v1391_v51 }
 0x21e   : > { %v321_v13 = vld [vmem:[%s13942_s12 + $0x1c0] sm:$0xff] }
 0x21f   : > { %9274 = vmatmul.mubr.bf16.vlgmr.msra.gmra.mrb[204].mxu0 %v2677_v2  ;;  %9314 = vmatmul.mubr.bf16.vlgmr.msra.gmra.mrb[204].mxu1 %v2679_v3  ;;  %v13190_v2 = vcombine.low %v2965_v33, %v3157_v27  ;;  %v13192_v3 = vcombine.low %v2966_v34, %v3158_v35  ;;  %v1409_v16 = vcombine.high %v321_v13, %v321_v13  ;;  %v2970_v27 = vld [vmem:[%s13949_s22 + $0x388] sm:$0xff] }
 0x220   : > { %9322 = vmatpush1.bf16.xpose.msra.mxu0 %v13182_v9  ;;  %9362 = vmatpush1.bf16.xpose.msra.mxu1 %v13184_v10  ;;  %v14685_v9 = vrot.slane %v320_v49, %v13970_v24  ;;  %v14688_v10 = vrot.slane %v1392_v52, %v13970_v24  ;;  %v14704_v33 = vrot.slane %v321_v13, %v13970_v24 }
 0x221   : > { %9353 = vmatprep.mubr.bf16.mxu0 %v2682_v11  ;;  %9393 = vmatprep.mubr.bf16.mxu1 %v2684_v15  ;;  %v13195_v11 = vcombine.high %v2967_v61, %v3159_v55 }
 0x222   : > { %v7195_v25 = vpop.f32.mrb[100].mxu0  ;;  %v7235_v26 = vpop.f32.mrb[100].mxu1  ;;  %9401 = vmatprep.subr.bf16.mxu0 %v13187_v18  ;;  %9441 = vmatprep.subr.bf16.mxu1 %v13189_v19  ;;  %v1407_v14 = vcombine.high %v14685_v9, %v14685_v9  ;;  %v1408_v15 = vcombine.high %v14688_v10, %v14688_v10  ;;  %v3161_v19 = vld [vmem:[%s13949_s22 + $0x980] sm:$0x11]  ;;  %v2693_v52 = vpack.c.bf16 %v14685_v9, %v14685_v9 }
 0x223   : > { %v7196_v28 = vadd.f32 %v7195_v25, %v7156_v12  ;;  %v7197_v29 = vpop.f32.mrb[101].mxu0  ;;  %v7237_v30 = vpop.f32.mrb[101].mxu1  ;;  %v13197_v12 = vcombine.high %v2968_v62, %v3160_v63  ;;  %v2691_v25 = vpack.c.bf16 %v14669_v46, %v14669_v46 }
 0x224   : > { %v7198_v36 = vpop.f32.mrb[102].mxu0  ;;  %v7238_v37 = vpop.f32.mrb[102].mxu1 }
 0x225   : > { %v7236_v41 = vadd.f32 %v7235_v26, %v7196_v28  ;;  %v7199_v42 = vpop.f32.mrb[103].mxu0  ;;  %v7239_v43 = vpop.f32.mrb[103].mxu1  ;;  %v2969_v26 = vld [vmem:[%s13949_s22 + $0x380] sm:$0xff]  ;;  %v3162_v28 = vld [vmem:[%s13949_s22 + $0x988] sm:$0x11]  ;;  %v2694_v37 = vpack.c.bf16 %v1407_v14, %v1407_v14 }
 0x226   : > { %v13199_v40 = vcombine.high %v2969_v26, %v3161_v19  ;;  %v322_v42 = vld [vmem:[%s13942_s12 + $0x1c8] sm:$0xff]  ;;  %v1424_v43 = vcombine.high %v14704_v33, %v14704_v33 }
 0x227   : > { %9354 = vmatmul.mubr.bf16.vlgmr.msra.gmra.mrb[208].mxu0 %v2681_v31  ;;  %9394 = vmatmul.mubr.bf16.vlgmr.msra.gmra.mrb[208].mxu1 %v2683_v32  ;;  %v13194_v31 = vcombine.low %v2967_v61, %v3159_v55  ;;  %v13196_v32 = vcombine.low %v2968_v62, %v3160_v63  ;;  %v2972_v55 = vld [vmem:[%s13949_s22 + $0x398] sm:$0xff] }
 0x228   : > { %9402 = vmatpush1.bf16.xpose.msra.mxu0 %v13186_v38  ;;  %9442 = vmatpush1.bf16.xpose.msra.mxu1 %v13188_v39  ;;  %v2696_v38 = vpack.c.bf16 %v1408_v15, %v1408_v15  ;;  %v14707_v39 = vrot.slane %v1409_v16, %v13970_v24  ;;  %v2698_v61 = vpack.c.bf16 %v1424_v43, %v1424_v43 }
 0x229   : > { %9433 = vmatprep.mubr.bf16.mxu0 %v2686_v44  ;;  %9473 = vmatprep.mubr.bf16.mxu1 %v2688_v45  ;;  %v1426_v45 = vcombine.high %v322_v42, %v322_v42  ;;  %v2697_v16 = vpack.c.bf16 %v14704_v33, %v14704_v33 }
 0x22a   : > { %v7275_v53 = vpop.f32.mrb[104].mxu0  ;;  %v7315_v54 = vpop.f32.mrb[104].mxu1  ;;  %9481 = vmatprep.subr.bf16.mxu0 %v13191_v47  ;;  %9521 = vmatprep.subr.bf16.mxu1 %v13193_v48  ;;  %v1425_v44 = vcombine.high %v14707_v39, %v14707_v39  ;;  %v3163_v48 = vld [vmem:[%s13949_s22 + $0x990] sm:$0x11] }
 0x22b   : > { %v7276_v56 = vadd.f32 %v7275_v53, %v7236_v41  ;;  %v7277_v57 = vpop.f32.mrb[105].mxu0  ;;  %v7317_v58 = vpop.f32.mrb[105].mxu1  ;;  %v13201_v41 = vcombine.high %v2970_v27, %v3162_v28  ;;  %v2695_v53 = vpack.c.bf16 %v14688_v10, %v14688_v10 }
 0x22c   : > { %v7278_v0 = vpop.f32.mrb[106].mxu0  ;;  %v7318_v1 = vpop.f32.mrb[106].mxu1 }
 0x22d   : > { %v7316_v5 = vadd.f32 %v7315_v54, %v7276_v56  ;;  %v7279_v6 = vpop.f32.mrb[107].mxu0  ;;  %v7319_v7 = vpop.f32.mrb[107].mxu1  ;;  %v2971_v54 = vld [vmem:[%s13949_s22 + $0x390] sm:$0xff]  ;;  %v3164_v56 = vld [vmem:[%s13949_s22 + $0x998] sm:$0x11]  ;;  %v2700_v1 = vpack.c.bf16 %v1425_v44, %v1425_v44 }
 0x22e   : > { %v323_v6 = vld [vmem:[%s13942_s12 + $0x1d0] sm:$0xff] }
 0x22f   : > { %9434 = vmatmul.mubr.bf16.vlgmr.msra.gmra.mrb[212].mxu0 %v2685_v59  ;;  %9474 = vmatmul.mubr.bf16.vlgmr.msra.gmra.mrb[212].mxu1 %v2687_v60  ;;  %v13198_v59 = vcombine.low %v2969_v26, %v3161_v19  ;;  %v13200_v60 = vcombine.low %v2970_v27, %v3162_v28  ;;  %v1443_v9 = vcombine.high %v323_v6, %v323_v6  ;;  %v2974_v19 = vld [vmem:[%s13949_s22 + $0x3a8] sm:$0xff] }
 0x230   : > { %9482 = vmatpush1.bf16.xpose.msra.mxu0 %v13190_v2  ;;  %9522 = vmatpush1.bf16.xpose.msra.mxu1 %v13192_v3  ;;  %v14723_v2 = vrot.slane %v322_v42, %v13970_v24  ;;  %v14726_v3 = vrot.slane %v1426_v45, %v13970_v24  ;;  %v14742_v26 = vrot.slane %v323_v6, %v13970_v24 }
 0x231   : > { %9513 = vmatprep.mubr.bf16.mxu0 %v2690_v4  ;;  %9553 = vmatprep.mubr.bf16.mxu1 %v2692_v8  ;;  %v13203_v4 = vcombine.high %v2971_v54, %v3163_v48 }
 0x232   : > { %v7355_v17 = vpop.f32.mrb[108].mxu0  ;;  %v7395_v18 = vpop.f32.mrb[108].mxu1  ;;  %9561 = vmatprep.subr.bf16.mxu0 %v13195_v11  ;;  %9601 = vmatprep.subr.bf16.mxu1 %v13197_v12  ;;  %v1441_v7 = vcombine.high %v14723_v2, %v14723_v2  ;;  %v1442_v8 = vcombine.high %v14726_v3, %v14726_v3  ;;  %v3165_v12 = vld [vmem:[%s13949_s22 + $0x9a0] sm:$0x11]  ;;  %v2701_v45 = vpack.c.bf16 %v14723_v2, %v14723_v2 }
 0x233   : > { %v7356_v20 = vadd.f32 %v7355_v17, %v7316_v5  ;;  %v7357_v21 = vpop.f32.mrb[109].mxu0  ;;  %v7397_v22 = vpop.f32.mrb[109].mxu1  ;;  %v13205_v5 = vcombine.high %v2972_v55, %v3164_v56  ;;  %v2699_v17 = vpack.c.bf16 %v14707_v39, %v14707_v39 }
 0x234   : > { %v7358_v29 = vpop.f32.mrb[110].mxu0  ;;  %v7398_v30 = vpop.f32.mrb[110].mxu1 }
 0x235   : > { %v7396_v34 = vadd.f32 %v7395_v18, %v7356_v20  ;;  %v7359_v35 = vpop.f32.mrb[111].mxu0  ;;  %v7399_v36 = vpop.f32.mrb[111].mxu1  ;;  %v2973_v18 = vld [vmem:[%s13949_s22 + $0x3a0] sm:$0xff]  ;;  %v3166_v20 = vld [vmem:[%s13949_s22 + $0x9a8] sm:$0x11]  ;;  %v2702_v30 = vpack.c.bf16 %v1441_v7, %v1441_v7 }
 0x236   : > { %v13207_v33 = vcombine.high %v2973_v18, %v3165_v12  ;;  %v324_v35 = vld [vmem:[%s13942_s12 + $0x1d8] sm:$0xff]  ;;  %v1458_v36 = vcombine.high %v14742_v26, %v14742_v26 }
 0x237   : > { %9514 = vmatmul.mubr.bf16.vlgmr.msra.gmra.mrb[216].mxu0 %v2689_v23  ;;  %9554 = vmatmul.mubr.bf16.vlgmr.msra.gmra.mrb[216].mxu1 %v2691_v25  ;;  %v13202_v23 = vcombine.low %v2971_v54, %v3163_v48  ;;  %v13204_v25 = vcombine.low %v2972_v55, %v3164_v56  ;;  %v2976_v48 = vld [vmem:[%s13949_s22 + $0x3b8] sm:$0xff] }
 0x238   : > { %9562 = vmatpush1.bf16.xpose.msra.mxu0 %v13194_v31  ;;  %9602 = vmatpush1.bf16.xpose.msra.mxu1 %v13196_v32  ;;  %v2704_v31 = vpack.c.bf16 %v1442_v8, %v1442_v8  ;;  %v14745_v32 = vrot.slane %v1443_v9, %v13970_v24  ;;  %v2706_v54 = vpack.c.bf16 %v1458_v36, %v1458_v36 }
 0x239   : > { %9593 = vmatprep.mubr.bf16.mxu0 %v2694_v37  ;;  %9633 = vmatprep.mubr.bf16.mxu1 %v2696_v38  ;;  %v1460_v38 = vcombine.high %v324_v35, %v324_v35  ;;  %v2705_v9 = vpack.c.bf16 %v14742_v26, %v14742_v26 }
 0x23a   : > { %v7435_v46 = vpop.f32.mrb[112].mxu0  ;;  %v7475_v47 = vpop.f32.mrb[112].mxu1  ;;  %9641 = vmatprep.subr.bf16.mxu0 %v13199_v40  ;;  %9681 = vmatprep.subr.bf16.mxu1 %v13201_v41  ;;  %v1459_v37 = vcombine.high %v14745_v32, %v14745_v32  ;;  %v3167_v41 = vld [vmem:[%s13949_s22 + $0x9b0] sm:$0x11] }
 0x23b   : > { %v7436_v49 = vadd.f32 %v7435_v46, %v7396_v34  ;;  %v7437_v50 = vpop.f32.mrb[113].mxu0  ;;  %v7477_v51 = vpop.f32.mrb[113].mxu1  ;;  %v13209_v34 = vcombine.high %v2974_v19, %v3166_v20  ;;  %v2703_v46 = vpack.c.bf16 %v14726_v3, %v14726_v3 }
 0x23c   : > { %v7438_v57 = vpop.f32.mrb[114].mxu0  ;;  %v7478_v58 = vpop.f32.mrb[114].mxu1 }
 0x23d   : > { %v7476_v62 = vadd.f32 %v7475_v47, %v7436_v49  ;;  %v7439_v63 = vpop.f32.mrb[115].mxu0  ;;  %v7479_v0 = vpop.f32.mrb[115].mxu1  ;;  %v2975_v47 = vld [vmem:[%s13949_s22 + $0x3b0] sm:$0xff]  ;;  %v3168_v49 = vld [vmem:[%s13949_s22 + $0x9b8] sm:$0x11]  ;;  %v2708_v58 = vpack.c.bf16 %v1459_v37, %v1459_v37 }
 0x23e   : > { %v325_v63 = vld [vmem:[%s13942_s12 + $0x1e0] sm:$0xff] }
 0x23f   : > { %9594 = vmatmul.mubr.bf16.vlgmr.msra.gmra.mrb[220].mxu0 %v2693_v52  ;;  %9634 = vmatmul.mubr.bf16.vlgmr.msra.gmra.mrb[220].mxu1 %v2695_v53  ;;  %v13206_v52 = vcombine.low %v2973_v18, %v3165_v12  ;;  %v13208_v53 = vcombine.low %v2974_v19, %v3166_v20  ;;  %v1477_v2 = vcombine.high %v325_v63, %v325_v63  ;;  %v2978_v12 = vld [vmem:[%s13949_s22 + $0x3c8] sm:$0xff] }
 0x240   : > { %9642 = vmatpush1.bf16.xpose.msra.mxu0 %v13198_v59  ;;  %9682 = vmatpush1.bf16.xpose.msra.mxu1 %v13200_v60  ;;  %v14761_v59 = vrot.slane %v324_v35, %v13970_v24  ;;  %v14764_v60 = vrot.slane %v1460_v38, %v13970_v24  ;;  %v14780_v18 = vrot.slane %v325_v63, %v13970_v24 }
 0x241   : > { %9673 = vmatprep.mubr.bf16.mxu0 %v2698_v61  ;;  %9713 = vmatprep.mubr.bf16.mxu1 %v2700_v1  ;;  %v13211_v61 = vcombine.high %v2975_v47, %v3167_v41 }
 0x242   : > { %v7515_v10 = vpop.f32.mrb[116].mxu0  ;;  %v7555_v11 = vpop.f32.mrb[116].mxu1  ;;  %9721 = vmatprep.subr.bf16.mxu0 %v13203_v4  ;;  %9761 = vmatprep.subr.bf16.mxu1 %v13205_v5  ;;  %v1475_v0 = vcombine.high %v14761_v59, %v14761_v59  ;;  %v1476_v1 = vcombine.high %v14764_v60, %v14764_v60  ;;  %v3169_v5 = vld [vmem:[%s13949_s22 + $0x9c0] sm:$0x11]  ;;  %v2709_v38 = vpack.c.bf16 %v14761_v59, %v14761_v59 }
 0x243   : > { %v7516_v13 = vadd.f32 %v7515_v10, %v7476_v62  ;;  %v7517_v14 = vpop.f32.mrb[117].mxu0  ;;  %v7557_v15 = vpop.f32.mrb[117].mxu1  ;;  %v13213_v62 = vcombine.high %v2976_v48, %v3168_v49  ;;  %v2707_v10 = vpack.c.bf16 %v14745_v32, %v14745_v32 }
 0x244   : > { %v7518_v21 = vpop.f32.mrb[118].mxu0  ;;  %v7558_v22 = vpop.f32.mrb[118].mxu1 }
 0x245   : > { %v7556_v27 = vadd.f32 %v7555_v11, %v7516_v13  ;;  %v7519_v28 = vpop.f32.mrb[119].mxu0  ;;  %v7559_v29 = vpop.f32.mrb[119].mxu1  ;;  %v2977_v11 = vld [vmem:[%s13949_s22 + $0x3c0] sm:$0xff]  ;;  %v3170_v13 = vld [vmem:[%s13949_s22 + $0x9c8] sm:$0x11]  ;;  %v2710_v22 = vpack.c.bf16 %v1475_v0, %v1475_v0 }
 0x246   : > { %v13215_v26 = vcombine.high %v2977_v11, %v3169_v5  ;;  %v326_v28 = vld [vmem:[%s13942_s12 + $0x1e8] sm:$0xff]  ;;  %v1492_v29 = vcombine.high %v14780_v18, %v14780_v18 }
 0x247   : > { %9674 = vmatmul.mubr.bf16.vlgmr.msra.gmra.mrb[224].mxu0 %v2697_v16  ;;  %9714 = vmatmul.mubr.bf16.vlgmr.msra.gmra.mrb[224].mxu1 %v2699_v17  ;;  %v13210_v16 = vcombine.low %v2975_v47, %v3167_v41  ;;  %v13212_v17 = vcombine.low %v2976_v48, %v3168_v49  ;;  %v2980_v41 = vld [vmem:[%s13949_s22 + $0x3d8] sm:$0xff] }
 0x248   : > { %9722 = vmatpush1.bf16.xpose.msra.mxu0 %v13202_v23  ;;  %9762 = vmatpush1.bf16.xpose.msra.mxu1 %v13204_v25  ;;  %v2712_v23 = vpack.c.bf16 %v1476_v1, %v1476_v1  ;;  %v14783_v25 = vrot.slane %v1477_v2, %v13970_v24  ;;  %v2714_v47 = vpack.c.bf16 %v1492_v29, %v1492_v29 }
 0x249   : > { %9753 = vmatprep.mubr.bf16.mxu0 %v2702_v30  ;;  %9793 = vmatprep.mubr.bf16.mxu1 %v2704_v31  ;;  %v1494_v31 = vcombine.high %v326_v28, %v326_v28  ;;  %v2713_v2 = vpack.c.bf16 %v14780_v18, %v14780_v18 }
 0x24a   : > { %v7595_v39 = vpop.f32.mrb[120].mxu0  ;;  %v7635_v40 = vpop.f32.mrb[120].mxu1  ;;  %9801 = vmatprep.subr.bf16.mxu0 %v13207_v33  ;;  %9841 = vmatprep.subr.bf16.mxu1 %v13209_v34  ;;  %v1493_v30 = vcombine.high %v14783_v25, %v14783_v25  ;;  %v3171_v34 = vld [vmem:[%s13949_s22 + $0x9d0] sm:$0x11] }
 0x24b   : > { %v7596_v42 = vadd.f32 %v7595_v39, %v7556_v27  ;;  %v7597_v43 = vpop.f32.mrb[121].mxu0  ;;  %v7637_v44 = vpop.f32.mrb[121].mxu1  ;;  %v13217_v27 = vcombine.high %v2978_v12, %v3170_v13  ;;  %v2711_v39 = vpack.c.bf16 %v14764_v60, %v14764_v60 }
 0x24c   : > { %v7598_v50 = vpop.f32.mrb[122].mxu0  ;;  %v7638_v51 = vpop.f32.mrb[122].mxu1 }
 0x24d   : > { %v7636_v55 = vadd.f32 %v7635_v40, %v7596_v42  ;;  %v7599_v56 = vpop.f32.mrb[123].mxu0  ;;  %v7639_v57 = vpop.f32.mrb[123].mxu1  ;;  %v2979_v40 = vld [vmem:[%s13949_s22 + $0x3d0] sm:$0xff]  ;;  %v3172_v42 = vld [vmem:[%s13949_s22 + $0x9d8] sm:$0x11]  ;;  %v2716_v51 = vpack.c.bf16 %v1493_v30, %v1493_v30 }
 0x24e   : > { %v327_v56 = vld [vmem:[%s13942_s12 + $0x1f0] sm:$0xff] }
 0x24f   : > { %9754 = vmatmul.mubr.bf16.vlgmr.msra.gmra.mrb[228].mxu0 %v2701_v45  ;;  %9794 = vmatmul.mubr.bf16.vlgmr.msra.gmra.mrb[228].mxu1 %v2703_v46  ;;  %v13214_v45 = vcombine.low %v2977_v11, %v3169_v5  ;;  %v13216_v46 = vcombine.low %v2978_v12, %v3170_v13  ;;  %v1511_v59 = vcombine.high %v327_v56, %v327_v56  ;;  %v2982_v5 = vld [vmem:[%s13949_s22 + $0x3e8] sm:$0xff] }
 0x250   : > { %9802 = vmatpush1.bf16.xpose.msra.mxu0 %v13206_v52  ;;  %9842 = vmatpush1.bf16.xpose.msra.mxu1 %v13208_v53  ;;  %v14799_v52 = vrot.slane %v326_v28, %v13970_v24  ;;  %v14802_v53 = vrot.slane %v1494_v31, %v13970_v24  ;;  %v14818_v11 = vrot.slane %v327_v56, %v13970_v24 }
 0x251   : > { %9833 = vmatprep.mubr.bf16.mxu0 %v2706_v54  ;;  %9873 = vmatprep.mubr.bf16.mxu1 %v2708_v58  ;;  %v13219_v54 = vcombine.high %v2979_v40, %v3171_v34 }
 0x252   : > { %v7675_v3 = vpop.f32.mrb[124].mxu0  ;;  %v7715_v4 = vpop.f32.mrb[124].mxu1  ;;  %9881 = vmatprep.subr.bf16.mxu0 %v13211_v61  ;;  %9921 = vmatprep.subr.bf16.mxu1 %v13213_v62  ;;  %v1509_v57 = vcombine.high %v14799_v52, %v14799_v52  ;;  %v1510_v58 = vcombine.high %v14802_v53, %v14802_v53  ;;  %v3173_v62 = vld [vmem:[%s13949_s22 + $0x9e0] sm:$0x11]  ;;  %v2717_v31 = vpack.c.bf16 %v14799_v52, %v14799_v52 }
 0x253   : > { %v7676_v6 = vadd.f32 %v7675_v3, %v7636_v55  ;;  %v7677_v7 = vpop.f32.mrb[125].mxu0  ;;  %v7717_v8 = vpop.f32.mrb[125].mxu1  ;;  %v13221_v55 = vcombine.high %v2980_v41, %v3172_v42  ;;  %v2715_v3 = vpack.c.bf16 %v14783_v25, %v14783_v25 }
 0x254   : > { %v7678_v14 = vpop.f32.mrb[126].mxu0  ;;  %v7718_v15 = vpop.f32.mrb[126].mxu1 }
 0x255   : > { %v7716_v19 = vadd.f32 %v7715_v4, %v7676_v6  ;;  %v7679_v20 = vpop.f32.mrb[127].mxu0  ;;  %v7719_v21 = vpop.f32.mrb[127].mxu1  ;;  %v2981_v4 = vld [vmem:[%s13949_s22 + $0x3e0] sm:$0xff]  ;;  %v3174_v6 = vld [vmem:[%s13949_s22 + $0x9e8] sm:$0x11]  ;;  %v2718_v15 = vpack.c.bf16 %v1509_v57, %v1509_v57 }
 0x256   : > { %v13223_v18 = vcombine.high %v2981_v4, %v3173_v62  ;;  %v328_v20 = vld [vmem:[%s13942_s12 + $0x1f8] sm:$0xff]  ;;  %v1526_v21 = vcombine.high %v14818_v11, %v14818_v11 }
 0x257   : > { %9834 = vmatmul.mubr.bf16.vlgmr.msra.gmra.mrb[232].mxu0 %v2705_v9  ;;  %9874 = vmatmul.mubr.bf16.vlgmr.msra.gmra.mrb[232].mxu1 %v2707_v10  ;;  %v13218_v9 = vcombine.low %v2979_v40, %v3171_v34  ;;  %v13220_v10 = vcombine.low %v2980_v41, %v3172_v42  ;;  %v2984_v34 = vld [vmem:[%s13949_s22 + $0x3f8] sm:$0xff] }
 0x258   : > { %9882 = vmatpush1.bf16.xpose.msra.mxu0 %v13210_v16  ;;  %9922 = vmatpush1.bf16.xpose.msra.mxu1 %v13212_v17  ;;  %v2720_v16 = vpack.c.bf16 %v1510_v58, %v1510_v58  ;;  %v14821_v17 = vrot.slane %v1511_v59, %v13970_v24  ;;  %v2722_v40 = vpack.c.bf16 %v1526_v21, %v1526_v21 }
 0x259   : > { %9913 = vmatprep.mubr.bf16.mxu0 %v2710_v22  ;;  %9953 = vmatprep.mubr.bf16.mxu1 %v2712_v23  ;;  %v1528_v23 = vcombine.high %v328_v20, %v328_v20  ;;  %v2721_v59 = vpack.c.bf16 %v14818_v11, %v14818_v11 }
 0x25a   : > { %v7755_v32 = vpop.f32.mrb[128].mxu0  ;;  %v7795_v33 = vpop.f32.mrb[128].mxu1  ;;  %9961 = vmatprep.subr.bf16.mxu0 %v13215_v26  ;;  %10001 = vmatprep.subr.bf16.mxu1 %v13217_v27  ;;  %v1527_v22 = vcombine.high %v14821_v17, %v14821_v17  ;;  %v3175_v27 = vld [vmem:[%s13949_s22 + $0x9f0] sm:$0x11] }
 0x25b   : > { %v7756_v35 = vadd.f32 %v7755_v32, %v7716_v19  ;;  %v7757_v36 = vpop.f32.mrb[129].mxu0  ;;  %v7797_v37 = vpop.f32.mrb[129].mxu1  ;;  %v13225_v19 = vcombine.high %v2982_v5, %v3174_v6  ;;  %v2719_v32 = vpack.c.bf16 %v14802_v53, %v14802_v53 }
 0x25c   : > { %v7758_v43 = vpop.f32.mrb[130].mxu0  ;;  %v7798_v44 = vpop.f32.mrb[130].mxu1 }
 0x25d   : > { %v7796_v48 = vadd.f32 %v7795_v33, %v7756_v35  ;;  %v7759_v49 = vpop.f32.mrb[131].mxu0  ;;  %v7799_v50 = vpop.f32.mrb[131].mxu1  ;;  %v2983_v33 = vld [vmem:[%s13949_s22 + $0x3f0] sm:$0xff]  ;;  %v3176_v35 = vld [vmem:[%s13949_s22 + $0x9f8] sm:$0x11]  ;;  %v2724_v44 = vpack.c.bf16 %v1527_v22, %v1527_v22 }
 0x25e   : > { %v329_v49 = vld [vmem:[%s13942_s12 + $0x200] sm:$0xff] }
 0x25f   : > { %9914 = vmatmul.mubr.bf16.vlgmr.msra.gmra.mrb[236].mxu0 %v2709_v38  ;;  %9954 = vmatmul.mubr.bf16.vlgmr.msra.gmra.mrb[236].mxu1 %v2711_v39  ;;  %v13222_v38 = vcombine.low %v2981_v4, %v3173_v62  ;;  %v13224_v39 = vcombine.low %v2982_v5, %v3174_v6  ;;  %v1545_v52 = vcombine.high %v329_v49, %v329_v49  ;;  %v2986_v62 = vld [vmem:[%s13949_s22 + $0x408] sm:$0xff] }
 0x260   : > { %9962 = vmatpush1.bf16.xpose.msra.mxu0 %v13214_v45  ;;  %10002 = vmatpush1.bf16.xpose.msra.mxu1 %v13216_v46  ;;  %v14837_v45 = vrot.slane %v328_v20, %v13970_v24  ;;  %v14840_v46 = vrot.slane %v1528_v23, %v13970_v24  ;;  %v14856_v4 = vrot.slane %v329_v49, %v13970_v24 }
 0x261   : > { %9993 = vmatprep.mubr.bf16.mxu0 %v2714_v47  ;;  %10033 = vmatprep.mubr.bf16.mxu1 %v2716_v51  ;;  %v13227_v47 = vcombine.high %v2983_v33, %v3175_v27 }
 0x262   : > { %v7835_v60 = vpop.f32.mrb[132].mxu0  ;;  %v7875_v61 = vpop.f32.mrb[132].mxu1  ;;  %10041 = vmatprep.subr.bf16.mxu0 %v13219_v54  ;;  %10081 = vmatprep.subr.bf16.mxu1 %v13221_v55  ;;  %v1543_v50 = vcombine.high %v14837_v45, %v14837_v45  ;;  %v1544_v51 = vcombine.high %v14840_v46, %v14840_v46  ;;  %v3177_v55 = vld [vmem:[%s13949_s22 + $0xa00] sm:$0x11]  ;;  %v2725_v23 = vpack.c.bf16 %v14837_v45, %v14837_v45 }
 0x263   : > { %v7836_v63 = vadd.f32 %v7835_v60, %v7796_v48  ;;  %v7837_v0 = vpop.f32.mrb[133].mxu0  ;;  %v7877_v1 = vpop.f32.mrb[133].mxu1  ;;  %v13229_v48 = vcombine.high %v2984_v34, %v3176_v35  ;;  %v2723_v60 = vpack.c.bf16 %v14821_v17, %v14821_v17 }
 0x264   : > { %v7838_v7 = vpop.f32.mrb[134].mxu0  ;;  %v7878_v8 = vpop.f32.mrb[134].mxu1 }
 0x265   : > { %v7876_v12 = vadd.f32 %v7875_v61, %v7836_v63  ;;  %v7839_v13 = vpop.f32.mrb[135].mxu0  ;;  %v7879_v14 = vpop.f32.mrb[135].mxu1  ;;  %v2985_v61 = vld [vmem:[%s13949_s22 + $0x400] sm:$0xff]  ;;  %v3178_v63 = vld [vmem:[%s13949_s22 + $0xa08] sm:$0x11]  ;;  %v2726_v8 = vpack.c.bf16 %v1543_v50, %v1543_v50 }
 0x266   : > { %v13231_v11 = vcombine.high %v2985_v61, %v3177_v55  ;;  %v330_v13 = vld [vmem:[%s13942_s12 + $0x208] sm:$0xff]  ;;  %v1560_v14 = vcombine.high %v14856_v4, %v14856_v4 }
 0x267   : > { %9994 = vmatmul.mubr.bf16.vlgmr.msra.gmra.mrb[240].mxu0 %v2713_v2  ;;  %10034 = vmatmul.mubr.bf16.vlgmr.msra.gmra.mrb[240].mxu1 %v2715_v3  ;;  %v13226_v2 = vcombine.low %v2983_v33, %v3175_v27  ;;  %v13228_v3 = vcombine.low %v2984_v34, %v3176_v35  ;;  %v2988_v27 = vld [vmem:[%s13949_s22 + $0x418] sm:$0xff] }
 0x268   : > { %10042 = vmatpush1.bf16.xpose.msra.mxu0 %v13218_v9  ;;  %10082 = vmatpush1.bf16.xpose.msra.mxu1 %v13220_v10  ;;  %v2728_v9 = vpack.c.bf16 %v1544_v51, %v1544_v51  ;;  %v14859_v10 = vrot.slane %v1545_v52, %v13970_v24  ;;  %v2730_v33 = vpack.c.bf16 %v1560_v14, %v1560_v14 }
 0x269   : > { %10073 = vmatprep.mubr.bf16.mxu0 %v2718_v15  ;;  %10113 = vmatprep.mubr.bf16.mxu1 %v2720_v16  ;;  %v1562_v16 = vcombine.high %v330_v13, %v330_v13  ;;  %v2729_v52 = vpack.c.bf16 %v14856_v4, %v14856_v4 }
 0x26a   : > { %v7915_v25 = vpop.f32.mrb[136].mxu0  ;;  %v7955_v26 = vpop.f32.mrb[136].mxu1  ;;  %10121 = vmatprep.subr.bf16.mxu0 %v13223_v18  ;;  %10161 = vmatprep.subr.bf16.mxu1 %v13225_v19  ;;  %v1561_v15 = vcombine.high %v14859_v10, %v14859_v10  ;;  %v3179_v19 = vld [vmem:[%s13949_s22 + $0xa10] sm:$0x11] }
 0x26b   : > { %v7916_v28 = vadd.f32 %v7915_v25, %v7876_v12  ;;  %v7917_v29 = vpop.f32.mrb[137].mxu0  ;;  %v7957_v30 = vpop.f32.mrb[137].mxu1  ;;  %v13233_v12 = vcombine.high %v2986_v62, %v3178_v63  ;;  %v2727_v25 = vpack.c.bf16 %v14840_v46, %v14840_v46 }
 0x26c   : > { %v7918_v36 = vpop.f32.mrb[138].mxu0  ;;  %v7958_v37 = vpop.f32.mrb[138].mxu1 }
 0x26d   : > { %v7956_v41 = vadd.f32 %v7955_v26, %v7916_v28  ;;  %v7919_v42 = vpop.f32.mrb[139].mxu0  ;;  %v7959_v43 = vpop.f32.mrb[139].mxu1  ;;  %v2987_v26 = vld [vmem:[%s13949_s22 + $0x410] sm:$0xff]  ;;  %v3180_v28 = vld [vmem:[%s13949_s22 + $0xa18] sm:$0x11]  ;;  %v2732_v37 = vpack.c.bf16 %v1561_v15, %v1561_v15 }
 0x26e   : > { %v331_v42 = vld [vmem:[%s13942_s12 + $0x210] sm:$0xff] }
 0x26f   : > { %10074 = vmatmul.mubr.bf16.vlgmr.msra.gmra.mrb[244].mxu0 %v2717_v31  ;;  %10114 = vmatmul.mubr.bf16.vlgmr.msra.gmra.mrb[244].mxu1 %v2719_v32  ;;  %v13230_v31 = vcombine.low %v2985_v61, %v3177_v55  ;;  %v13232_v32 = vcombine.low %v2986_v62, %v3178_v63  ;;  %v1579_v45 = vcombine.high %v331_v42, %v331_v42  ;;  %v2990_v55 = vld [vmem:[%s13949_s22 + $0x428] sm:$0xff] }
 0x270   : > { %10122 = vmatpush1.bf16.xpose.msra.mxu0 %v13222_v38  ;;  %10162 = vmatpush1.bf16.xpose.msra.mxu1 %v13224_v39  ;;  %v14875_v38 = vrot.slane %v330_v13, %v13970_v24  ;;  %v14878_v39 = vrot.slane %v1562_v16, %v13970_v24  ;;  %v14894_v61 = vrot.slane %v331_v42, %v13970_v24 }
 0x271   : > { %10153 = vmatprep.mubr.bf16.mxu0 %v2722_v40  ;;  %10193 = vmatprep.mubr.bf16.mxu1 %v2724_v44  ;;  %v13235_v40 = vcombine.high %v2987_v26, %v3179_v19 }
 0x272   : > { %v7995_v53 = vpop.f32.mrb[140].mxu0  ;;  %v8035_v54 = vpop.f32.mrb[140].mxu1  ;;  %10201 = vmatprep.subr.bf16.mxu0 %v13227_v47  ;;  %10241 = vmatprep.subr.bf16.mxu1 %v13229_v48  ;;  %v1577_v43 = vcombine.high %v14875_v38, %v14875_v38  ;;  %v1578_v44 = vcombine.high %v14878_v39, %v14878_v39  ;;  %v3181_v48 = vld [vmem:[%s13949_s22 + $0xa20] sm:$0x11]  ;;  %v2733_v16 = vpack.c.bf16 %v14875_v38, %v14875_v38 }
 0x273   : > { %v7996_v56 = vadd.f32 %v7995_v53, %v7956_v41  ;;  %v7997_v57 = vpop.f32.mrb[141].mxu0  ;;  %v8037_v58 = vpop.f32.mrb[141].mxu1  ;;  %v13237_v41 = vcombine.high %v2988_v27, %v3180_v28  ;;  %v2731_v53 = vpack.c.bf16 %v14859_v10, %v14859_v10 }
 0x274   : > { %v7998_v0 = vpop.f32.mrb[142].mxu0  ;;  %v8038_v1 = vpop.f32.mrb[142].mxu1 }
 0x275   : > { %v8036_v5 = vadd.f32 %v8035_v54, %v7996_v56  ;;  %v7999_v6 = vpop.f32.mrb[143].mxu0  ;;  %v8039_v7 = vpop.f32.mrb[143].mxu1  ;;  %v2989_v54 = vld [vmem:[%s13949_s22 + $0x420] sm:$0xff]  ;;  %v3182_v56 = vld [vmem:[%s13949_s22 + $0xa28] sm:$0x11]  ;;  %v2734_v1 = vpack.c.bf16 %v1577_v43, %v1577_v43 }
 0x276   : > { %v13239_v4 = vcombine.high %v2989_v54, %v3181_v48  ;;  %v332_v6 = vld [vmem:[%s13942_s12 + $0x218] sm:$0xff]  ;;  %v1594_v7 = vcombine.high %v14894_v61, %v14894_v61 }
 0x277   : > { %10154 = vmatmul.mubr.bf16.vlgmr.msra.gmra.mrb[248].mxu0 %v2721_v59  ;;  %10194 = vmatmul.mubr.bf16.vlgmr.msra.gmra.mrb[248].mxu1 %v2723_v60  ;;  %v13234_v59 = vcombine.low %v2987_v26, %v3179_v19  ;;  %v13236_v60 = vcombine.low %v2988_v27, %v3180_v28  ;;  %v2992_v19 = vld [vmem:[%s13949_s22 + $0x438] sm:$0xff] }
 0x278   : > { %10202 = vmatpush1.bf16.xpose.msra.mxu0 %v13226_v2  ;;  %10242 = vmatpush1.bf16.xpose.msra.mxu1 %v13228_v3  ;;  %v2736_v2 = vpack.c.bf16 %v1578_v44, %v1578_v44  ;;  %v14897_v3 = vrot.slane %v1579_v45, %v13970_v24  ;;  %v2738_v26 = vpack.c.bf16 %v1594_v7, %v1594_v7 }
 0x279   : > { %10233 = vmatprep.mubr.bf16.mxu0 %v2726_v8  ;;  %10273 = vmatprep.mubr.bf16.mxu1 %v2728_v9  ;;  %v1596_v9 = vcombine.high %v332_v6, %v332_v6  ;;  %v2737_v45 = vpack.c.bf16 %v14894_v61, %v14894_v61 }
 0x27a   : > { %v8075_v17 = vpop.f32.mrb[144].mxu0  ;;  %v8115_v18 = vpop.f32.mrb[144].mxu1  ;;  %10281 = vmatprep.subr.bf16.mxu0 %v13231_v11  ;;  %10321 = vmatprep.subr.bf16.mxu1 %v13233_v12  ;;  %v1595_v8 = vcombine.high %v14897_v3, %v14897_v3  ;;  %v3183_v12 = vld [vmem:[%s13949_s22 + $0xa30] sm:$0x11] }
 0x27b   : > { %v8076_v20 = vadd.f32 %v8075_v17, %v8036_v5  ;;  %v8077_v21 = vpop.f32.mrb[145].mxu0  ;;  %v8117_v22 = vpop.f32.mrb[145].mxu1  ;;  %v13241_v5 = vcombine.high %v2990_v55, %v3182_v56  ;;  %v2735_v17 = vpack.c.bf16 %v14878_v39, %v14878_v39 }
 0x27c   : > { %v8078_v29 = vpop.f32.mrb[146].mxu0  ;;  %v8118_v30 = vpop.f32.mrb[146].mxu1 }
 0x27d   : > { %v8116_v34 = vadd.f32 %v8115_v18, %v8076_v20  ;;  %v8079_v35 = vpop.f32.mrb[147].mxu0  ;;  %v8119_v36 = vpop.f32.mrb[147].mxu1  ;;  %v2991_v18 = vld [vmem:[%s13949_s22 + $0x430] sm:$0xff]  ;;  %v3184_v20 = vld [vmem:[%s13949_s22 + $0xa38] sm:$0x11]  ;;  %v2740_v30 = vpack.c.bf16 %v1595_v8, %v1595_v8 }
 0x27e   : > { %v333_v35 = vld [vmem:[%s13942_s12 + $0x220] sm:$0xff] }
 0x27f   : > { %10234 = vmatmul.mubr.bf16.vlgmr.msra.gmra.mrb[252].mxu0 %v2725_v23  ;;  %10274 = vmatmul.mubr.bf16.vlgmr.msra.gmra.mrb[252].mxu1 %v2727_v25  ;;  %v13238_v23 = vcombine.low %v2989_v54, %v3181_v48  ;;  %v13240_v25 = vcombine.low %v2990_v55, %v3182_v56  ;;  %v1613_v38 = vcombine.high %v333_v35, %v333_v35  ;;  %v2994_v48 = vld [vmem:[%s13949_s22 + $0x448] sm:$0xff] }
 0x280   : > { %10282 = vmatpush1.bf16.xpose.msra.mxu0 %v13230_v31  ;;  %10322 = vmatpush1.bf16.xpose.msra.mxu1 %v13232_v32  ;;  %v14913_v31 = vrot.slane %v332_v6, %v13970_v24  ;;  %v14916_v32 = vrot.slane %v1596_v9, %v13970_v24  ;;  %v14932_v54 = vrot.slane %v333_v35, %v13970_v24 }
 0x281   : > { %10313 = vmatprep.mubr.bf16.mxu0 %v2730_v33  ;;  %10353 = vmatprep.mubr.bf16.mxu1 %v2732_v37  ;;  %v13243_v33 = vcombine.high %v2991_v18, %v3183_v12 }
 0x282   : > { %v8155_v46 = vpop.f32.mrb[148].mxu0  ;;  %v8195_v47 = vpop.f32.mrb[148].mxu1  ;;  %10361 = vmatprep.subr.bf16.mxu0 %v13235_v40  ;;  %10401 = vmatprep.subr.bf16.mxu1 %v13237_v41  ;;  %v1611_v36 = vcombine.high %v14913_v31, %v14913_v31  ;;  %v1612_v37 = vcombine.high %v14916_v32, %v14916_v32  ;;  %v3185_v41 = vld [vmem:[%s13949_s22 + $0xa40] sm:$0x11]  ;;  %v2741_v9 = vpack.c.bf16 %v14913_v31, %v14913_v31 }
 0x283   : > { %v8156_v49 = vadd.f32 %v8155_v46, %v8116_v34  ;;  %v8157_v50 = vpop.f32.mrb[149].mxu0  ;;  %v8197_v51 = vpop.f32.mrb[149].mxu1  ;;  %v13245_v34 = vcombine.high %v2992_v19, %v3184_v20  ;;  %v2739_v46 = vpack.c.bf16 %v14897_v3, %v14897_v3 }
 0x284   : > { %v8158_v57 = vpop.f32.mrb[150].mxu0  ;;  %v8198_v58 = vpop.f32.mrb[150].mxu1 }
 0x285   : > { %v8196_v62 = vadd.f32 %v8195_v47, %v8156_v49  ;;  %v8159_v63 = vpop.f32.mrb[151].mxu0  ;;  %v8199_v0 = vpop.f32.mrb[151].mxu1  ;;  %v2993_v47 = vld [vmem:[%s13949_s22 + $0x440] sm:$0xff]  ;;  %v3186_v49 = vld [vmem:[%s13949_s22 + $0xa48] sm:$0x11]  ;;  %v2742_v58 = vpack.c.bf16 %v1611_v36, %v1611_v36 }
 0x286   : > { %v13247_v61 = vcombine.high %v2993_v47, %v3185_v41  ;;  %v334_v63 = vld [vmem:[%s13942_s12 + $0x228] sm:$0xff]  ;;  %v1628_v0 = vcombine.high %v14932_v54, %v14932_v54 }
 0x287   : > { %10314 = vmatmul.mubr.bf16.vlgmr.msra.gmra.mrb[0].mxu0 %v2729_v52  ;;  %10354 = vmatmul.mubr.bf16.vlgmr.msra.gmra.mrb[0].mxu1 %v2731_v53  ;;  %v13242_v52 = vcombine.low %v2991_v18, %v3183_v12  ;;  %v13244_v53 = vcombine.low %v2992_v19, %v3184_v20  ;;  %v2996_v12 = vld [vmem:[%s13949_s22 + $0x458] sm:$0xff] }
 0x288   : > { %10362 = vmatpush1.bf16.xpose.msra.mxu0 %v13234_v59  ;;  %10402 = vmatpush1.bf16.xpose.msra.mxu1 %v13236_v60  ;;  %v2744_v59 = vpack.c.bf16 %v1612_v37, %v1612_v37  ;;  %v14935_v60 = vrot.slane %v1613_v38, %v13970_v24  ;;  %v2746_v18 = vpack.c.bf16 %v1628_v0, %v1628_v0 }
 0x289   : > { %10393 = vmatprep.mubr.bf16.mxu0 %v2734_v1  ;;  %10433 = vmatprep.mubr.bf16.mxu1 %v2736_v2  ;;  %v1630_v2 = vcombine.high %v334_v63, %v334_v63  ;;  %v2745_v38 = vpack.c.bf16 %v14932_v54, %v14932_v54 }
 0x28a   : > { %v8235_v10 = vpop.f32.mrb[152].mxu0  ;;  %v8275_v11 = vpop.f32.mrb[152].mxu1  ;;  %10441 = vmatprep.subr.bf16.mxu0 %v13239_v4  ;;  %10481 = vmatprep.subr.bf16.mxu1 %v13241_v5  ;;  %v1629_v1 = vcombine.high %v14935_v60, %v14935_v60  ;;  %v3187_v5 = vld [vmem:[%s13949_s22 + $0xa50] sm:$0x11] }
 0x28b   : > { %v8236_v13 = vadd.f32 %v8235_v10, %v8196_v62  ;;  %v8237_v14 = vpop.f32.mrb[153].mxu0  ;;  %v8277_v15 = vpop.f32.mrb[153].mxu1  ;;  %v13249_v62 = vcombine.high %v2994_v48, %v3186_v49  ;;  %v2743_v10 = vpack.c.bf16 %v14916_v32, %v14916_v32 }
 0x28c   : > { %v8238_v21 = vpop.f32.mrb[154].mxu0  ;;  %v8278_v22 = vpop.f32.mrb[154].mxu1 }
 0x28d   : > { %v8276_v27 = vadd.f32 %v8275_v11, %v8236_v13  ;;  %v8239_v28 = vpop.f32.mrb[155].mxu0  ;;  %v8279_v29 = vpop.f32.mrb[155].mxu1  ;;  %v2995_v11 = vld [vmem:[%s13949_s22 + $0x450] sm:$0xff]  ;;  %v3188_v13 = vld [vmem:[%s13949_s22 + $0xa58] sm:$0x11]  ;;  %v2748_v22 = vpack.c.bf16 %v1629_v1, %v1629_v1 }
 0x28e   : > { %v335_v28 = vld [vmem:[%s13942_s12 + $0x230] sm:$0xff] }
 0x28f   : > { %10394 = vmatmul.mubr.bf16.vlgmr.msra.gmra.mrb[4].mxu0 %v2733_v16  ;;  %10434 = vmatmul.mubr.bf16.vlgmr.msra.gmra.mrb[4].mxu1 %v2735_v17  ;;  %v13246_v16 = vcombine.low %v2993_v47, %v3185_v41  ;;  %v13248_v17 = vcombine.low %v2994_v48, %v3186_v49  ;;  %v1647_v31 = vcombine.high %v335_v28, %v335_v28  ;;  %v2998_v41 = vld [vmem:[%s13949_s22 + $0x468] sm:$0xff] }
 0x290   : > { %10442 = vmatpush1.bf16.xpose.msra.mxu0 %v13238_v23  ;;  %10482 = vmatpush1.bf16.xpose.msra.mxu1 %v13240_v25  ;;  %v14951_v23 = vrot.slane %v334_v63, %v13970_v24  ;;  %v14954_v25 = vrot.slane %v1630_v2, %v13970_v24  ;;  %v14970_v47 = vrot.slane %v335_v28, %v13970_v24 }
 0x291   : > { %10473 = vmatprep.mubr.bf16.mxu0 %v2738_v26  ;;  %10513 = vmatprep.mubr.bf16.mxu1 %v2740_v30  ;;  %v13251_v26 = vcombine.high %v2995_v11, %v3187_v5 }
 0x292   : > { %v8315_v39 = vpop.f32.mrb[156].mxu0  ;;  %v8355_v40 = vpop.f32.mrb[156].mxu1  ;;  %10521 = vmatprep.subr.bf16.mxu0 %v13243_v33  ;;  %10561 = vmatprep.subr.bf16.mxu1 %v13245_v34  ;;  %v1645_v29 = vcombine.high %v14951_v23, %v14951_v23  ;;  %v1646_v30 = vcombine.high %v14954_v25, %v14954_v25  ;;  %v3189_v34 = vld [vmem:[%s13949_s22 + $0xa60] sm:$0x11]  ;;  %v2749_v2 = vpack.c.bf16 %v14951_v23, %v14951_v23 }
 0x293   : > { %v8316_v42 = vadd.f32 %v8315_v39, %v8276_v27  ;;  %v8317_v43 = vpop.f32.mrb[157].mxu0  ;;  %v8357_v44 = vpop.f32.mrb[157].mxu1  ;;  %v13253_v27 = vcombine.high %v2996_v12, %v3188_v13  ;;  %v2747_v39 = vpack.c.bf16 %v14935_v60, %v14935_v60 }
 0x294   : > { %v8318_v50 = vpop.f32.mrb[158].mxu0  ;;  %v8358_v51 = vpop.f32.mrb[158].mxu1 }
 0x295   : > { %v8356_v55 = vadd.f32 %v8355_v40, %v8316_v42  ;;  %v8319_v56 = vpop.f32.mrb[159].mxu0  ;;  %v8359_v57 = vpop.f32.mrb[159].mxu1  ;;  %v2997_v40 = vld [vmem:[%s13949_s22 + $0x460] sm:$0xff]  ;;  %v3190_v42 = vld [vmem:[%s13949_s22 + $0xa68] sm:$0x11]  ;;  %v2750_v51 = vpack.c.bf16 %v1645_v29, %v1645_v29 }
 0x296   : > { %v13255_v54 = vcombine.high %v2997_v40, %v3189_v34  ;;  %v336_v56 = vld [vmem:[%s13942_s12 + $0x238] sm:$0xff]  ;;  %v1662_v57 = vcombine.high %v14970_v47, %v14970_v47 }
 0x297   : > { %10474 = vmatmul.mubr.bf16.vlgmr.msra.gmra.mrb[8].mxu0 %v2737_v45  ;;  %10514 = vmatmul.mubr.bf16.vlgmr.msra.gmra.mrb[8].mxu1 %v2739_v46  ;;  %v13250_v45 = vcombine.low %v2995_v11, %v3187_v5  ;;  %v13252_v46 = vcombine.low %v2996_v12, %v3188_v13  ;;  %v3000_v5 = vld [vmem:[%s13949_s22 + $0x478] sm:$0xff] }
 0x298   : > { %10522 = vmatpush1.bf16.xpose.msra.mxu0 %v13242_v52  ;;  %10562 = vmatpush1.bf16.xpose.msra.mxu1 %v13244_v53  ;;  %v2752_v52 = vpack.c.bf16 %v1646_v30, %v1646_v30  ;;  %v14973_v53 = vrot.slane %v1647_v31, %v13970_v24  ;;  %v2754_v11 = vpack.c.bf16 %v1662_v57, %v1662_v57 }
 0x299   : > { %10553 = vmatprep.mubr.bf16.mxu0 %v2742_v58  ;;  %10593 = vmatprep.mubr.bf16.mxu1 %v2744_v59  ;;  %v1664_v59 = vcombine.high %v336_v56, %v336_v56  ;;  %v2753_v31 = vpack.c.bf16 %v14970_v47, %v14970_v47 }
 0x29a   : > { %v8395_v3 = vpop.f32.mrb[160].mxu0  ;;  %v8435_v4 = vpop.f32.mrb[160].mxu1  ;;  %10601 = vmatprep.subr.bf16.mxu0 %v13247_v61  ;;  %10641 = vmatprep.subr.bf16.mxu1 %v13249_v62  ;;  %v1663_v58 = vcombine.high %v14973_v53, %v14973_v53  ;;  %v3191_v62 = vld [vmem:[%s13949_s22 + $0xa70] sm:$0x11] }
 0x29b   : > { %v8396_v6 = vadd.f32 %v8395_v3, %v8356_v55  ;;  %v8397_v7 = vpop.f32.mrb[161].mxu0  ;;  %v8437_v8 = vpop.f32.mrb[161].mxu1  ;;  %v13257_v55 = vcombine.high %v2998_v41, %v3190_v42  ;;  %v2751_v3 = vpack.c.bf16 %v14954_v25, %v14954_v25 }
 0x29c   : > { %v8398_v14 = vpop.f32.mrb[162].mxu0  ;;  %v8438_v15 = vpop.f32.mrb[162].mxu1 }
 0x29d   : > { %v8436_v19 = vadd.f32 %v8435_v4, %v8396_v6  ;;  %v8399_v20 = vpop.f32.mrb[163].mxu0  ;;  %v8439_v21 = vpop.f32.mrb[163].mxu1  ;;  %v2999_v4 = vld [vmem:[%s13949_s22 + $0x470] sm:$0xff]  ;;  %v3192_v6 = vld [vmem:[%s13949_s22 + $0xa78] sm:$0x11]  ;;  %v2756_v15 = vpack.c.bf16 %v1663_v58, %v1663_v58 }
 0x29e   : > { %v337_v20 = vld [vmem:[%s13942_s12 + $0x240] sm:$0xff] }
 0x29f   : > { %10554 = vmatmul.mubr.bf16.vlgmr.msra.gmra.mrb[12].mxu0 %v2741_v9  ;;  %10594 = vmatmul.mubr.bf16.vlgmr.msra.gmra.mrb[12].mxu1 %v2743_v10  ;;  %v13254_v9 = vcombine.low %v2997_v40, %v3189_v34  ;;  %v13256_v10 = vcombine.low %v2998_v41, %v3190_v42  ;;  %v1681_v23 = vcombine.high %v337_v20, %v337_v20  ;;  %v3002_v34 = vld [vmem:[%s13949_s22 + $0x488] sm:$0xff] }
 0x2a0   : > { %10602 = vmatpush1.bf16.xpose.msra.mxu0 %v13246_v16  ;;  %10642 = vmatpush1.bf16.xpose.msra.mxu1 %v13248_v17  ;;  %v14989_v16 = vrot.slane %v336_v56, %v13970_v24  ;;  %v14992_v17 = vrot.slane %v1664_v59, %v13970_v24  ;;  %v15008_v40 = vrot.slane %v337_v20, %v13970_v24 }
 0x2a1   : > { %10633 = vmatprep.mubr.bf16.mxu0 %v2746_v18  ;;  %10673 = vmatprep.mubr.bf16.mxu1 %v2748_v22  ;;  %v13259_v18 = vcombine.high %v2999_v4, %v3191_v62 }
 0x2a2   : > { %v8475_v32 = vpop.f32.mrb[164].mxu0  ;;  %v8515_v33 = vpop.f32.mrb[164].mxu1  ;;  %10681 = vmatprep.subr.bf16.mxu0 %v13251_v26  ;;  %10721 = vmatprep.subr.bf16.mxu1 %v13253_v27  ;;  %v1679_v21 = vcombine.high %v14989_v16, %v14989_v16  ;;  %v1680_v22 = vcombine.high %v14992_v17, %v14992_v17  ;;  %v3193_v27 = vld [vmem:[%s13949_s22 + $0xa80] sm:$0x11]  ;;  %v2757_v59 = vpack.c.bf16 %v14989_v16, %v14989_v16 }
 0x2a3   : > { %v8476_v35 = vadd.f32 %v8475_v32, %v8436_v19  ;;  %v8477_v36 = vpop.f32.mrb[165].mxu0  ;;  %v8517_v37 = vpop.f32.mrb[165].mxu1  ;;  %v13261_v19 = vcombine.high %v3000_v5, %v3192_v6  ;;  %v2755_v32 = vpack.c.bf16 %v14973_v53, %v14973_v53 }
 0x2a4   : > { %v8478_v43 = vpop.f32.mrb[166].mxu0  ;;  %v8518_v44 = vpop.f32.mrb[166].mxu1 }
 0x2a5   : > { %v8516_v48 = vadd.f32 %v8515_v33, %v8476_v35  ;;  %v8479_v49 = vpop.f32.mrb[167].mxu0  ;;  %v8519_v50 = vpop.f32.mrb[167].mxu1  ;;  %v3001_v33 = vld [vmem:[%s13949_s22 + $0x480] sm:$0xff]  ;;  %v3194_v35 = vld [vmem:[%s13949_s22 + $0xa88] sm:$0x11]  ;;  %v2758_v44 = vpack.c.bf16 %v1679_v21, %v1679_v21 }
 0x2a6   : > { %v13263_v47 = vcombine.high %v3001_v33, %v3193_v27  ;;  %v338_v49 = vld [vmem:[%s13942_s12 + $0x248] sm:$0xff]  ;;  %v1696_v50 = vcombine.high %v15008_v40, %v15008_v40 }
 0x2a7   : > { %10634 = vmatmul.mubr.bf16.vlgmr.msra.gmra.mrb[16].mxu0 %v2745_v38  ;;  %10674 = vmatmul.mubr.bf16.vlgmr.msra.gmra.mrb[16].mxu1 %v2747_v39  ;;  %v13258_v38 = vcombine.low %v2999_v4, %v3191_v62  ;;  %v13260_v39 = vcombine.low %v3000_v5, %v3192_v6  ;;  %v3004_v62 = vld [vmem:[%s13949_s22 + $0x498] sm:$0xff] }
 0x2a8   : > { %10682 = vmatpush1.bf16.xpose.msra.mxu0 %v13250_v45  ;;  %10722 = vmatpush1.bf16.xpose.msra.mxu1 %v13252_v46  ;;  %v2760_v45 = vpack.c.bf16 %v1680_v22, %v1680_v22  ;;  %v15011_v46 = vrot.slane %v1681_v23, %v13970_v24  ;;  %v2762_v4 = vpack.c.bf16 %v1696_v50, %v1696_v50 }
 0x2a9   : > { %10713 = vmatprep.mubr.bf16.mxu0 %v2750_v51  ;;  %10753 = vmatprep.mubr.bf16.mxu1 %v2752_v52  ;;  %v1698_v52 = vcombine.high %v338_v49, %v338_v49  ;;  %v2761_v23 = vpack.c.bf16 %v15008_v40, %v15008_v40 }
 0x2aa   : > { %v8555_v60 = vpop.f32.mrb[168].mxu0  ;;  %v8595_v61 = vpop.f32.mrb[168].mxu1  ;;  %10761 = vmatprep.subr.bf16.mxu0 %v13255_v54  ;;  %10801 = vmatprep.subr.bf16.mxu1 %v13257_v55  ;;  %v1697_v51 = vcombine.high %v15011_v46, %v15011_v46  ;;  %v3195_v55 = vld [vmem:[%s13949_s22 + $0xa90] sm:$0x11] }
 0x2ab   : > { %v8556_v63 = vadd.f32 %v8555_v60, %v8516_v48  ;;  %v8557_v0 = vpop.f32.mrb[169].mxu0  ;;  %v8597_v1 = vpop.f32.mrb[169].mxu1  ;;  %v13265_v48 = vcombine.high %v3002_v34, %v3194_v35  ;;  %v2759_v60 = vpack.c.bf16 %v14992_v17, %v14992_v17 }
 0x2ac   : > { %v8558_v7 = vpop.f32.mrb[170].mxu0  ;;  %v8598_v8 = vpop.f32.mrb[170].mxu1 }
 0x2ad   : > { %v8596_v12 = vadd.f32 %v8595_v61, %v8556_v63  ;;  %v8559_v13 = vpop.f32.mrb[171].mxu0  ;;  %v8599_v14 = vpop.f32.mrb[171].mxu1  ;;  %v3003_v61 = vld [vmem:[%s13949_s22 + $0x490] sm:$0xff]  ;;  %v3196_v63 = vld [vmem:[%s13949_s22 + $0xa98] sm:$0x11]  ;;  %v2764_v8 = vpack.c.bf16 %v1697_v51, %v1697_v51 }
 0x2ae   : > { %v339_v13 = vld [vmem:[%s13942_s12 + $0x250] sm:$0xff] }
 0x2af   : > { %10714 = vmatmul.mubr.bf16.vlgmr.msra.gmra.mrb[20].mxu0 %v2749_v2  ;;  %10754 = vmatmul.mubr.bf16.vlgmr.msra.gmra.mrb[20].mxu1 %v2751_v3  ;;  %v13262_v2 = vcombine.low %v3001_v33, %v3193_v27  ;;  %v13264_v3 = vcombine.low %v3002_v34, %v3194_v35  ;;  %v1715_v16 = vcombine.high %v339_v13, %v339_v13  ;;  %v3006_v27 = vld [vmem:[%s13949_s22 + $0x4a8] sm:$0xff] }
 0x2b0   : > { %10762 = vmatpush1.bf16.xpose.msra.mxu0 %v13254_v9  ;;  %10802 = vmatpush1.bf16.xpose.msra.mxu1 %v13256_v10  ;;  %v15027_v9 = vrot.slane %v338_v49, %v13970_v24  ;;  %v15030_v10 = vrot.slane %v1698_v52, %v13970_v24  ;;  %v15046_v33 = vrot.slane %v339_v13, %v13970_v24 }
 0x2b1   : > { %10793 = vmatprep.mubr.bf16.mxu0 %v2754_v11  ;;  %10833 = vmatprep.mubr.bf16.mxu1 %v2756_v15  ;;  %v13267_v11 = vcombine.high %v3003_v61, %v3195_v55 }
 0x2b2   : > { %v8635_v25 = vpop.f32.mrb[172].mxu0  ;;  %v8675_v26 = vpop.f32.mrb[172].mxu1  ;;  %10841 = vmatprep.subr.bf16.mxu0 %v13259_v18  ;;  %10881 = vmatprep.subr.bf16.mxu1 %v13261_v19  ;;  %v1713_v14 = vcombine.high %v15027_v9, %v15027_v9  ;;  %v1714_v15 = vcombine.high %v15030_v10, %v15030_v10  ;;  %v3197_v19 = vld [vmem:[%s13949_s22 + $0xaa0] sm:$0x11]  ;;  %v2765_v52 = vpack.c.bf16 %v15027_v9, %v15027_v9 }
 0x2b3   : > { %v8636_v28 = vadd.f32 %v8635_v25, %v8596_v12  ;;  %v8637_v29 = vpop.f32.mrb[173].mxu0  ;;  %v8677_v30 = vpop.f32.mrb[173].mxu1  ;;  %v13269_v12 = vcombine.high %v3004_v62, %v3196_v63  ;;  %v2763_v25 = vpack.c.bf16 %v15011_v46, %v15011_v46 }
 0x2b4   : > { %v8638_v36 = vpop.f32.mrb[174].mxu0  ;;  %v8678_v37 = vpop.f32.mrb[174].mxu1 }
 0x2b5   : > { %v8676_v41 = vadd.f32 %v8675_v26, %v8636_v28  ;;  %v8639_v42 = vpop.f32.mrb[175].mxu0  ;;  %v8679_v43 = vpop.f32.mrb[175].mxu1  ;;  %v3005_v26 = vld [vmem:[%s13949_s22 + $0x4a0] sm:$0xff]  ;;  %v3198_v28 = vld [vmem:[%s13949_s22 + $0xaa8] sm:$0x11]  ;;  %v2766_v37 = vpack.c.bf16 %v1713_v14, %v1713_v14 }
 0x2b6   : > { %v13271_v40 = vcombine.high %v3005_v26, %v3197_v19  ;;  %v340_v42 = vld [vmem:[%s13942_s12 + $0x258] sm:$0xff]  ;;  %v1730_v43 = vcombine.high %v15046_v33, %v15046_v33 }
 0x2b7   : > { %10794 = vmatmul.mubr.bf16.vlgmr.msra.gmra.mrb[24].mxu0 %v2753_v31  ;;  %10834 = vmatmul.mubr.bf16.vlgmr.msra.gmra.mrb[24].mxu1 %v2755_v32  ;;  %v13266_v31 = vcombine.low %v3003_v61, %v3195_v55  ;;  %v13268_v32 = vcombine.low %v3004_v62, %v3196_v63  ;;  %v3008_v55 = vld [vmem:[%s13949_s22 + $0x4b8] sm:$0xff] }
 0x2b8   : > { %10842 = vmatpush1.bf16.xpose.msra.mxu0 %v13258_v38  ;;  %10882 = vmatpush1.bf16.xpose.msra.mxu1 %v13260_v39  ;;  %v2768_v38 = vpack.c.bf16 %v1714_v15, %v1714_v15  ;;  %v15049_v39 = vrot.slane %v1715_v16, %v13970_v24  ;;  %v2770_v61 = vpack.c.bf16 %v1730_v43, %v1730_v43 }
 0x2b9   : > { %10873 = vmatprep.mubr.bf16.mxu0 %v2758_v44  ;;  %10913 = vmatprep.mubr.bf16.mxu1 %v2760_v45  ;;  %v1732_v45 = vcombine.high %v340_v42, %v340_v42  ;;  %v2769_v16 = vpack.c.bf16 %v15046_v33, %v15046_v33 }
 0x2ba   : > { %v8715_v53 = vpop.f32.mrb[176].mxu0  ;;  %v8755_v54 = vpop.f32.mrb[176].mxu1  ;;  %10921 = vmatprep.subr.bf16.mxu0 %v13263_v47  ;;  %10961 = vmatprep.subr.bf16.mxu1 %v13265_v48  ;;  %v1731_v44 = vcombine.high %v15049_v39, %v15049_v39  ;;  %v3199_v48 = vld [vmem:[%s13949_s22 + $0xab0] sm:$0x11] }
 0x2bb   : > { %v8716_v56 = vadd.f32 %v8715_v53, %v8676_v41  ;;  %v8717_v57 = vpop.f32.mrb[177].mxu0  ;;  %v8757_v58 = vpop.f32.mrb[177].mxu1  ;;  %v13273_v41 = vcombine.high %v3006_v27, %v3198_v28  ;;  %v2767_v53 = vpack.c.bf16 %v15030_v10, %v15030_v10 }
 0x2bc   : > { %v8718_v0 = vpop.f32.mrb[178].mxu0  ;;  %v8758_v1 = vpop.f32.mrb[178].mxu1 }
 0x2bd   : > { %v8756_v5 = vadd.f32 %v8755_v54, %v8716_v56  ;;  %v8719_v6 = vpop.f32.mrb[179].mxu0  ;;  %v8759_v7 = vpop.f32.mrb[179].mxu1  ;;  %v3007_v54 = vld [vmem:[%s13949_s22 + $0x4b0] sm:$0xff]  ;;  %v3200_v56 = vld [vmem:[%s13949_s22 + $0xab8] sm:$0x11]  ;;  %v2772_v1 = vpack.c.bf16 %v1731_v44, %v1731_v44 }
 0x2be   : > { %v341_v6 = vld [vmem:[%s13942_s12 + $0x260] sm:$0xff] }
 0x2bf   : > { %10874 = vmatmul.mubr.bf16.vlgmr.msra.gmra.mrb[28].mxu0 %v2757_v59  ;;  %10914 = vmatmul.mubr.bf16.vlgmr.msra.gmra.mrb[28].mxu1 %v2759_v60  ;;  %v13270_v59 = vcombine.low %v3005_v26, %v3197_v19  ;;  %v13272_v60 = vcombine.low %v3006_v27, %v3198_v28  ;;  %v1749_v9 = vcombine.high %v341_v6, %v341_v6  ;;  %v3010_v19 = vld [vmem:[%s13949_s22 + $0x4c8] sm:$0xff] }
 0x2c0   : > { %10922 = vmatpush1.bf16.xpose.msra.mxu0 %v13262_v2  ;;  %10962 = vmatpush1.bf16.xpose.msra.mxu1 %v13264_v3  ;;  %v15065_v2 = vrot.slane %v340_v42, %v13970_v24  ;;  %v15068_v3 = vrot.slane %v1732_v45, %v13970_v24  ;;  %v15084_v26 = vrot.slane %v341_v6, %v13970_v24 }
 0x2c1   : > { %10953 = vmatprep.mubr.bf16.mxu0 %v2762_v4  ;;  %10993 = vmatprep.mubr.bf16.mxu1 %v2764_v8  ;;  %v13275_v4 = vcombine.high %v3007_v54, %v3199_v48 }
 0x2c2   : > { %v8795_v17 = vpop.f32.mrb[180].mxu0  ;;  %v8835_v18 = vpop.f32.mrb[180].mxu1  ;;  %11001 = vmatprep.subr.bf16.mxu0 %v13267_v11  ;;  %11041 = vmatprep.subr.bf16.mxu1 %v13269_v12  ;;  %v1747_v7 = vcombine.high %v15065_v2, %v15065_v2  ;;  %v1748_v8 = vcombine.high %v15068_v3, %v15068_v3  ;;  %v3201_v12 = vld [vmem:[%s13949_s22 + $0xac0] sm:$0x11]  ;;  %v2773_v45 = vpack.c.bf16 %v15065_v2, %v15065_v2 }
 0x2c3   : > { %v8796_v20 = vadd.f32 %v8795_v17, %v8756_v5  ;;  %v8797_v21 = vpop.f32.mrb[181].mxu0  ;;  %v8837_v22 = vpop.f32.mrb[181].mxu1  ;;  %v13277_v5 = vcombine.high %v3008_v55, %v3200_v56  ;;  %v2771_v17 = vpack.c.bf16 %v15049_v39, %v15049_v39 }
 0x2c4   : > { %v8798_v29 = vpop.f32.mrb[182].mxu0  ;;  %v8838_v30 = vpop.f32.mrb[182].mxu1 }
 0x2c5   : > { %v8836_v34 = vadd.f32 %v8835_v18, %v8796_v20  ;;  %v8799_v35 = vpop.f32.mrb[183].mxu0  ;;  %v8839_v36 = vpop.f32.mrb[183].mxu1  ;;  %v3009_v18 = vld [vmem:[%s13949_s22 + $0x4c0] sm:$0xff]  ;;  %v3202_v20 = vld [vmem:[%s13949_s22 + $0xac8] sm:$0x11]  ;;  %v2774_v30 = vpack.c.bf16 %v1747_v7, %v1747_v7 }
 0x2c6   : > { %v13279_v33 = vcombine.high %v3009_v18, %v3201_v12  ;;  %v342_v35 = vld [vmem:[%s13942_s12 + $0x268] sm:$0xff]  ;;  %v1764_v36 = vcombine.high %v15084_v26, %v15084_v26 }
 0x2c7   : > { %10954 = vmatmul.mubr.bf16.vlgmr.msra.gmra.mrb[32].mxu0 %v2761_v23  ;;  %10994 = vmatmul.mubr.bf16.vlgmr.msra.gmra.mrb[32].mxu1 %v2763_v25  ;;  %v13274_v23 = vcombine.low %v3007_v54, %v3199_v48  ;;  %v13276_v25 = vcombine.low %v3008_v55, %v3200_v56  ;;  %v3012_v48 = vld [vmem:[%s13949_s22 + $0x4d8] sm:$0xff] }
 0x2c8   : > { %11002 = vmatpush1.bf16.xpose.msra.mxu0 %v13266_v31  ;;  %11042 = vmatpush1.bf16.xpose.msra.mxu1 %v13268_v32  ;;  %v2776_v31 = vpack.c.bf16 %v1748_v8, %v1748_v8  ;;  %v15087_v32 = vrot.slane %v1749_v9, %v13970_v24  ;;  %v2778_v54 = vpack.c.bf16 %v1764_v36, %v1764_v36 }
 0x2c9   : > { %11033 = vmatprep.mubr.bf16.mxu0 %v2766_v37  ;;  %11073 = vmatprep.mubr.bf16.mxu1 %v2768_v38  ;;  %v1766_v38 = vcombine.high %v342_v35, %v342_v35  ;;  %v2777_v9 = vpack.c.bf16 %v15084_v26, %v15084_v26 }
 0x2ca   : > { %v8875_v46 = vpop.f32.mrb[184].mxu0  ;;  %v8915_v47 = vpop.f32.mrb[184].mxu1  ;;  %11081 = vmatprep.subr.bf16.mxu0 %v13271_v40  ;;  %11121 = vmatprep.subr.bf16.mxu1 %v13273_v41  ;;  %v1765_v37 = vcombine.high %v15087_v32, %v15087_v32  ;;  %v3203_v41 = vld [vmem:[%s13949_s22 + $0xad0] sm:$0x11] }
 0x2cb   : > { %v8876_v49 = vadd.f32 %v8875_v46, %v8836_v34  ;;  %v8877_v50 = vpop.f32.mrb[185].mxu0  ;;  %v8917_v51 = vpop.f32.mrb[185].mxu1  ;;  %v13281_v34 = vcombine.high %v3010_v19, %v3202_v20  ;;  %v2775_v46 = vpack.c.bf16 %v15068_v3, %v15068_v3 }
 0x2cc   : > { %v8878_v57 = vpop.f32.mrb[186].mxu0  ;;  %v8918_v58 = vpop.f32.mrb[186].mxu1 }
 0x2cd   : > { %v8916_v62 = vadd.f32 %v8915_v47, %v8876_v49  ;;  %v8879_v63 = vpop.f32.mrb[187].mxu0  ;;  %v8919_v0 = vpop.f32.mrb[187].mxu1  ;;  %v3011_v47 = vld [vmem:[%s13949_s22 + $0x4d0] sm:$0xff]  ;;  %v3204_v49 = vld [vmem:[%s13949_s22 + $0xad8] sm:$0x11]  ;;  %v2780_v58 = vpack.c.bf16 %v1765_v37, %v1765_v37 }
 0x2ce   : > { %v343_v63 = vld [vmem:[%s13942_s12 + $0x270] sm:$0xff] }
 0x2cf   : > { %11034 = vmatmul.mubr.bf16.vlgmr.msra.gmra.mrb[36].mxu0 %v2765_v52  ;;  %11074 = vmatmul.mubr.bf16.vlgmr.msra.gmra.mrb[36].mxu1 %v2767_v53  ;;  %v13278_v52 = vcombine.low %v3009_v18, %v3201_v12  ;;  %v13280_v53 = vcombine.low %v3010_v19, %v3202_v20  ;;  %v1783_v2 = vcombine.high %v343_v63, %v343_v63  ;;  %v3014_v12 = vld [vmem:[%s13949_s22 + $0x4e8] sm:$0xff] }
 0x2d0   : > { %11082 = vmatpush1.bf16.xpose.msra.mxu0 %v13270_v59  ;;  %11122 = vmatpush1.bf16.xpose.msra.mxu1 %v13272_v60  ;;  %v15103_v59 = vrot.slane %v342_v35, %v13970_v24  ;;  %v15106_v60 = vrot.slane %v1766_v38, %v13970_v24  ;;  %v15122_v18 = vrot.slane %v343_v63, %v13970_v24 }
 0x2d1   : > { %11113 = vmatprep.mubr.bf16.mxu0 %v2770_v61  ;;  %11153 = vmatprep.mubr.bf16.mxu1 %v2772_v1  ;;  %v13283_v61 = vcombine.high %v3011_v47, %v3203_v41 }
 0x2d2   : > { %v8955_v10 = vpop.f32.mrb[188].mxu0  ;;  %v8995_v11 = vpop.f32.mrb[188].mxu1  ;;  %11161 = vmatprep.subr.bf16.mxu0 %v13275_v4  ;;  %11201 = vmatprep.subr.bf16.mxu1 %v13277_v5  ;;  %v1781_v0 = vcombine.high %v15103_v59, %v15103_v59  ;;  %v1782_v1 = vcombine.high %v15106_v60, %v15106_v60  ;;  %v3205_v5 = vld [vmem:[%s13949_s22 + $0xae0] sm:$0x11]  ;;  %v2781_v38 = vpack.c.bf16 %v15103_v59, %v15103_v59 }
 0x2d3   : > { %v8956_v13 = vadd.f32 %v8955_v10, %v8916_v62  ;;  %v8957_v14 = vpop.f32.mrb[189].mxu0  ;;  %v8997_v15 = vpop.f32.mrb[189].mxu1  ;;  %v13285_v62 = vcombine.high %v3012_v48, %v3204_v49  ;;  %v2779_v10 = vpack.c.bf16 %v15087_v32, %v15087_v32 }
 0x2d4   : > { %v8958_v21 = vpop.f32.mrb[190].mxu0  ;;  %v8998_v22 = vpop.f32.mrb[190].mxu1 }
 0x2d5   : > { %v8996_v27 = vadd.f32 %v8995_v11, %v8956_v13  ;;  %v8959_v28 = vpop.f32.mrb[191].mxu0  ;;  %v8999_v29 = vpop.f32.mrb[191].mxu1  ;;  %v3013_v11 = vld [vmem:[%s13949_s22 + $0x4e0] sm:$0xff]  ;;  %v3206_v13 = vld [vmem:[%s13949_s22 + $0xae8] sm:$0x11]  ;;  %v2782_v22 = vpack.c.bf16 %v1781_v0, %v1781_v0 }
 0x2d6   : > { %v13287_v26 = vcombine.high %v3013_v11, %v3205_v5  ;;  %v344_v28 = vld [vmem:[%s13942_s12 + $0x278] sm:$0xff]  ;;  %v1798_v29 = vcombine.high %v15122_v18, %v15122_v18 }
 0x2d7   : > { %11114 = vmatmul.mubr.bf16.vlgmr.msra.gmra.mrb[40].mxu0 %v2769_v16  ;;  %11154 = vmatmul.mubr.bf16.vlgmr.msra.gmra.mrb[40].mxu1 %v2771_v17  ;;  %v13282_v16 = vcombine.low %v3011_v47, %v3203_v41  ;;  %v13284_v17 = vcombine.low %v3012_v48, %v3204_v49  ;;  %v3016_v41 = vld [vmem:[%s13949_s22 + $0x4f8] sm:$0xff] }
 0x2d8   : > { %11162 = vmatpush1.bf16.xpose.msra.mxu0 %v13274_v23  ;;  %11202 = vmatpush1.bf16.xpose.msra.mxu1 %v13276_v25  ;;  %v2784_v23 = vpack.c.bf16 %v1782_v1, %v1782_v1  ;;  %v15125_v25 = vrot.slane %v1783_v2, %v13970_v24  ;;  %v2786_v47 = vpack.c.bf16 %v1798_v29, %v1798_v29 }
 0x2d9   : > { %11193 = vmatprep.mubr.bf16.mxu0 %v2774_v30  ;;  %11233 = vmatprep.mubr.bf16.mxu1 %v2776_v31  ;;  %v1800_v31 = vcombine.high %v344_v28, %v344_v28  ;;  %v2785_v2 = vpack.c.bf16 %v15122_v18, %v15122_v18 }
 0x2da   : > { %v9035_v39 = vpop.f32.mrb[192].mxu0  ;;  %v9075_v40 = vpop.f32.mrb[192].mxu1  ;;  %11241 = vmatprep.subr.bf16.mxu0 %v13279_v33  ;;  %11281 = vmatprep.subr.bf16.mxu1 %v13281_v34  ;;  %v1799_v30 = vcombine.high %v15125_v25, %v15125_v25  ;;  %v3207_v34 = vld [vmem:[%s13949_s22 + $0xaf0] sm:$0x11] }
 0x2db   : > { %v9036_v42 = vadd.f32 %v9035_v39, %v8996_v27  ;;  %v9037_v43 = vpop.f32.mrb[193].mxu0  ;;  %v9077_v44 = vpop.f32.mrb[193].mxu1  ;;  %v13289_v27 = vcombine.high %v3014_v12, %v3206_v13  ;;  %v2783_v39 = vpack.c.bf16 %v15106_v60, %v15106_v60 }
 0x2dc   : > { %v9038_v50 = vpop.f32.mrb[194].mxu0  ;;  %v9078_v51 = vpop.f32.mrb[194].mxu1 }
 0x2dd   : > { %v9076_v55 = vadd.f32 %v9075_v40, %v9036_v42  ;;  %v9039_v56 = vpop.f32.mrb[195].mxu0  ;;  %v9079_v57 = vpop.f32.mrb[195].mxu1  ;;  %v3015_v40 = vld [vmem:[%s13949_s22 + $0x4f0] sm:$0xff]  ;;  %v3208_v42 = vld [vmem:[%s13949_s22 + $0xaf8] sm:$0x11]  ;;  %v2788_v51 = vpack.c.bf16 %v1799_v30, %v1799_v30 }
 0x2de   : > { %v345_v56 = vld [vmem:[%s13942_s12 + $0x280] sm:$0xff] }
 0x2df   : > { %11194 = vmatmul.mubr.bf16.vlgmr.msra.gmra.mrb[44].mxu0 %v2773_v45  ;;  %11234 = vmatmul.mubr.bf16.vlgmr.msra.gmra.mrb[44].mxu1 %v2775_v46  ;;  %v13286_v45 = vcombine.low %v3013_v11, %v3205_v5  ;;  %v13288_v46 = vcombine.low %v3014_v12, %v3206_v13  ;;  %v1817_v59 = vcombine.high %v345_v56, %v345_v56  ;;  %v3018_v5 = vld [vmem:[%s13949_s22 + $0x508] sm:$0xff] }
 0x2e0   : > { %11242 = vmatpush1.bf16.xpose.msra.mxu0 %v13278_v52  ;;  %11282 = vmatpush1.bf16.xpose.msra.mxu1 %v13280_v53  ;;  %v15141_v52 = vrot.slane %v344_v28, %v13970_v24  ;;  %v15144_v53 = vrot.slane %v1800_v31, %v13970_v24  ;;  %v15160_v11 = vrot.slane %v345_v56, %v13970_v24 }
 0x2e1   : > { %11273 = vmatprep.mubr.bf16.mxu0 %v2778_v54  ;;  %11313 = vmatprep.mubr.bf16.mxu1 %v2780_v58  ;;  %v13291_v54 = vcombine.high %v3015_v40, %v3207_v34 }
 0x2e2   : > { %v9115_v3 = vpop.f32.mrb[196].mxu0  ;;  %v9155_v4 = vpop.f32.mrb[196].mxu1  ;;  %11321 = vmatprep.subr.bf16.mxu0 %v13283_v61  ;;  %11361 = vmatprep.subr.bf16.mxu1 %v13285_v62  ;;  %v1815_v57 = vcombine.high %v15141_v52, %v15141_v52  ;;  %v1816_v58 = vcombine.high %v15144_v53, %v15144_v53  ;;  %v3209_v62 = vld [vmem:[%s13949_s22 + $0xb00] sm:$0x11]  ;;  %v2789_v31 = vpack.c.bf16 %v15141_v52, %v15141_v52 }
 0x2e3   : > { %v9116_v6 = vadd.f32 %v9115_v3, %v9076_v55  ;;  %v9117_v7 = vpop.f32.mrb[197].mxu0  ;;  %v9157_v8 = vpop.f32.mrb[197].mxu1  ;;  %v13293_v55 = vcombine.high %v3016_v41, %v3208_v42  ;;  %v2787_v3 = vpack.c.bf16 %v15125_v25, %v15125_v25 }
 0x2e4   : > { %v9118_v14 = vpop.f32.mrb[198].mxu0  ;;  %v9158_v15 = vpop.f32.mrb[198].mxu1 }
 0x2e5   : > { %v9156_v19 = vadd.f32 %v9155_v4, %v9116_v6  ;;  %v9119_v20 = vpop.f32.mrb[199].mxu0  ;;  %v9159_v21 = vpop.f32.mrb[199].mxu1  ;;  %v3017_v4 = vld [vmem:[%s13949_s22 + $0x500] sm:$0xff]  ;;  %v3210_v6 = vld [vmem:[%s13949_s22 + $0xb08] sm:$0x11]  ;;  %v2790_v15 = vpack.c.bf16 %v1815_v57, %v1815_v57 }
 0x2e6   : > { %v13295_v18 = vcombine.high %v3017_v4, %v3209_v62  ;;  %v346_v20 = vld [vmem:[%s13942_s12 + $0x288] sm:$0xff]  ;;  %v1832_v21 = vcombine.high %v15160_v11, %v15160_v11 }
 0x2e7   : > { %11274 = vmatmul.mubr.bf16.vlgmr.msra.gmra.mrb[48].mxu0 %v2777_v9  ;;  %11314 = vmatmul.mubr.bf16.vlgmr.msra.gmra.mrb[48].mxu1 %v2779_v10  ;;  %v13290_v9 = vcombine.low %v3015_v40, %v3207_v34  ;;  %v13292_v10 = vcombine.low %v3016_v41, %v3208_v42  ;;  %v3020_v34 = vld [vmem:[%s13949_s22 + $0x518] sm:$0xff] }
 0x2e8   : > { %11322 = vmatpush1.bf16.xpose.msra.mxu0 %v13282_v16  ;;  %11362 = vmatpush1.bf16.xpose.msra.mxu1 %v13284_v17  ;;  %v2792_v16 = vpack.c.bf16 %v1816_v58, %v1816_v58  ;;  %v15163_v17 = vrot.slane %v1817_v59, %v13970_v24  ;;  %v2794_v40 = vpack.c.bf16 %v1832_v21, %v1832_v21 }
 0x2e9   : > { %11353 = vmatprep.mubr.bf16.mxu0 %v2782_v22  ;;  %11393 = vmatprep.mubr.bf16.mxu1 %v2784_v23  ;;  %v1834_v23 = vcombine.high %v346_v20, %v346_v20  ;;  %v2793_v59 = vpack.c.bf16 %v15160_v11, %v15160_v11 }
 0x2ea   : > { %v9195_v32 = vpop.f32.mrb[200].mxu0  ;;  %v9235_v33 = vpop.f32.mrb[200].mxu1  ;;  %11401 = vmatprep.subr.bf16.mxu0 %v13287_v26  ;;  %11441 = vmatprep.subr.bf16.mxu1 %v13289_v27  ;;  %v1833_v22 = vcombine.high %v15163_v17, %v15163_v17  ;;  %v3211_v27 = vld [vmem:[%s13949_s22 + $0xb10] sm:$0x11] }
 0x2eb   : > { %v9196_v35 = vadd.f32 %v9195_v32, %v9156_v19  ;;  %v9197_v36 = vpop.f32.mrb[201].mxu0  ;;  %v9237_v37 = vpop.f32.mrb[201].mxu1  ;;  %v13297_v19 = vcombine.high %v3018_v5, %v3210_v6  ;;  %v2791_v32 = vpack.c.bf16 %v15144_v53, %v15144_v53 }
 0x2ec   : > { %v9198_v43 = vpop.f32.mrb[202].mxu0  ;;  %v9238_v44 = vpop.f32.mrb[202].mxu1 }
 0x2ed   : > { %v9236_v48 = vadd.f32 %v9235_v33, %v9196_v35  ;;  %v9199_v49 = vpop.f32.mrb[203].mxu0  ;;  %v9239_v50 = vpop.f32.mrb[203].mxu1  ;;  %v3019_v33 = vld [vmem:[%s13949_s22 + $0x510] sm:$0xff]  ;;  %v3212_v35 = vld [vmem:[%s13949_s22 + $0xb18] sm:$0x11]  ;;  %v2796_v44 = vpack.c.bf16 %v1833_v22, %v1833_v22 }
 0x2ee   : > { %v347_v49 = vld [vmem:[%s13942_s12 + $0x290] sm:$0xff] }
 0x2ef   : > { %11354 = vmatmul.mubr.bf16.vlgmr.msra.gmra.mrb[52].mxu0 %v2781_v38  ;;  %11394 = vmatmul.mubr.bf16.vlgmr.msra.gmra.mrb[52].mxu1 %v2783_v39  ;;  %v13294_v38 = vcombine.low %v3017_v4, %v3209_v62  ;;  %v13296_v39 = vcombine.low %v3018_v5, %v3210_v6  ;;  %v1851_v52 = vcombine.high %v347_v49, %v347_v49  ;;  %v3022_v62 = vld [vmem:[%s13949_s22 + $0x528] sm:$0xff] }
 0x2f0   : > { %11402 = vmatpush1.bf16.xpose.msra.mxu0 %v13286_v45  ;;  %11442 = vmatpush1.bf16.xpose.msra.mxu1 %v13288_v46  ;;  %v15179_v45 = vrot.slane %v346_v20, %v13970_v24  ;;  %v15182_v46 = vrot.slane %v1834_v23, %v13970_v24  ;;  %v15198_v4 = vrot.slane %v347_v49, %v13970_v24 }
 0x2f1   : > { %11433 = vmatprep.mubr.bf16.mxu0 %v2786_v47  ;;  %11473 = vmatprep.mubr.bf16.mxu1 %v2788_v51  ;;  %v13299_v47 = vcombine.high %v3019_v33, %v3211_v27 }
 0x2f2   : > { %v9275_v60 = vpop.f32.mrb[204].mxu0  ;;  %v9315_v61 = vpop.f32.mrb[204].mxu1  ;;  %11481 = vmatprep.subr.bf16.mxu0 %v13291_v54  ;;  %11521 = vmatprep.subr.bf16.mxu1 %v13293_v55  ;;  %v1849_v50 = vcombine.high %v15179_v45, %v15179_v45  ;;  %v1850_v51 = vcombine.high %v15182_v46, %v15182_v46  ;;  %v3213_v55 = vld [vmem:[%s13949_s22 + $0xb20] sm:$0x11]  ;;  %v2797_v23 = vpack.c.bf16 %v15179_v45, %v15179_v45 }
 0x2f3   : > { %v9276_v63 = vadd.f32 %v9275_v60, %v9236_v48  ;;  %v9277_v0 = vpop.f32.mrb[205].mxu0  ;;  %v9317_v1 = vpop.f32.mrb[205].mxu1  ;;  %v13301_v48 = vcombine.high %v3020_v34, %v3212_v35  ;;  %v2795_v60 = vpack.c.bf16 %v15163_v17, %v15163_v17 }
 0x2f4   : > { %v9278_v7 = vpop.f32.mrb[206].mxu0  ;;  %v9318_v8 = vpop.f32.mrb[206].mxu1 }
 0x2f5   : > { %v9316_v12 = vadd.f32 %v9315_v61, %v9276_v63  ;;  %v9279_v13 = vpop.f32.mrb[207].mxu0  ;;  %v9319_v14 = vpop.f32.mrb[207].mxu1  ;;  %v3021_v61 = vld [vmem:[%s13949_s22 + $0x520] sm:$0xff]  ;;  %v3214_v63 = vld [vmem:[%s13949_s22 + $0xb28] sm:$0x11]  ;;  %v2798_v8 = vpack.c.bf16 %v1849_v50, %v1849_v50 }
 0x2f6   : > { %v13303_v11 = vcombine.high %v3021_v61, %v3213_v55  ;;  %v348_v13 = vld [vmem:[%s13942_s12 + $0x298] sm:$0xff]  ;;  %v1866_v14 = vcombine.high %v15198_v4, %v15198_v4 }
 0x2f7   : > { %11434 = vmatmul.mubr.bf16.vlgmr.msra.gmra.mrb[56].mxu0 %v2785_v2  ;;  %11474 = vmatmul.mubr.bf16.vlgmr.msra.gmra.mrb[56].mxu1 %v2787_v3  ;;  %v13298_v2 = vcombine.low %v3019_v33, %v3211_v27  ;;  %v13300_v3 = vcombine.low %v3020_v34, %v3212_v35  ;;  %v3024_v27 = vld [vmem:[%s13949_s22 + $0x538] sm:$0xff] }
 0x2f8   : > { %11482 = vmatpush1.bf16.xpose.msra.mxu0 %v13290_v9  ;;  %11522 = vmatpush1.bf16.xpose.msra.mxu1 %v13292_v10  ;;  %v2800_v9 = vpack.c.bf16 %v1850_v51, %v1850_v51  ;;  %v15201_v10 = vrot.slane %v1851_v52, %v13970_v24  ;;  %v2802_v33 = vpack.c.bf16 %v1866_v14, %v1866_v14 }
 0x2f9   : > { %11513 = vmatprep.mubr.bf16.mxu0 %v2790_v15  ;;  %11553 = vmatprep.mubr.bf16.mxu1 %v2792_v16  ;;  %v1868_v16 = vcombine.high %v348_v13, %v348_v13  ;;  %v2801_v52 = vpack.c.bf16 %v15198_v4, %v15198_v4 }
 0x2fa   : > { %v9355_v25 = vpop.f32.mrb[208].mxu0  ;;  %v9395_v26 = vpop.f32.mrb[208].mxu1  ;;  %11561 = vmatprep.subr.bf16.mxu0 %v13295_v18  ;;  %11601 = vmatprep.subr.bf16.mxu1 %v13297_v19  ;;  %v1867_v15 = vcombine.high %v15201_v10, %v15201_v10  ;;  %v3215_v19 = vld [vmem:[%s13949_s22 + $0xb30] sm:$0x11] }
 0x2fb   : > { %v9356_v28 = vadd.f32 %v9355_v25, %v9316_v12  ;;  %v9357_v29 = vpop.f32.mrb[209].mxu0  ;;  %v9397_v30 = vpop.f32.mrb[209].mxu1  ;;  %v13305_v12 = vcombine.high %v3022_v62, %v3214_v63  ;;  %v2799_v25 = vpack.c.bf16 %v15182_v46, %v15182_v46 }
 0x2fc   : > { %v9358_v36 = vpop.f32.mrb[210].mxu0  ;;  %v9398_v37 = vpop.f32.mrb[210].mxu1 }
 0x2fd   : > { %v9396_v41 = vadd.f32 %v9395_v26, %v9356_v28  ;;  %v9359_v42 = vpop.f32.mrb[211].mxu0  ;;  %v9399_v43 = vpop.f32.mrb[211].mxu1  ;;  %v3023_v26 = vld [vmem:[%s13949_s22 + $0x530] sm:$0xff]  ;;  %v3216_v28 = vld [vmem:[%s13949_s22 + $0xb38] sm:$0x11]  ;;  %v2804_v37 = vpack.c.bf16 %v1867_v15, %v1867_v15 }
 0x2fe   : > { %v349_v42 = vld [vmem:[%s13942_s12 + $0x2a0] sm:$0xff] }
 0x2ff   : > { %11514 = vmatmul.mubr.bf16.vlgmr.msra.gmra.mrb[60].mxu0 %v2789_v31  ;;  %11554 = vmatmul.mubr.bf16.vlgmr.msra.gmra.mrb[60].mxu1 %v2791_v32  ;;  %v13302_v31 = vcombine.low %v3021_v61, %v3213_v55  ;;  %v13304_v32 = vcombine.low %v3022_v62, %v3214_v63  ;;  %v1885_v45 = vcombine.high %v349_v42, %v349_v42  ;;  %v3026_v55 = vld [vmem:[%s13949_s22 + $0x548] sm:$0xff] }
 0x300   : > { %11562 = vmatpush1.bf16.xpose.msra.mxu0 %v13294_v38  ;;  %11602 = vmatpush1.bf16.xpose.msra.mxu1 %v13296_v39  ;;  %v15217_v38 = vrot.slane %v348_v13, %v13970_v24  ;;  %v15220_v39 = vrot.slane %v1868_v16, %v13970_v24  ;;  %v15236_v61 = vrot.slane %v349_v42, %v13970_v24 }
 0x301   : > { %11593 = vmatprep.mubr.bf16.mxu0 %v2794_v40  ;;  %11633 = vmatprep.mubr.bf16.mxu1 %v2796_v44  ;;  %v13307_v40 = vcombine.high %v3023_v26, %v3215_v19 }
 0x302   : > { %v9435_v53 = vpop.f32.mrb[212].mxu0  ;;  %v9475_v54 = vpop.f32.mrb[212].mxu1  ;;  %11641 = vmatprep.subr.bf16.mxu0 %v13299_v47  ;;  %11681 = vmatprep.subr.bf16.mxu1 %v13301_v48  ;;  %v1883_v43 = vcombine.high %v15217_v38, %v15217_v38  ;;  %v1884_v44 = vcombine.high %v15220_v39, %v15220_v39  ;;  %v3217_v48 = vld [vmem:[%s13949_s22 + $0xb40] sm:$0x11]  ;;  %v2805_v16 = vpack.c.bf16 %v15217_v38, %v15217_v38 }
 0x303   : > { %v9436_v56 = vadd.f32 %v9435_v53, %v9396_v41  ;;  %v9437_v57 = vpop.f32.mrb[213].mxu0  ;;  %v9477_v58 = vpop.f32.mrb[213].mxu1  ;;  %v13309_v41 = vcombine.high %v3024_v27, %v3216_v28  ;;  %v2803_v53 = vpack.c.bf16 %v15201_v10, %v15201_v10 }
 0x304   : > { %v9438_v0 = vpop.f32.mrb[214].mxu0  ;;  %v9478_v1 = vpop.f32.mrb[214].mxu1 }
 0x305   : > { %v9476_v5 = vadd.f32 %v9475_v54, %v9436_v56  ;;  %v9439_v6 = vpop.f32.mrb[215].mxu0  ;;  %v9479_v7 = vpop.f32.mrb[215].mxu1  ;;  %v3025_v54 = vld [vmem:[%s13949_s22 + $0x540] sm:$0xff]  ;;  %v3218_v56 = vld [vmem:[%s13949_s22 + $0xb48] sm:$0x11]  ;;  %v2806_v1 = vpack.c.bf16 %v1883_v43, %v1883_v43 }
 0x306   : > { %v13311_v4 = vcombine.high %v3025_v54, %v3217_v48  ;;  %v350_v6 = vld [vmem:[%s13942_s12 + $0x2a8] sm:$0xff]  ;;  %v1900_v7 = vcombine.high %v15236_v61, %v15236_v61 }
 0x307   : > { %11594 = vmatmul.mubr.bf16.vlgmr.msra.gmra.mrb[64].mxu0 %v2793_v59  ;;  %11634 = vmatmul.mubr.bf16.vlgmr.msra.gmra.mrb[64].mxu1 %v2795_v60  ;;  %v13306_v59 = vcombine.low %v3023_v26, %v3215_v19  ;;  %v13308_v60 = vcombine.low %v3024_v27, %v3216_v28  ;;  %v3028_v19 = vld [vmem:[%s13949_s22 + $0x558] sm:$0xff] }
 0x308   : > { %11642 = vmatpush1.bf16.xpose.msra.mxu0 %v13298_v2  ;;  %11682 = vmatpush1.bf16.xpose.msra.mxu1 %v13300_v3  ;;  %v2808_v2 = vpack.c.bf16 %v1884_v44, %v1884_v44  ;;  %v15239_v3 = vrot.slane %v1885_v45, %v13970_v24  ;;  %v2810_v26 = vpack.c.bf16 %v1900_v7, %v1900_v7 }
 0x309   : > { %11673 = vmatprep.mubr.bf16.mxu0 %v2798_v8  ;;  %11713 = vmatprep.mubr.bf16.mxu1 %v2800_v9  ;;  %v1902_v9 = vcombine.high %v350_v6, %v350_v6  ;;  %v2809_v45 = vpack.c.bf16 %v15236_v61, %v15236_v61 }
 0x30a   : > { %v9515_v17 = vpop.f32.mrb[216].mxu0  ;;  %v9555_v18 = vpop.f32.mrb[216].mxu1  ;;  %11721 = vmatprep.subr.bf16.mxu0 %v13303_v11  ;;  %11761 = vmatprep.subr.bf16.mxu1 %v13305_v12  ;;  %v1901_v8 = vcombine.high %v15239_v3, %v15239_v3  ;;  %v3219_v12 = vld [vmem:[%s13949_s22 + $0xb50] sm:$0x11] }
 0x30b   : > { %v9516_v20 = vadd.f32 %v9515_v17, %v9476_v5  ;;  %v9517_v21 = vpop.f32.mrb[217].mxu0  ;;  %v9557_v22 = vpop.f32.mrb[217].mxu1  ;;  %v13313_v5 = vcombine.high %v3026_v55, %v3218_v56  ;;  %v2807_v17 = vpack.c.bf16 %v15220_v39, %v15220_v39 }
 0x30c   : > { %v9518_v29 = vpop.f32.mrb[218].mxu0  ;;  %v9558_v30 = vpop.f32.mrb[218].mxu1 }
 0x30d   : > { %v9556_v34 = vadd.f32 %v9555_v18, %v9516_v20  ;;  %v9519_v35 = vpop.f32.mrb[219].mxu0  ;;  %v9559_v36 = vpop.f32.mrb[219].mxu1  ;;  %v3027_v18 = vld [vmem:[%s13949_s22 + $0x550] sm:$0xff]  ;;  %v3220_v20 = vld [vmem:[%s13949_s22 + $0xb58] sm:$0x11]  ;;  %v2812_v30 = vpack.c.bf16 %v1901_v8, %v1901_v8 }
 0x30e   : > { %v351_v35 = vld [vmem:[%s13942_s12 + $0x2b0] sm:$0xff] }
 0x30f   : > { %11674 = vmatmul.mubr.bf16.vlgmr.msra.gmra.mrb[68].mxu0 %v2797_v23  ;;  %11714 = vmatmul.mubr.bf16.vlgmr.msra.gmra.mrb[68].mxu1 %v2799_v25  ;;  %v13310_v23 = vcombine.low %v3025_v54, %v3217_v48  ;;  %v13312_v25 = vcombine.low %v3026_v55, %v3218_v56  ;;  %v1919_v38 = vcombine.high %v351_v35, %v351_v35  ;;  %v3030_v48 = vld [vmem:[%s13949_s22 + $0x568] sm:$0xff] }
 0x310   : > { %11722 = vmatpush1.bf16.xpose.msra.mxu0 %v13302_v31  ;;  %11762 = vmatpush1.bf16.xpose.msra.mxu1 %v13304_v32  ;;  %v15255_v31 = vrot.slane %v350_v6, %v13970_v24  ;;  %v15258_v32 = vrot.slane %v1902_v9, %v13970_v24  ;;  %v15274_v54 = vrot.slane %v351_v35, %v13970_v24 }
 0x311   : > { %11753 = vmatprep.mubr.bf16.mxu0 %v2802_v33  ;;  %11793 = vmatprep.mubr.bf16.mxu1 %v2804_v37  ;;  %v13315_v33 = vcombine.high %v3027_v18, %v3219_v12 }
 0x312   : > { %v9595_v46 = vpop.f32.mrb[220].mxu0  ;;  %v9635_v47 = vpop.f32.mrb[220].mxu1  ;;  %11801 = vmatprep.subr.bf16.mxu0 %v13307_v40  ;;  %11841 = vmatprep.subr.bf16.mxu1 %v13309_v41  ;;  %v1917_v36 = vcombine.high %v15255_v31, %v15255_v31  ;;  %v1918_v37 = vcombine.high %v15258_v32, %v15258_v32  ;;  %v3221_v41 = vld [vmem:[%s13949_s22 + $0xb60] sm:$0x11]  ;;  %v2813_v9 = vpack.c.bf16 %v15255_v31, %v15255_v31 }
 0x313   : > { %v9596_v49 = vadd.f32 %v9595_v46, %v9556_v34  ;;  %v9597_v50 = vpop.f32.mrb[221].mxu0  ;;  %v9637_v51 = vpop.f32.mrb[221].mxu1  ;;  %v13317_v34 = vcombine.high %v3028_v19, %v3220_v20  ;;  %v2811_v46 = vpack.c.bf16 %v15239_v3, %v15239_v3 }
 0x314   : > { %v9598_v57 = vpop.f32.mrb[222].mxu0  ;;  %v9638_v58 = vpop.f32.mrb[222].mxu1 }
 0x315   : > { %v9636_v62 = vadd.f32 %v9635_v47, %v9596_v49  ;;  %v9599_v63 = vpop.f32.mrb[223].mxu0  ;;  %v9639_v0 = vpop.f32.mrb[223].mxu1  ;;  %v3029_v47 = vld [vmem:[%s13949_s22 + $0x560] sm:$0xff]  ;;  %v3222_v49 = vld [vmem:[%s13949_s22 + $0xb68] sm:$0x11]  ;;  %v2814_v58 = vpack.c.bf16 %v1917_v36, %v1917_v36 }
 0x316   : > { %v13319_v61 = vcombine.high %v3029_v47, %v3221_v41  ;;  %v352_v63 = vld [vmem:[%s13942_s12 + $0x2b8] sm:$0xff]  ;;  %v1934_v0 = vcombine.high %v15274_v54, %v15274_v54 }
 0x317   : > { %11754 = vmatmul.mubr.bf16.vlgmr.msra.gmra.mrb[72].mxu0 %v2801_v52  ;;  %11794 = vmatmul.mubr.bf16.vlgmr.msra.gmra.mrb[72].mxu1 %v2803_v53  ;;  %v13314_v52 = vcombine.low %v3027_v18, %v3219_v12  ;;  %v13316_v53 = vcombine.low %v3028_v19, %v3220_v20  ;;  %v3032_v12 = vld [vmem:[%s13949_s22 + $0x578] sm:$0xff] }
 0x318   : > { %11802 = vmatpush1.bf16.xpose.msra.mxu0 %v13306_v59  ;;  %11842 = vmatpush1.bf16.xpose.msra.mxu1 %v13308_v60  ;;  %v2816_v59 = vpack.c.bf16 %v1918_v37, %v1918_v37  ;;  %v15277_v60 = vrot.slane %v1919_v38, %v13970_v24  ;;  %v2818_v18 = vpack.c.bf16 %v1934_v0, %v1934_v0 }
 0x319   : > { %11833 = vmatprep.mubr.bf16.mxu0 %v2806_v1  ;;  %11873 = vmatprep.mubr.bf16.mxu1 %v2808_v2  ;;  %v1936_v2 = vcombine.high %v352_v63, %v352_v63  ;;  %v2817_v38 = vpack.c.bf16 %v15274_v54, %v15274_v54 }
 0x31a   : > { %v9675_v10 = vpop.f32.mrb[224].mxu0  ;;  %v9715_v11 = vpop.f32.mrb[224].mxu1  ;;  %11881 = vmatprep.subr.bf16.mxu0 %v13311_v4  ;;  %11921 = vmatprep.subr.bf16.mxu1 %v13313_v5  ;;  %v1935_v1 = vcombine.high %v15277_v60, %v15277_v60  ;;  %v3223_v5 = vld [vmem:[%s13949_s22 + $0xb70] sm:$0x11] }
 0x31b   : > { %v9676_v13 = vadd.f32 %v9675_v10, %v9636_v62  ;;  %v9677_v14 = vpop.f32.mrb[225].mxu0  ;;  %v9717_v15 = vpop.f32.mrb[225].mxu1  ;;  %v13321_v62 = vcombine.high %v3030_v48, %v3222_v49  ;;  %v2815_v10 = vpack.c.bf16 %v15258_v32, %v15258_v32 }
 0x31c   : > { %v9678_v21 = vpop.f32.mrb[226].mxu0  ;;  %v9718_v22 = vpop.f32.mrb[226].mxu1 }
 0x31d   : > { %v9716_v27 = vadd.f32 %v9715_v11, %v9676_v13  ;;  %v9679_v28 = vpop.f32.mrb[227].mxu0  ;;  %v9719_v29 = vpop.f32.mrb[227].mxu1  ;;  %v3031_v11 = vld [vmem:[%s13949_s22 + $0x570] sm:$0xff]  ;;  %v3224_v13 = vld [vmem:[%s13949_s22 + $0xb78] sm:$0x11]  ;;  %v2820_v22 = vpack.c.bf16 %v1935_v1, %v1935_v1 }
 0x31e   : > { %v353_v28 = vld [vmem:[%s13942_s12 + $0x2c0] sm:$0xff] }
 0x31f   : > { %11834 = vmatmul.mubr.bf16.vlgmr.msra.gmra.mrb[76].mxu0 %v2805_v16  ;;  %11874 = vmatmul.mubr.bf16.vlgmr.msra.gmra.mrb[76].mxu1 %v2807_v17  ;;  %v13318_v16 = vcombine.low %v3029_v47, %v3221_v41  ;;  %v13320_v17 = vcombine.low %v3030_v48, %v3222_v49  ;;  %v1953_v31 = vcombine.high %v353_v28, %v353_v28  ;;  %v3034_v41 = vld [vmem:[%s13949_s22 + $0x588] sm:$0xff] }
 0x320   : > { %11882 = vmatpush1.bf16.xpose.msra.mxu0 %v13310_v23  ;;  %11922 = vmatpush1.bf16.xpose.msra.mxu1 %v13312_v25  ;;  %v15293_v23 = vrot.slane %v352_v63, %v13970_v24  ;;  %v15296_v25 = vrot.slane %v1936_v2, %v13970_v24  ;;  %v15312_v47 = vrot.slane %v353_v28, %v13970_v24 }
 0x321   : > { %11913 = vmatprep.mubr.bf16.mxu0 %v2810_v26  ;;  %11953 = vmatprep.mubr.bf16.mxu1 %v2812_v30  ;;  %v13323_v26 = vcombine.high %v3031_v11, %v3223_v5 }
 0x322   : > { %v9755_v39 = vpop.f32.mrb[228].mxu0  ;;  %v9795_v40 = vpop.f32.mrb[228].mxu1  ;;  %11961 = vmatprep.subr.bf16.mxu0 %v13315_v33  ;;  %12001 = vmatprep.subr.bf16.mxu1 %v13317_v34  ;;  %v1951_v29 = vcombine.high %v15293_v23, %v15293_v23  ;;  %v1952_v30 = vcombine.high %v15296_v25, %v15296_v25  ;;  %v3225_v34 = vld [vmem:[%s13949_s22 + $0xb80] sm:$0x11]  ;;  %v2821_v2 = vpack.c.bf16 %v15293_v23, %v15293_v23 }
 0x323   : > { %v9756_v42 = vadd.f32 %v9755_v39, %v9716_v27  ;;  %v9757_v43 = vpop.f32.mrb[229].mxu0  ;;  %v9797_v44 = vpop.f32.mrb[229].mxu1  ;;  %v13325_v27 = vcombine.high %v3032_v12, %v3224_v13  ;;  %v2819_v39 = vpack.c.bf16 %v15277_v60, %v15277_v60 }
 0x324   : > { %v9758_v50 = vpop.f32.mrb[230].mxu0  ;;  %v9798_v51 = vpop.f32.mrb[230].mxu1 }
 0x325   : > { %v9796_v55 = vadd.f32 %v9795_v40, %v9756_v42  ;;  %v9759_v56 = vpop.f32.mrb[231].mxu0  ;;  %v9799_v57 = vpop.f32.mrb[231].mxu1  ;;  %v3033_v40 = vld [vmem:[%s13949_s22 + $0x580] sm:$0xff]  ;;  %v3226_v42 = vld [vmem:[%s13949_s22 + $0xb88] sm:$0x11]  ;;  %v2822_v51 = vpack.c.bf16 %v1951_v29, %v1951_v29 }
 0x326   : > { %v13327_v54 = vcombine.high %v3033_v40, %v3225_v34  ;;  %v354_v56 = vld [vmem:[%s13942_s12 + $0x2c8] sm:$0xff]  ;;  %v1968_v57 = vcombine.high %v15312_v47, %v15312_v47 }
 0x327   : > { %11914 = vmatmul.mubr.bf16.vlgmr.msra.gmra.mrb[80].mxu0 %v2809_v45  ;;  %11954 = vmatmul.mubr.bf16.vlgmr.msra.gmra.mrb[80].mxu1 %v2811_v46  ;;  %v13322_v45 = vcombine.low %v3031_v11, %v3223_v5  ;;  %v13324_v46 = vcombine.low %v3032_v12, %v3224_v13  ;;  %v3036_v5 = vld [vmem:[%s13949_s22 + $0x598] sm:$0xff] }
 0x328   : > { %11962 = vmatpush1.bf16.xpose.msra.mxu0 %v13314_v52  ;;  %12002 = vmatpush1.bf16.xpose.msra.mxu1 %v13316_v53  ;;  %v2824_v52 = vpack.c.bf16 %v1952_v30, %v1952_v30  ;;  %v15315_v53 = vrot.slane %v1953_v31, %v13970_v24  ;;  %v2826_v11 = vpack.c.bf16 %v1968_v57, %v1968_v57 }
 0x329   : > { %11993 = vmatprep.mubr.bf16.mxu0 %v2814_v58  ;;  %12033 = vmatprep.mubr.bf16.mxu1 %v2816_v59  ;;  %v1970_v59 = vcombine.high %v354_v56, %v354_v56  ;;  %v2825_v31 = vpack.c.bf16 %v15312_v47, %v15312_v47 }
 0x32a   : > { %v9835_v3 = vpop.f32.mrb[232].mxu0  ;;  %v9875_v4 = vpop.f32.mrb[232].mxu1  ;;  %12041 = vmatprep.subr.bf16.mxu0 %v13319_v61  ;;  %12081 = vmatprep.subr.bf16.mxu1 %v13321_v62  ;;  %v1969_v58 = vcombine.high %v15315_v53, %v15315_v53  ;;  %v3227_v62 = vld [vmem:[%s13949_s22 + $0xb90] sm:$0x11] }
 0x32b   : > { %v9836_v6 = vadd.f32 %v9835_v3, %v9796_v55  ;;  %v9837_v7 = vpop.f32.mrb[233].mxu0  ;;  %v9877_v8 = vpop.f32.mrb[233].mxu1  ;;  %v13329_v55 = vcombine.high %v3034_v41, %v3226_v42  ;;  %v2823_v3 = vpack.c.bf16 %v15296_v25, %v15296_v25 }
 0x32c   : > { %v9838_v14 = vpop.f32.mrb[234].mxu0  ;;  %v9878_v15 = vpop.f32.mrb[234].mxu1 }
 0x32d   : > { %v9876_v19 = vadd.f32 %v9875_v4, %v9836_v6  ;;  %v9839_v20 = vpop.f32.mrb[235].mxu0  ;;  %v9879_v21 = vpop.f32.mrb[235].mxu1  ;;  %v3035_v4 = vld [vmem:[%s13949_s22 + $0x590] sm:$0xff]  ;;  %v3228_v6 = vld [vmem:[%s13949_s22 + $0xb98] sm:$0x11]  ;;  %v2828_v15 = vpack.c.bf16 %v1969_v58, %v1969_v58 }
 0x32e   : > { %v355_v20 = vld [vmem:[%s13942_s12 + $0x2d0] sm:$0xff] }
 0x32f   : > { %11994 = vmatmul.mubr.bf16.vlgmr.msra.gmra.mrb[84].mxu0 %v2813_v9  ;;  %12034 = vmatmul.mubr.bf16.vlgmr.msra.gmra.mrb[84].mxu1 %v2815_v10  ;;  %v13326_v9 = vcombine.low %v3033_v40, %v3225_v34  ;;  %v13328_v10 = vcombine.low %v3034_v41, %v3226_v42  ;;  %v1987_v23 = vcombine.high %v355_v20, %v355_v20  ;;  %v3038_v34 = vld [vmem:[%s13949_s22 + $0x5a8] sm:$0xff] }
 0x330   : > { %12042 = vmatpush1.bf16.xpose.msra.mxu0 %v13318_v16  ;;  %12082 = vmatpush1.bf16.xpose.msra.mxu1 %v13320_v17  ;;  %v15331_v16 = vrot.slane %v354_v56, %v13970_v24  ;;  %v15334_v17 = vrot.slane %v1970_v59, %v13970_v24  ;;  %v15350_v40 = vrot.slane %v355_v20, %v13970_v24 }
 0x331   : > { %12073 = vmatprep.mubr.bf16.mxu0 %v2818_v18  ;;  %12113 = vmatprep.mubr.bf16.mxu1 %v2820_v22  ;;  %v13331_v18 = vcombine.high %v3035_v4, %v3227_v62 }
 0x332   : > { %v9915_v32 = vpop.f32.mrb[236].mxu0  ;;  %v9955_v33 = vpop.f32.mrb[236].mxu1  ;;  %12121 = vmatprep.subr.bf16.mxu0 %v13323_v26  ;;  %12161 = vmatprep.subr.bf16.mxu1 %v13325_v27  ;;  %v1985_v21 = vcombine.high %v15331_v16, %v15331_v16  ;;  %v1986_v22 = vcombine.high %v15334_v17, %v15334_v17  ;;  %v3229_v27 = vld [vmem:[%s13949_s22 + $0xba0] sm:$0x11]  ;;  %v2829_v59 = vpack.c.bf16 %v15331_v16, %v15331_v16 }
 0x333   : > { %v9916_v35 = vadd.f32 %v9915_v32, %v9876_v19  ;;  %v9917_v36 = vpop.f32.mrb[237].mxu0  ;;  %v9957_v37 = vpop.f32.mrb[237].mxu1  ;;  %v13333_v19 = vcombine.high %v3036_v5, %v3228_v6  ;;  %v2827_v32 = vpack.c.bf16 %v15315_v53, %v15315_v53 }
 0x334   : > { %v9918_v43 = vpop.f32.mrb[238].mxu0  ;;  %v9958_v44 = vpop.f32.mrb[238].mxu1 }
 0x335   : > { %v9956_v48 = vadd.f32 %v9955_v33, %v9916_v35  ;;  %v9919_v49 = vpop.f32.mrb[239].mxu0  ;;  %v9959_v50 = vpop.f32.mrb[239].mxu1  ;;  %v3037_v33 = vld [vmem:[%s13949_s22 + $0x5a0] sm:$0xff]  ;;  %v3230_v35 = vld [vmem:[%s13949_s22 + $0xba8] sm:$0x11]  ;;  %v2830_v44 = vpack.c.bf16 %v1985_v21, %v1985_v21 }
 0x336   : > { %v13335_v47 = vcombine.high %v3037_v33, %v3229_v27  ;;  %v356_v49 = vld [vmem:[%s13942_s12 + $0x2d8] sm:$0xff]  ;;  %v2002_v50 = vcombine.high %v15350_v40, %v15350_v40 }
 0x337   : > { %12074 = vmatmul.mubr.bf16.vlgmr.msra.gmra.mrb[88].mxu0 %v2817_v38  ;;  %12114 = vmatmul.mubr.bf16.vlgmr.msra.gmra.mrb[88].mxu1 %v2819_v39  ;;  %v13330_v38 = vcombine.low %v3035_v4, %v3227_v62  ;;  %v13332_v39 = vcombine.low %v3036_v5, %v3228_v6  ;;  %v3040_v62 = vld [vmem:[%s13949_s22 + $0x5b8] sm:$0xff] }
 0x338   : > { %12122 = vmatpush1.bf16.xpose.msra.mxu0 %v13322_v45  ;;  %12162 = vmatpush1.bf16.xpose.msra.mxu1 %v13324_v46  ;;  %v2832_v45 = vpack.c.bf16 %v1986_v22, %v1986_v22  ;;  %v15353_v46 = vrot.slane %v1987_v23, %v13970_v24  ;;  %v2834_v4 = vpack.c.bf16 %v2002_v50, %v2002_v50 }
 0x339   : > { %12153 = vmatprep.mubr.bf16.mxu0 %v2822_v51  ;;  %12193 = vmatprep.mubr.bf16.mxu1 %v2824_v52  ;;  %v2004_v52 = vcombine.high %v356_v49, %v356_v49  ;;  %v2833_v23 = vpack.c.bf16 %v15350_v40, %v15350_v40 }
 0x33a   : > { %v9995_v60 = vpop.f32.mrb[240].mxu0  ;;  %v10035_v61 = vpop.f32.mrb[240].mxu1  ;;  %12201 = vmatprep.subr.bf16.mxu0 %v13327_v54  ;;  %12241 = vmatprep.subr.bf16.mxu1 %v13329_v55  ;;  %v2003_v51 = vcombine.high %v15353_v46, %v15353_v46  ;;  %v3231_v55 = vld [vmem:[%s13949_s22 + $0xbb0] sm:$0x11] }
 0x33b   : > { %v9996_v63 = vadd.f32 %v9995_v60, %v9956_v48  ;;  %v9997_v0 = vpop.f32.mrb[241].mxu0  ;;  %v10037_v1 = vpop.f32.mrb[241].mxu1  ;;  %v13337_v48 = vcombine.high %v3038_v34, %v3230_v35  ;;  %v2831_v60 = vpack.c.bf16 %v15334_v17, %v15334_v17 }
 0x33c   : > { %v9998_v7 = vpop.f32.mrb[242].mxu0  ;;  %v10038_v8 = vpop.f32.mrb[242].mxu1 }
 0x33d   : > { %v10036_v12 = vadd.f32 %v10035_v61, %v9996_v63  ;;  %v9999_v13 = vpop.f32.mrb[243].mxu0  ;;  %v10039_v14 = vpop.f32.mrb[243].mxu1  ;;  %v3039_v61 = vld [vmem:[%s13949_s22 + $0x5b0] sm:$0xff]  ;;  %v3232_v63 = vld [vmem:[%s13949_s22 + $0xbb8] sm:$0x11]  ;;  %v2836_v8 = vpack.c.bf16 %v2003_v51, %v2003_v51 }
 0x33e   : > { %v357_v13 = vld [vmem:[%s13942_s12 + $0x2e0] sm:$0xff] }
 0x33f   : > { %12154 = vmatmul.mubr.bf16.vlgmr.msra.gmra.mrb[92].mxu0 %v2821_v2  ;;  %12194 = vmatmul.mubr.bf16.vlgmr.msra.gmra.mrb[92].mxu1 %v2823_v3  ;;  %v13334_v2 = vcombine.low %v3037_v33, %v3229_v27  ;;  %v13336_v3 = vcombine.low %v3038_v34, %v3230_v35  ;;  %v2021_v16 = vcombine.high %v357_v13, %v357_v13  ;;  %v3042_v27 = vld [vmem:[%s13949_s22 + $0x5c8] sm:$0xff] }
 0x340   : > { %12202 = vmatpush1.bf16.xpose.msra.mxu0 %v13326_v9  ;;  %12242 = vmatpush1.bf16.xpose.msra.mxu1 %v13328_v10  ;;  %v15369_v9 = vrot.slane %v356_v49, %v13970_v24  ;;  %v15372_v10 = vrot.slane %v2004_v52, %v13970_v24  ;;  %v15388_v33 = vrot.slane %v357_v13, %v13970_v24 }
 0x341   : > { %12233 = vmatprep.mubr.bf16.mxu0 %v2826_v11  ;;  %12273 = vmatprep.mubr.bf16.mxu1 %v2828_v15  ;;  %v13339_v11 = vcombine.high %v3039_v61, %v3231_v55 }
 0x342   : > { %v10075_v25 = vpop.f32.mrb[244].mxu0  ;;  %v10115_v26 = vpop.f32.mrb[244].mxu1  ;;  %12281 = vmatprep.subr.bf16.mxu0 %v13331_v18  ;;  %12321 = vmatprep.subr.bf16.mxu1 %v13333_v19  ;;  %v2019_v14 = vcombine.high %v15369_v9, %v15369_v9  ;;  %v2020_v15 = vcombine.high %v15372_v10, %v15372_v10  ;;  %v3233_v19 = vld [vmem:[%s13949_s22 + $0xbc0] sm:$0x11]  ;;  %v2837_v52 = vpack.c.bf16 %v15369_v9, %v15369_v9 }
 0x343   : > { %v10076_v28 = vadd.f32 %v10075_v25, %v10036_v12  ;;  %v10077_v29 = vpop.f32.mrb[245].mxu0  ;;  %v10117_v30 = vpop.f32.mrb[245].mxu1  ;;  %v13341_v12 = vcombine.high %v3040_v62, %v3232_v63  ;;  %v2835_v25 = vpack.c.bf16 %v15353_v46, %v15353_v46 }
 0x344   : > { %v10078_v36 = vpop.f32.mrb[246].mxu0  ;;  %v10118_v37 = vpop.f32.mrb[246].mxu1 }
 0x345   : > { %v10116_v41 = vadd.f32 %v10115_v26, %v10076_v28  ;;  %v10079_v42 = vpop.f32.mrb[247].mxu0  ;;  %v10119_v43 = vpop.f32.mrb[247].mxu1  ;;  %v3041_v26 = vld [vmem:[%s13949_s22 + $0x5c0] sm:$0xff]  ;;  %v3234_v28 = vld [vmem:[%s13949_s22 + $0xbc8] sm:$0x11]  ;;  %v2838_v37 = vpack.c.bf16 %v2019_v14, %v2019_v14 }
 0x346   : > { %v13343_v40 = vcombine.high %v3041_v26, %v3233_v19  ;;  %v358_v42 = vld [vmem:[%s13942_s12 + $0x2e8] sm:$0xff]  ;;  %v2036_v43 = vcombine.high %v15388_v33, %v15388_v33 }
 0x347   : > { %12234 = vmatmul.mubr.bf16.vlgmr.msra.gmra.mrb[96].mxu0 %v2825_v31  ;;  %12274 = vmatmul.mubr.bf16.vlgmr.msra.gmra.mrb[96].mxu1 %v2827_v32  ;;  %v13338_v31 = vcombine.low %v3039_v61, %v3231_v55  ;;  %v13340_v32 = vcombine.low %v3040_v62, %v3232_v63  ;;  %v3044_v55 = vld [vmem:[%s13949_s22 + $0x5d8] sm:$0xff] }
 0x348   : > { %12282 = vmatpush1.bf16.xpose.msra.mxu0 %v13330_v38  ;;  %12322 = vmatpush1.bf16.xpose.msra.mxu1 %v13332_v39  ;;  %v2840_v38 = vpack.c.bf16 %v2020_v15, %v2020_v15  ;;  %v15391_v39 = vrot.slane %v2021_v16, %v13970_v24  ;;  %v2842_v61 = vpack.c.bf16 %v2036_v43, %v2036_v43 }
 0x349   : > { %12313 = vmatprep.mubr.bf16.mxu0 %v2830_v44  ;;  %12353 = vmatprep.mubr.bf16.mxu1 %v2832_v45  ;;  %v2038_v45 = vcombine.high %v358_v42, %v358_v42  ;;  %v2841_v16 = vpack.c.bf16 %v15388_v33, %v15388_v33 }
 0x34a   : > { %v10155_v53 = vpop.f32.mrb[248].mxu0  ;;  %v10195_v54 = vpop.f32.mrb[248].mxu1  ;;  %12361 = vmatprep.subr.bf16.mxu0 %v13335_v47  ;;  %12401 = vmatprep.subr.bf16.mxu1 %v13337_v48  ;;  %v2037_v44 = vcombine.high %v15391_v39, %v15391_v39  ;;  %v3235_v48 = vld [vmem:[%s13949_s22 + $0xbd0] sm:$0x11] }
 0x34b   : > { %v10156_v56 = vadd.f32 %v10155_v53, %v10116_v41  ;;  %v10157_v57 = vpop.f32.mrb[249].mxu0  ;;  %v10197_v58 = vpop.f32.mrb[249].mxu1  ;;  %v13345_v41 = vcombine.high %v3042_v27, %v3234_v28  ;;  %v2839_v53 = vpack.c.bf16 %v15372_v10, %v15372_v10 }
 0x34c   : > { %v10158_v0 = vpop.f32.mrb[250].mxu0  ;;  %v10198_v1 = vpop.f32.mrb[250].mxu1 }
 0x34d   : > { %v10196_v5 = vadd.f32 %v10195_v54, %v10156_v56  ;;  %v10159_v6 = vpop.f32.mrb[251].mxu0  ;;  %v10199_v7 = vpop.f32.mrb[251].mxu1  ;;  %v3043_v54 = vld [vmem:[%s13949_s22 + $0x5d0] sm:$0xff]  ;;  %v3236_v56 = vld [vmem:[%s13949_s22 + $0xbd8] sm:$0x11]  ;;  %v2844_v1 = vpack.c.bf16 %v2037_v44, %v2037_v44 }
 0x34e   : > { %v359_v6 = vld [vmem:[%s13942_s12 + $0x2f0] sm:$0xff] }
 0x34f   : > { %12314 = vmatmul.mubr.bf16.vlgmr.msra.gmra.mrb[100].mxu0 %v2829_v59  ;;  %12354 = vmatmul.mubr.bf16.vlgmr.msra.gmra.mrb[100].mxu1 %v2831_v60  ;;  %v13342_v59 = vcombine.low %v3041_v26, %v3233_v19  ;;  %v13344_v60 = vcombine.low %v3042_v27, %v3234_v28  ;;  %v2055_v9 = vcombine.high %v359_v6, %v359_v6  ;;  %v3046_v19 = vld [vmem:[%s13949_s22 + $0x5e8] sm:$0xff] }
 0x350   : > { %12362 = vmatpush1.bf16.xpose.msra.mxu0 %v13334_v2  ;;  %12402 = vmatpush1.bf16.xpose.msra.mxu1 %v13336_v3  ;;  %v15407_v2 = vrot.slane %v358_v42, %v13970_v24  ;;  %v15410_v3 = vrot.slane %v2038_v45, %v13970_v24  ;;  %v15426_v26 = vrot.slane %v359_v6, %v13970_v24 }
 0x351   : > { %12393 = vmatprep.mubr.bf16.mxu0 %v2834_v4  ;;  %12433 = vmatprep.mubr.bf16.mxu1 %v2836_v8  ;;  %v13347_v4 = vcombine.high %v3043_v54, %v3235_v48 }
 0x352   : > { %v10235_v17 = vpop.f32.mrb[252].mxu0  ;;  %v10275_v18 = vpop.f32.mrb[252].mxu1  ;;  %12441 = vmatprep.subr.bf16.mxu0 %v13339_v11  ;;  %12481 = vmatprep.subr.bf16.mxu1 %v13341_v12  ;;  %v2053_v7 = vcombine.high %v15407_v2, %v15407_v2  ;;  %v2054_v8 = vcombine.high %v15410_v3, %v15410_v3  ;;  %v3237_v12 = vld [vmem:[%s13949_s22 + $0xbe0] sm:$0x11]  ;;  %v2845_v45 = vpack.c.bf16 %v15407_v2, %v15407_v2 }
 0x353   : > { %v10236_v20 = vadd.f32 %v10235_v17, %v10196_v5  ;;  %v10237_v21 = vpop.f32.mrb[253].mxu0  ;;  %v10277_v22 = vpop.f32.mrb[253].mxu1  ;;  %v13349_v5 = vcombine.high %v3044_v55, %v3236_v56  ;;  %v2843_v17 = vpack.c.bf16 %v15391_v39, %v15391_v39 }
 0x354   : > { %v10238_v29 = vpop.f32.mrb[254].mxu0  ;;  %v10278_v30 = vpop.f32.mrb[254].mxu1 }
 0x355   : > { %v10276_v34 = vadd.f32 %v10275_v18, %v10236_v20  ;;  %v10239_v35 = vpop.f32.mrb[255].mxu0  ;;  %v10279_v36 = vpop.f32.mrb[255].mxu1  ;;  %v3045_v18 = vld [vmem:[%s13949_s22 + $0x5e0] sm:$0xff]  ;;  %v3238_v20 = vld [vmem:[%s13949_s22 + $0xbe8] sm:$0x11]  ;;  %v2846_v30 = vpack.c.bf16 %v2053_v7, %v2053_v7 }
 0x356   : > { %v13351_v33 = vcombine.high %v3045_v18, %v3237_v12  ;;  %v360_v35 = vld [vmem:[%s13942_s12 + $0x2f8] sm:$0xff]  ;;  %v2070_v36 = vcombine.high %v15426_v26, %v15426_v26 }
 0x357   : > { %12394 = vmatmul.mubr.bf16.vlgmr.msra.gmra.mrb[104].mxu0 %v2833_v23  ;;  %12434 = vmatmul.mubr.bf16.vlgmr.msra.gmra.mrb[104].mxu1 %v2835_v25  ;;  %v13346_v23 = vcombine.low %v3043_v54, %v3235_v48  ;;  %v13348_v25 = vcombine.low %v3044_v55, %v3236_v56  ;;  %v3048_v48 = vld [vmem:[%s13949_s22 + $0x5f8] sm:$0xff] }
 0x358   : > { %12442 = vmatpush1.bf16.xpose.msra.mxu0 %v13338_v31  ;;  %12482 = vmatpush1.bf16.xpose.msra.mxu1 %v13340_v32  ;;  %v2848_v31 = vpack.c.bf16 %v2054_v8, %v2054_v8  ;;  %v15429_v32 = vrot.slane %v2055_v9, %v13970_v24  ;;  %v2850_v54 = vpack.c.bf16 %v2070_v36, %v2070_v36 }
 0x359   : > { %12473 = vmatprep.mubr.bf16.mxu0 %v2838_v37  ;;  %12513 = vmatprep.mubr.bf16.mxu1 %v2840_v38  ;;  %v2072_v38 = vcombine.high %v360_v35, %v360_v35 }
 0x35a   : > { %v10315_v46 = vpop.f32.mrb[0].mxu0  ;;  %v10355_v47 = vpop.f32.mrb[0].mxu1  ;;  %12521 = vmatprep.subr.bf16.mxu0 %v13343_v40  ;;  %12561 = vmatprep.subr.bf16.mxu1 %v13345_v41  ;;  %v2071_v37 = vcombine.high %v15429_v32, %v15429_v32  ;;  %v3239_v41 = vld [vmem:[%s13949_s22 + $0xbf0] sm:$0x11]  ;;  %v2851_v6 = vpack.c.bf16 %v15429_v32, %v15429_v32 }
 0x35b   : > { %v10316_v49 = vadd.f32 %v10315_v46, %v10276_v34  ;;  %v10317_v50 = vpop.f32.mrb[1].mxu0  ;;  %v10357_v51 = vpop.f32.mrb[1].mxu1  ;;  %v13353_v34 = vcombine.high %v3046_v19, %v3238_v20  ;;  %v2847_v46 = vpack.c.bf16 %v15410_v3, %v15410_v3 }
 0x35c   : > { %v10318_v57 = vpop.f32.mrb[2].mxu0  ;;  %v10358_v58 = vpop.f32.mrb[2].mxu1 }
 0x35d   : > { %v10356_v62 = vadd.f32 %v10355_v47, %v10316_v49  ;;  %v10319_v63 = vpop.f32.mrb[3].mxu0  ;;  %v10359_v0 = vpop.f32.mrb[3].mxu1  ;;  %v3047_v47 = vld [vmem:[%s13949_s22 + $0x5f0] sm:$0xff]  ;;  %v3240_v49 = vld [vmem:[%s13949_s22 + $0xbf8] sm:$0x11]  ;;  %v2852_v58 = vpack.c.bf16 %v2071_v37, %v2071_v37 }
 0x35e   : > { %v13354_v9 = vcombine.low %v3047_v47, %v3239_v41 }
 0x35f   : > { %12474 = vmatmul.mubr.bf16.vlgmr.msra.gmra.mrb[108].mxu0 %v2837_v52  ;;  %12514 = vmatmul.mubr.bf16.vlgmr.msra.gmra.mrb[108].mxu1 %v2839_v53  ;;  %v13350_v52 = vcombine.low %v3045_v18, %v3237_v12  ;;  %v13352_v53 = vcombine.low %v3046_v19, %v3238_v20 }
 0x360   : > { %12522 = vmatpush1.bf16.xpose.msra.mxu0 %v13342_v59  ;;  %12562 = vmatpush1.bf16.xpose.msra.mxu1 %v13344_v60  ;;  %v2079_v59 = vrot.slane %v360_v35, %v13970_v24  ;;  %v2086_v60 = vrot.slane %v2072_v38, %v13970_v24  ;;  %v2849_v24 = vpack.c.bf16 %v15426_v26, %v15426_v26 }
 0x361   : > { %12553 = vmatprep.mubr.bf16.mxu0 %v2842_v61  ;;  %12593 = vmatprep.mubr.bf16.mxu1 %v2844_v1  ;;  %v13355_v61 = vcombine.high %v3047_v47, %v3239_v41 }
 0x362   : > { %v10395_v10 = vpop.f32.mrb[4].mxu0  ;;  %v10435_v11 = vpop.f32.mrb[4].mxu1  ;;  %12601 = vmatprep.subr.bf16.mxu0 %v13347_v4  ;;  %12641 = vmatprep.subr.bf16.mxu1 %v13349_v5  ;;  %v2087_v63 = vcombine.high %v2079_v59, %v2079_v59  ;;  %v2088_v0 = vcombine.high %v2086_v60, %v2086_v60 }
 0x363   : > { %v10396_v13 = vadd.f32 %v10395_v10, %v10356_v62  ;;  %v10397_v14 = vpop.f32.mrb[5].mxu0  ;;  %v10437_v15 = vpop.f32.mrb[5].mxu1  ;;  %v13357_v62 = vcombine.high %v3048_v48, %v3240_v49  ;;  %v13356_v10 = vcombine.low %v3048_v48, %v3240_v49 }
 0x364   : > { %v10398_v21 = vpop.f32.mrb[6].mxu0  ;;  %v10438_v22 = vpop.f32.mrb[6].mxu1  ;;  %v2854_v14 = vpack.c.bf16 %v2087_v63, %v2087_v63  ;;  %v2856_v15 = vpack.c.bf16 %v2088_v0, %v2088_v0 }
 0x365   : > { %v10436_v27 = vadd.f32 %v10435_v11, %v10396_v13  ;;  %v10399_v28 = vpop.f32.mrb[7].mxu0  ;;  %v10439_v29 = vpop.f32.mrb[7].mxu1  ;;  %v2853_v21 = vpack.c.bf16 %v2079_v59, %v2079_v59  ;;  %v2855_v22 = vpack.c.bf16 %v2086_v60, %v2086_v60 }
 0x367   : > { %12554 = vmatmul.mubr.bf16.vlgmr.msra.gmra.mrb[112].mxu0 %v2841_v16  ;;  %12594 = vmatmul.mubr.bf16.vlgmr.msra.gmra.mrb[112].mxu1 %v2843_v17 }
 0x368   : > { %12602 = vmatpush1.bf16.xpose.msra.mxu0 %v13346_v23  ;;  %12642 = vmatpush1.bf16.xpose.msra.mxu1 %v13348_v25 }
 0x369   : > { %12633 = vmatprep.mubr.bf16.mxu0 %v2846_v30  ;;  %12673 = vmatprep.mubr.bf16.mxu1 %v2848_v31 }
 0x36a   : > { %v10475_v39 = vpop.f32.mrb[8].mxu0  ;;  %v10515_v40 = vpop.f32.mrb[8].mxu1  ;;  %12681 = vmatprep.subr.bf16.mxu0 %v13351_v33  ;;  %12721 = vmatprep.subr.bf16.mxu1 %v13353_v34 }
 0x36b   : > { %v10476_v42 = vadd.f32 %v10475_v39, %v10436_v27  ;;  %v10477_v43 = vpop.f32.mrb[9].mxu0  ;;  %v10517_v44 = vpop.f32.mrb[9].mxu1 }
 0x36c   : > { %v10478_v50 = vpop.f32.mrb[10].mxu0  ;;  %v10518_v51 = vpop.f32.mrb[10].mxu1 }
 0x36d   : > { %v10516_v55 = vadd.f32 %v10515_v40, %v10476_v42  ;;  %v10479_v56 = vpop.f32.mrb[11].mxu0  ;;  %v10519_v57 = vpop.f32.mrb[11].mxu1 }
 0x36f   : > { %12634 = vmatmul.mubr.bf16.vlgmr.msra.gmra.mrb[116].mxu0 %v2845_v45  ;;  %12674 = vmatmul.mubr.bf16.vlgmr.msra.gmra.mrb[116].mxu1 %v2847_v46 }
 0x370   : > { %12682 = vmatpush1.bf16.xpose.msra.mxu0 %v13350_v52  ;;  %12722 = vmatpush1.bf16.xpose.msra.mxu1 %v13352_v53 }
 0x371   : > { %12713 = vmatprep.mubr.bf16.mxu0 %v2850_v54  ;;  %12753 = vmatprep.mubr.bf16.mxu1 %v2852_v58 }
 0x372   : > { %v10555_v1 = vpop.f32.mrb[12].mxu0  ;;  %v10595_v2 = vpop.f32.mrb[12].mxu1  ;;  %12761 = vmatprep.subr.bf16.mxu0 %v13355_v61  ;;  %12801 = vmatprep.subr.bf16.mxu1 %v13357_v62 }
 0x373   : > { %v10556_v3 = vadd.f32 %v10555_v1, %v10516_v55  ;;  %v10557_v4 = vpop.f32.mrb[13].mxu0  ;;  %v10597_v5 = vpop.f32.mrb[13].mxu1 }
 0x374   : > { %v10558_v7 = vpop.f32.mrb[14].mxu0  ;;  %v10598_v8 = vpop.f32.mrb[14].mxu1 }
 0x375   : > { %v10596_v11 = vadd.f32 %v10595_v2, %v10556_v3  ;;  %v10559_v12 = vpop.f32.mrb[15].mxu0  ;;  %v10599_v13 = vpop.f32.mrb[15].mxu1 }
 0x377   : > { %12714 = vmatmul.mubr.bf16.vlgmr.msra.gmra.mrb[120].mxu0 %v2849_v24  ;;  %12754 = vmatmul.mubr.bf16.vlgmr.msra.gmra.mrb[120].mxu1 %v2851_v6 }
 0x378   : > { %12762 = vmatpush1.bf16.xpose.msra.mxu0 %v13354_v9  ;;  %12802 = vmatpush1.bf16.xpose.msra.mxu1 %v13356_v10 }
 0x379   : > { %12793 = vmatprep.mubr.bf16.mxu0 %v2854_v14  ;;  %12833 = vmatprep.mubr.bf16.mxu1 %v2856_v15 }
 0x37a   : > { %v10635_v16 = vpop.f32.mrb[16].mxu0  ;;  %v10675_v17 = vpop.f32.mrb[16].mxu1 }
 0x37b   : > { %v10636_v18 = vadd.f32 %v10635_v16, %v10596_v11  ;;  %v10637_v19 = vpop.f32.mrb[17].mxu0  ;;  %v10677_v20 = vpop.f32.mrb[17].mxu1 }
 0x37c   : > { %v10638_v23 = vpop.f32.mrb[18].mxu0  ;;  %v10678_v25 = vpop.f32.mrb[18].mxu1 }
 0x37d   : > { %v10676_v26 = vadd.f32 %v10675_v17, %v10636_v18  ;;  %v10639_v27 = vpop.f32.mrb[19].mxu0  ;;  %v10679_v28 = vpop.f32.mrb[19].mxu1 }
 0x37f   : > { %12794 = vmatmul.mubr.bf16.vlgmr.msra.gmra.mrb[124].mxu0 %v2853_v21  ;;  %12834 = vmatmul.mubr.bf16.vlgmr.msra.gmra.mrb[124].mxu1 %v2855_v22 }
 0x382   : > { %v10715_v29 = vpop.f32.mrb[20].mxu0  ;;  %v10755_v30 = vpop.f32.mrb[20].mxu1 }
 0x383   : > { %v10716_v31 = vadd.f32 %v10715_v29, %v10676_v26  ;;  %v10717_v32 = vpop.f32.mrb[21].mxu0  ;;  %v10757_v33 = vpop.f32.mrb[21].mxu1 }
 0x384   : > { %v10718_v34 = vpop.f32.mrb[22].mxu0  ;;  %v10758_v35 = vpop.f32.mrb[22].mxu1 }
 0x385   : > { %v10756_v36 = vadd.f32 %v10755_v30, %v10716_v31  ;;  %v10719_v37 = vpop.f32.mrb[23].mxu0  ;;  %v10759_v38 = vpop.f32.mrb[23].mxu1 }
 0x38a   : > { %v10795_v39 = vpop.f32.mrb[24].mxu0  ;;  %v10835_v40 = vpop.f32.mrb[24].mxu1 }
 0x38b   : > { %v10796_v41 = vadd.f32 %v10795_v39, %v10756_v36  ;;  %v10797_v42 = vpop.f32.mrb[25].mxu0  ;;  %v10837_v43 = vpop.f32.mrb[25].mxu1 }
 0x38c   : > { %v10798_v44 = vpop.f32.mrb[26].mxu0  ;;  %v10838_v45 = vpop.f32.mrb[26].mxu1 }
 0x38d   : > { %v10836_v46 = vadd.f32 %v10835_v40, %v10796_v41  ;;  %v10799_v47 = vpop.f32.mrb[27].mxu0  ;;  %v10839_v48 = vpop.f32.mrb[27].mxu1 }
 0x392   : > { %v10875_v49 = vpop.f32.mrb[28].mxu0  ;;  %v10915_v50 = vpop.f32.mrb[28].mxu1 }
 0x393   : > { %v10876_v51 = vadd.f32 %v10875_v49, %v10836_v46  ;;  %v10877_v52 = vpop.f32.mrb[29].mxu0  ;;  %v10917_v53 = vpop.f32.mrb[29].mxu1 }
 0x394   : > { %v10878_v54 = vpop.f32.mrb[30].mxu0  ;;  %v10918_v55 = vpop.f32.mrb[30].mxu1 }
 0x395   : > { %v10916_v56 = vadd.f32 %v10915_v50, %v10876_v51  ;;  %v10879_v57 = vpop.f32.mrb[31].mxu0  ;;  %v10919_v58 = vpop.f32.mrb[31].mxu1 }
 0x39a   : > { %v10955_v59 = vpop.f32.mrb[32].mxu0  ;;  %v10995_v60 = vpop.f32.mrb[32].mxu1 }
 0x39b   : > { %v10956_v61 = vadd.f32 %v10955_v59, %v10916_v56  ;;  %v10957_v62 = vpop.f32.mrb[33].mxu0  ;;  %v10997_v63 = vpop.f32.mrb[33].mxu1 }
 0x39c   : > { %v10958_v0 = vpop.f32.mrb[34].mxu0  ;;  %v10998_v1 = vpop.f32.mrb[34].mxu1 }
 0x39d   : > { %v10996_v2 = vadd.f32 %v10995_v60, %v10956_v61  ;;  %v10959_v3 = vpop.f32.mrb[35].mxu0  ;;  %v10999_v4 = vpop.f32.mrb[35].mxu1 }
 0x3a2   : > { %v11035_v5 = vpop.f32.mrb[36].mxu0  ;;  %v11075_v24 = vpop.f32.mrb[36].mxu1 }
 0x3a3   : > { %v11036_v6 = vadd.f32 %v11035_v5, %v10996_v2  ;;  %v11037_v7 = vpop.f32.mrb[37].mxu0  ;;  %v11077_v8 = vpop.f32.mrb[37].mxu1 }
 0x3a4   : > { %v11038_v9 = vpop.f32.mrb[38].mxu0  ;;  %v11078_v10 = vpop.f32.mrb[38].mxu1 }
 0x3a5   : > { %v11076_v11 = vadd.f32 %v11075_v24, %v11036_v6  ;;  %v11039_v12 = vpop.f32.mrb[39].mxu0  ;;  %v11079_v13 = vpop.f32.mrb[39].mxu1 }
 0x3aa   : > { %v11115_v14 = vpop.f32.mrb[40].mxu0  ;;  %v11155_v15 = vpop.f32.mrb[40].mxu1 }
 0x3ab   : > { %v11116_v16 = vadd.f32 %v11115_v14, %v11076_v11  ;;  %v11117_v17 = vpop.f32.mrb[41].mxu0  ;;  %v11157_v18 = vpop.f32.mrb[41].mxu1 }
 0x3ac   : > { %v11118_v19 = vpop.f32.mrb[42].mxu0  ;;  %v11158_v20 = vpop.f32.mrb[42].mxu1 }
 0x3ad   : > { %v11156_v21 = vadd.f32 %v11155_v15, %v11116_v16  ;;  %v11119_v22 = vpop.f32.mrb[43].mxu0  ;;  %v11159_v23 = vpop.f32.mrb[43].mxu1 }
 0x3b2   : > { %v11195_v25 = vpop.f32.mrb[44].mxu0  ;;  %v11235_v26 = vpop.f32.mrb[44].mxu1 }
 0x3b3   : > { %v11196_v27 = vadd.f32 %v11195_v25, %v11156_v21  ;;  %v11197_v28 = vpop.f32.mrb[45].mxu0  ;;  %v11237_v29 = vpop.f32.mrb[45].mxu1 }
 0x3b4   : > { %v11198_v30 = vpop.f32.mrb[46].mxu0  ;;  %v11238_v31 = vpop.f32.mrb[46].mxu1 }
 0x3b5   : > { %v11236_v32 = vadd.f32 %v11235_v26, %v11196_v27  ;;  %v11199_v33 = vpop.f32.mrb[47].mxu0  ;;  %v11239_v34 = vpop.f32.mrb[47].mxu1 }
 0x3ba   : > { %v11275_v35 = vpop.f32.mrb[48].mxu0  ;;  %v11315_v36 = vpop.f32.mrb[48].mxu1 }
 0x3bb   : > { %v11276_v37 = vadd.f32 %v11275_v35, %v11236_v32  ;;  %v11277_v38 = vpop.f32.mrb[49].mxu0  ;;  %v11317_v39 = vpop.f32.mrb[49].mxu1 }
 0x3bc   : > { %v11278_v40 = vpop.f32.mrb[50].mxu0  ;;  %v11318_v41 = vpop.f32.mrb[50].mxu1 }
 0x3bd   : > { %v11316_v42 = vadd.f32 %v11315_v36, %v11276_v37  ;;  %v11279_v43 = vpop.f32.mrb[51].mxu0  ;;  %v11319_v44 = vpop.f32.mrb[51].mxu1 }
 0x3c2   : > { %v11355_v45 = vpop.f32.mrb[52].mxu0  ;;  %v11395_v46 = vpop.f32.mrb[52].mxu1 }
 0x3c3   : > { %v11356_v47 = vadd.f32 %v11355_v45, %v11316_v42  ;;  %v11357_v48 = vpop.f32.mrb[53].mxu0  ;;  %v11397_v49 = vpop.f32.mrb[53].mxu1 }
 0x3c4   : > { %v11358_v50 = vpop.f32.mrb[54].mxu0  ;;  %v11398_v51 = vpop.f32.mrb[54].mxu1 }
 0x3c5   : > { %v11396_v52 = vadd.f32 %v11395_v46, %v11356_v47  ;;  %v11359_v53 = vpop.f32.mrb[55].mxu0  ;;  %v11399_v54 = vpop.f32.mrb[55].mxu1 }
 0x3ca   : > { %v11435_v55 = vpop.f32.mrb[56].mxu0  ;;  %v11475_v56 = vpop.f32.mrb[56].mxu1 }
 0x3cb   : > { %v11436_v57 = vadd.f32 %v11435_v55, %v11396_v52  ;;  %v11437_v58 = vpop.f32.mrb[57].mxu0  ;;  %v11477_v59 = vpop.f32.mrb[57].mxu1 }
 0x3cc   : > { %v11438_v60 = vpop.f32.mrb[58].mxu0  ;;  %v11478_v61 = vpop.f32.mrb[58].mxu1 }
 0x3cd   : > { %v11476_v62 = vadd.f32 %v11475_v56, %v11436_v57  ;;  %v11439_v63 = vpop.f32.mrb[59].mxu0  ;;  %v11479_v0 = vpop.f32.mrb[59].mxu1 }
 0x3d2   : > { %v11515_v1 = vpop.f32.mrb[60].mxu0  ;;  %v11555_v2 = vpop.f32.mrb[60].mxu1 }
 0x3d3   : > { %v11516_v3 = vadd.f32 %v11515_v1, %v11476_v62  ;;  %v11517_v4 = vpop.f32.mrb[61].mxu0  ;;  %v11557_v5 = vpop.f32.mrb[61].mxu1 }
 0x3d4   : > { %v11518_v24 = vpop.f32.mrb[62].mxu0  ;;  %v11558_v6 = vpop.f32.mrb[62].mxu1 }
 0x3d5   : > { %v11556_v7 = vadd.f32 %v11555_v2, %v11516_v3  ;;  %v11519_v8 = vpop.f32.mrb[63].mxu0  ;;  %v11559_v9 = vpop.f32.mrb[63].mxu1 }
 0x3da   : > { %v11595_v10 = vpop.f32.mrb[64].mxu0  ;;  %v11635_v11 = vpop.f32.mrb[64].mxu1 }
 0x3db   : > { %v11596_v12 = vadd.f32 %v11595_v10, %v11556_v7  ;;  %v11597_v13 = vpop.f32.mrb[65].mxu0  ;;  %v11637_v14 = vpop.f32.mrb[65].mxu1 }
 0x3dc   : > { %v11598_v15 = vpop.f32.mrb[66].mxu0  ;;  %v11638_v16 = vpop.f32.mrb[66].mxu1 }
 0x3dd   : > { %v11636_v17 = vadd.f32 %v11635_v11, %v11596_v12  ;;  %v11599_v18 = vpop.f32.mrb[67].mxu0  ;;  %v11639_v19 = vpop.f32.mrb[67].mxu1 }
 0x3e2   : > { %v11675_v20 = vpop.f32.mrb[68].mxu0  ;;  %v11715_v21 = vpop.f32.mrb[68].mxu1 }
 0x3e3   : > { %v11676_v22 = vadd.f32 %v11675_v20, %v11636_v17  ;;  %v11677_v23 = vpop.f32.mrb[69].mxu0  ;;  %v11717_v25 = vpop.f32.mrb[69].mxu1 }
 0x3e4   : > { %v11678_v26 = vpop.f32.mrb[70].mxu0  ;;  %v11718_v27 = vpop.f32.mrb[70].mxu1 }
 0x3e5   : > { %v11716_v28 = vadd.f32 %v11715_v21, %v11676_v22  ;;  %v11679_v29 = vpop.f32.mrb[71].mxu0  ;;  %v11719_v30 = vpop.f32.mrb[71].mxu1 }
 0x3ea   : > { %v11755_v31 = vpop.f32.mrb[72].mxu0  ;;  %v11795_v32 = vpop.f32.mrb[72].mxu1 }
 0x3eb   : > { %v11756_v33 = vadd.f32 %v11755_v31, %v11716_v28  ;;  %v11757_v34 = vpop.f32.mrb[73].mxu0  ;;  %v11797_v35 = vpop.f32.mrb[73].mxu1 }
 0x3ec   : > { %v11758_v36 = vpop.f32.mrb[74].mxu0  ;;  %v11798_v37 = vpop.f32.mrb[74].mxu1 }
 0x3ed   : > { %v11796_v38 = vadd.f32 %v11795_v32, %v11756_v33  ;;  %v11759_v39 = vpop.f32.mrb[75].mxu0  ;;  %v11799_v40 = vpop.f32.mrb[75].mxu1 }
 0x3f2   : > { %v11835_v41 = vpop.f32.mrb[76].mxu0  ;;  %v11875_v42 = vpop.f32.mrb[76].mxu1 }
 0x3f3   : > { %v11836_v43 = vadd.f32 %v11835_v41, %v11796_v38  ;;  %v11837_v44 = vpop.f32.mrb[77].mxu0  ;;  %v11877_v45 = vpop.f32.mrb[77].mxu1 }
 0x3f4   : > { %v11838_v46 = vpop.f32.mrb[78].mxu0  ;;  %v11878_v47 = vpop.f32.mrb[78].mxu1 }
 0x3f5   : > { %v11876_v48 = vadd.f32 %v11875_v42, %v11836_v43  ;;  %v11839_v49 = vpop.f32.mrb[79].mxu0  ;;  %v11879_v50 = vpop.f32.mrb[79].mxu1 }
 0x3fa   : > { %v11915_v51 = vpop.f32.mrb[80].mxu0  ;;  %v11955_v52 = vpop.f32.mrb[80].mxu1 }
 0x3fb   : > { %v11916_v53 = vadd.f32 %v11915_v51, %v11876_v48  ;;  %v11917_v54 = vpop.f32.mrb[81].mxu0  ;;  %v11957_v55 = vpop.f32.mrb[81].mxu1 }
 0x3fc   : > { %v11918_v56 = vpop.f32.mrb[82].mxu0  ;;  %v11958_v57 = vpop.f32.mrb[82].mxu1 }
 0x3fd   : > { %v11956_v58 = vadd.f32 %v11955_v52, %v11916_v53  ;;  %v11919_v59 = vpop.f32.mrb[83].mxu0  ;;  %v11959_v60 = vpop.f32.mrb[83].mxu1 }
 0x402   : > { %v11995_v61 = vpop.f32.mrb[84].mxu0  ;;  %v12035_v62 = vpop.f32.mrb[84].mxu1 }
 0x403   : > { %v11996_v63 = vadd.f32 %v11995_v61, %v11956_v58  ;;  %v11997_v0 = vpop.f32.mrb[85].mxu0  ;;  %v12037_v1 = vpop.f32.mrb[85].mxu1 }
 0x404   : > { %v11998_v2 = vpop.f32.mrb[86].mxu0  ;;  %v12038_v3 = vpop.f32.mrb[86].mxu1 }
 0x405   : > { %v12036_v4 = vadd.f32 %v12035_v62, %v11996_v63  ;;  %v11999_v5 = vpop.f32.mrb[87].mxu0  ;;  %v12039_v24 = vpop.f32.mrb[87].mxu1 }
 0x40a   : > { %v12075_v6 = vpop.f32.mrb[88].mxu0  ;;  %v12115_v7 = vpop.f32.mrb[88].mxu1 }
 0x40b   : > { %v12076_v8 = vadd.f32 %v12075_v6, %v12036_v4  ;;  %v12077_v9 = vpop.f32.mrb[89].mxu0  ;;  %v12117_v10 = vpop.f32.mrb[89].mxu1 }
 0x40c   : > { %v12078_v11 = vpop.f32.mrb[90].mxu0  ;;  %v12118_v12 = vpop.f32.mrb[90].mxu1 }
 0x40d   : > { %v12116_v13 = vadd.f32 %v12115_v7, %v12076_v8  ;;  %v12079_v14 = vpop.f32.mrb[91].mxu0  ;;  %v12119_v15 = vpop.f32.mrb[91].mxu1 }
 0x412   : > { %v12155_v16 = vpop.f32.mrb[92].mxu0  ;;  %v12195_v17 = vpop.f32.mrb[92].mxu1 }
 0x413   : > { %v12156_v18 = vadd.f32 %v12155_v16, %v12116_v13  ;;  %v12157_v19 = vpop.f32.mrb[93].mxu0  ;;  %v12197_v20 = vpop.f32.mrb[93].mxu1 }
 0x414   : > { %v12158_v21 = vpop.f32.mrb[94].mxu0  ;;  %v12198_v22 = vpop.f32.mrb[94].mxu1 }
 0x415   : > { %v12196_v23 = vadd.f32 %v12195_v17, %v12156_v18  ;;  %v12159_v25 = vpop.f32.mrb[95].mxu0  ;;  %v12199_v26 = vpop.f32.mrb[95].mxu1 }
 0x41a   : > { %v12235_v27 = vpop.f32.mrb[96].mxu0  ;;  %v12275_v28 = vpop.f32.mrb[96].mxu1 }
 0x41b   : > { %v12236_v29 = vadd.f32 %v12235_v27, %v12196_v23  ;;  %v12237_v30 = vpop.f32.mrb[97].mxu0  ;;  %v12277_v31 = vpop.f32.mrb[97].mxu1 }
 0x41c   : > { %v12238_v32 = vpop.f32.mrb[98].mxu0  ;;  %v12278_v33 = vpop.f32.mrb[98].mxu1 }
 0x41d   : > { %v12276_v34 = vadd.f32 %v12275_v28, %v12236_v29  ;;  %v12239_v35 = vpop.f32.mrb[99].mxu0  ;;  %v12279_v36 = vpop.f32.mrb[99].mxu1 }
 0x422   : > { %v12315_v37 = vpop.f32.mrb[100].mxu0  ;;  %v12355_v38 = vpop.f32.mrb[100].mxu1 }
 0x423   : > { %v12316_v39 = vadd.f32 %v12315_v37, %v12276_v34  ;;  %v12317_v40 = vpop.f32.mrb[101].mxu0  ;;  %v12357_v41 = vpop.f32.mrb[101].mxu1 }
 0x424   : > { %v12318_v42 = vpop.f32.mrb[102].mxu0  ;;  %v12358_v43 = vpop.f32.mrb[102].mxu1 }
 0x425   : > { %v12356_v44 = vadd.f32 %v12355_v38, %v12316_v39  ;;  %v12319_v45 = vpop.f32.mrb[103].mxu0  ;;  %v12359_v46 = vpop.f32.mrb[103].mxu1  ;;  %v264_v38 = vld [vmem:[#allocation2] sm:$0x3] }
 0x426   : > { %v13359_v45 = vld [vmem:[#allocation8] ss:$0 sm:$0xff] (!%p13358_p9) }
 0x42a   : > { %v12395_v47 = vpop.f32.mrb[104].mxu0  ;;  %v12435_v48 = vpop.f32.mrb[104].mxu1 }
 0x42b   : > { %v12396_v49 = vadd.f32 %v12395_v47, %v12356_v44  ;;  %v12397_v50 = vpop.f32.mrb[105].mxu0  ;;  %v12437_v51 = vpop.f32.mrb[105].mxu1 }
 0x42c   : > { %v12398_v52 = vpop.f32.mrb[106].mxu0  ;;  %v12438_v53 = vpop.f32.mrb[106].mxu1 }
 0x42d   : > { %v12436_v54 = vadd.f32 %v12435_v48, %v12396_v49  ;;  %v12399_v55 = vpop.f32.mrb[107].mxu0  ;;  %v12439_v56 = vpop.f32.mrb[107].mxu1 }
 0x432   : > { %v12475_v57 = vpop.f32.mrb[108].mxu0  ;;  %v12515_v58 = vpop.f32.mrb[108].mxu1 }
 0x433   : > { %v12476_v59 = vadd.f32 %v12475_v57, %v12436_v54  ;;  %v12477_v60 = vpop.f32.mrb[109].mxu0  ;;  %v12517_v61 = vpop.f32.mrb[109].mxu1 }
 0x434   : > { %v12478_v62 = vpop.f32.mrb[110].mxu0  ;;  %v12518_v63 = vpop.f32.mrb[110].mxu1 }
 0x435   : > { %v12516_v0 = vadd.f32 %v12515_v58, %v12476_v59  ;;  %v12479_v1 = vpop.f32.mrb[111].mxu0  ;;  %v12519_v2 = vpop.f32.mrb[111].mxu1 }
 0x43a   : > { %v12555_v3 = vpop.f32.mrb[112].mxu0  ;;  %v12595_v4 = vpop.f32.mrb[112].mxu1 }
 0x43b   : > { %v12556_v5 = vadd.f32 %v12555_v3, %v12516_v0  ;;  %v12557_v24 = vpop.f32.mrb[113].mxu0  ;;  %v12597_v6 = vpop.f32.mrb[113].mxu1 }
 0x43c   : > { %v12558_v7 = vpop.f32.mrb[114].mxu0  ;;  %v12598_v8 = vpop.f32.mrb[114].mxu1 }
 0x43d   : > { %v12596_v9 = vadd.f32 %v12595_v4, %v12556_v5  ;;  %v12559_v10 = vpop.f32.mrb[115].mxu0  ;;  %v12599_v11 = vpop.f32.mrb[115].mxu1 }
 0x442   : > { %v12635_v12 = vpop.f32.mrb[116].mxu0  ;;  %v12675_v13 = vpop.f32.mrb[116].mxu1 }
 0x443   : > { %v12636_v14 = vadd.f32 %v12635_v12, %v12596_v9  ;;  %v12637_v15 = vpop.f32.mrb[117].mxu0  ;;  %v12677_v16 = vpop.f32.mrb[117].mxu1 }
 0x444   : > { %v12638_v17 = vpop.f32.mrb[118].mxu0  ;;  %v12678_v18 = vpop.f32.mrb[118].mxu1 }
 0x445   : > { %v12676_v19 = vadd.f32 %v12675_v13, %v12636_v14  ;;  %v12639_v20 = vpop.f32.mrb[119].mxu0  ;;  %v12679_v21 = vpop.f32.mrb[119].mxu1 }
 0x44a   : > { %v12715_v22 = vpop.f32.mrb[120].mxu0  ;;  %v12755_v23 = vpop.f32.mrb[120].mxu1 }
 0x44b   : > { %v12716_v25 = vadd.f32 %v12715_v22, %v12676_v19  ;;  %v12717_v26 = vpop.f32.mrb[121].mxu0  ;;  %v12757_v27 = vpop.f32.mrb[121].mxu1 }
 0x44c   : > { %v12718_v28 = vpop.f32.mrb[122].mxu0  ;;  %v12758_v29 = vpop.f32.mrb[122].mxu1 }
 0x44d   : > { %v12756_v30 = vadd.f32 %v12755_v23, %v12716_v25  ;;  %v12719_v31 = vpop.f32.mrb[123].mxu0  ;;  %v12759_v32 = vpop.f32.mrb[123].mxu1 }
 0x452   : > { %v12795_v33 = vpop.f32.mrb[124].mxu0  ;;  %v12835_v34 = vpop.f32.mrb[124].mxu1 }
 0x453   : > { %v12796_v35 = vadd.f32 %v12795_v33, %v12756_v30  ;;  %v12797_v36 = vpop.f32.mrb[125].mxu0  ;;  %v12837_v37 = vpop.f32.mrb[125].mxu1  ;;  %12847 = sbr.rel (%p13358_p9) target bundleno = 1124 (0x464), region = 52 }
 0x454   : > { %v12798_v39 = vpop.f32.mrb[126].mxu0  ;;  %v12838_v40 = vpop.f32.mrb[126].mxu1 }
 0x455   : > { %v12836_v41 = vadd.f32 %v12835_v34, %v12796_v35  ;;  %v12799_v42 = vpop.f32.mrb[127].mxu0  ;;  %v12839_v43 = vpop.f32.mrb[127].mxu1 }
 0x457   : > { %v12841_v44 = vadd.f32 %v12836_v41, %v264_v38 }
 0x459   : > { %12843 = vst.msk [vmem:[#allocation2] sm:$0x3] %vm12842_vm1, %v12841_v44 }
 0x460   : > { %v12854_v46 = vld [vmem:[#allocation2] sm:$0x3] }
 0x461   : > { %v12861_v47 = vadd.f32 %v13359_v45, %v12854_v46 }
 0x463   : > { %12862 = vst.msk [vmem:[#allocation9] sm:$0x3] %vm12842_vm1, %v12861_v47 }
 0x464 PF: > { %p13396_p11 = scmp.eq.s32.totalorder %s13785_s18, 3  ;;  %s13735_s20 = smov [#allocation9]  }
 0x465   : > { %s12870_s21 = sshll.u32 %s13735_s20, 4  ;;  %s12871_s21 = int_to_ptr.vmem [resolvable:$true] %s12870_s21 }
 0x466   : > { %s13637_s28 = scalar_lea.vmem %s12871_s21, 32  ;;  %p13644_p1 = scmp.lt.s32.totalorder %s12871_s21, %s12871_s21 }
 0x467   : > { %p13638_p13 = scmp.ne.s32.totalorder %s12871_s21, %s13637_s28  ;;  %p13645_p0 = scmp.lt.s32.totalorder %s13637_s28, %s13637_s28 }
 0x469   : > { %p13639_p3 = pnand %p13638_p13, %p13396_p11  ;;  %p13646_p8 = por %p13645_p0, %p13644_p1 }
 0x46b   : > { %p13640_p4 = pneg %p13639_p3 }
 0x46d   : > { %p13647_p2 = pnand %p13646_p8, %p13640_p4 }
 0x46f   : > { %13650 = shalt.err (!%p13647_p2)
}
 0x470   : > { %s13651_s7 = scalar_lea.hbm %s15495_s3, 32 }
 0x471   : > { %p13652_p12 = scmp.ne.s32.totalorder %s15495_s3, %s13651_s7  ;;  %p13657_p5 = scmp.lt.u32.totalorder %s13651_s7, %s15495_s3 }
 0x473   : > { %p13653_p7 = pnand %p13652_p12, %p13396_p11 }
 0x475   : > { %p13654_p10 = pneg %p13653_p7 }
 0x477   : > { %p13659_p6 = pnand %p13657_p5, %p13654_p10 }
 0x479   : > { %13662 = shalt.err (!%p13659_p6)
}
 0x47a   : > { %13379 = dma.vmem_to_hbm [thread:$0]  (%p13396_p11), %s12871_s21, 32, %s15495_s3, [#allocation5]  }
 0x47b   : > { %13700 = dma.done.wait (%p13396_p11), [#allocation5], 32  }
 0x47c   : > { %13702 = vsyncadd (%p13396_p11), [#allocation5], 4294967264 }
 0x47d PF: > { %s20_s17 = sadd.s32 1, %s13725_s17   ;;  %s15512_s12 = smov %s13709_s13 }
 0x47e   : > { %p17_p9 = scmp.ge.s32.totalorder %s20_s17, 6   ;;  %s15513_s13 = smov %s13713_s14 }
 0x47f   : > { %s15514_s14 = smov %s13869_s26  ;;  %s15515_s15 = smov %s13721_s16 }
 0x480   : > { %s15516_s16 = smov %s15518_s25  ;;  %19 = sbr.rel (!%p17_p9) target bundleno = 7 (0x7), region = 94 }
 0x487   :  { %12883 = vsyncpa [#allocation4], 1 }
 0x488   :  { %12885 = vsyncpa [#allocation4 + $0x1], 1 }
 0x489   :  { %12886 = vsyncpa [#allocation7], 1 }
 0x48a   :  { %12888 = vsyncpa [#allocation7 + $0x1], 1 }
 0x48b   :  { %12889 = vsyncpa [#allocation5], 1 }
 0x48c   :  { %12891 = vsyncpa [#allocation5 + $0x1], 1 }

</bundles_post_ra>
